<compile_context>
chip_gen: v7x
topology: tpu7x:2x2x1
jax: 0.10.0
libtpu: 0.0.40
codegen_flags: <defaults>
</compile_context>

<pallas_src>
import functools
import math

import jax
import jax.numpy as jnp
from jax.experimental import pallas as pl
from jax.experimental.pallas import tpu as pltpu

GLN_EPS = 1e-8   # Conv-TasNet gLN epsilon
LN_EPS = 1e-5    # LayerNorm epsilon
LANE = 128       # TPU lane width


def _round_up(n, m):
    return ((n + m - 1) // m) * m


# ---------------------------------------------------------------------------
# iota-built selection matrices (constructed inside the kernel; MXU-friendly)
# ---------------------------------------------------------------------------
def _iota2(shape):
    rows = jax.lax.broadcasted_iota(jnp.int32, shape, 0)
    cols = jax.lax.broadcasted_iota(jnp.int32, shape, 1)
    return rows, cols


def _conv_tap_matrix(t_out, t_in, k):
    """A[t, j] = 1 iff j == 2*t + k - 1  (depthwise conv: kernel=4, stride=2, pad=1)."""
    rows, cols = _iota2((t_out, t_in))
    return (cols == 2 * rows + (k - 1)).astype(jnp.float32)


def _upsample2_matrix(t_out, t_in):
    """U[j, t] = 1 iff t == j // 2  (x2 nearest-neighbor upsample)."""
    rows, cols = _iota2((t_out, t_in))
    return jnp.logical_or(2 * cols == rows, 2 * cols + 1 == rows).astype(jnp.float32)


def _avgpool_matrix(t_out, t_in):
    """P[t, j] = 1/f iff t*f <= j < (t+1)*f, f = t_in // t_out (adaptive avg pool)."""
    f = t_in // t_out
    rows, cols = _iota2((t_out, t_in))
    mask = jnp.logical_and(cols >= rows * f, cols < rows * f + f)
    return mask.astype(jnp.float32) * (1.0 / float(f))


# ---------------------------------------------------------------------------
# Fused kernel: one program per batch element
# ---------------------------------------------------------------------------
def _vp_block_kernel(
    alpha_ref,                                    # SMEM (q,) PReLU alphas
    x_ref,                                        # (1, T, Ce_pad) padded input
    proj_w_ref, proj_b_ref, proj_g_ref, proj_bt_ref,
    down_w_ref, down_b_ref, down_g_ref, down_bt_ref,   # stacked over (q-1) stages
    ln_g_ref, ln_b_ref,
    wq_ref, wk_ref, wv_ref, bq_ref, bk_ref, bv_ref,    # per-head 128-aligned blocks
    wo_ref, bo_ref,
    fuse_wg_ref, fuse_bg_ref, fuse_wr_ref, fuse_br_ref,
    back_w_ref, back_b_ref,
    o_ref,                                        # (1, T, Ce_pad)
    *, q, n_heads, t_len, c_hidden,
):
    f32 = jnp.float32
    bf16 = jnp.bfloat16

    def mxu(a, b):
        # bf16 MXU matmul with f32 accumulation.
        return jnp.dot(a.astype(bf16), b.astype(bf16), preferred_element_type=f32)

    def gln(y, gamma, beta, n_valid):
        # Global layer norm over (T, C_real).  Padded lanes of y are zero, so plain sums
        # equal real-channel sums; divide by the REAL element count.  gamma is zero on
        # padded lanes, keeping them zero after normalization.
        s1 = jnp.sum(y)
        s2 = jnp.sum(y * y)
        mean = s1 / n_valid
        var = jnp.maximum(s2 / n_valid - mean * mean, 0.0)
        return (y - mean) * jax.lax.rsqrt(var + GLN_EPS) * gamma + beta

    x_in = x_ref[0]                                           # (T, Ce_pad) f32

    # ---- proj: 1x1 Conv1d (embed -> hidden) + PReLU + gLN --------------------
    h = mxu(x_in, proj_w_ref[...]) + proj_b_ref[...]
    a0 = alpha_ref[0]
    h = jnp.where(h > 0, h, h * a0)                           # PReLU (single parameter)
    h = gln(h, proj_g_ref[...], proj_bt_ref[...], float(t_len * c_hidden))

    # ---- compress: (q-1) depthwise stride-2 conv stages + PReLU + gLN --------
    down_list = [h]
    cur = h
    t_i = t_len
    for i in range(q - 1):
        t_o = t_i // 2
        w = down_w_ref[i]                                     # (4, Ch_pad) depthwise taps
        acc = None
        for k in range(4):                                    # exact time-tap selection
            a_k = _conv_tap_matrix(t_o, t_i, k)
            term = jnp.dot(a_k, cur * w[k:k + 1, :], preferred_element_type=f32)
            acc = term if acc is None else acc + term
        y = acc + down_b_ref[i]
        a_i = alpha_ref[i + 1]
        y = jnp.where(y > 0, y, y * a_i)
        y = gln(y, down_g_ref[i], down_bt_ref[i], float(t_o * c_hidden))
        down_list.append(y)
        cur = y
        t_i = t_o

    # ---- pooled sum of every scale at the coarsest resolution ---------------
    t_c = t_len // (2 ** (q - 1))
    comp = down_list[-1]
    for i in range(q - 1):
        p_mat = _avgpool_matrix(t_c, down_list[i].shape[0])
        comp = comp + jnp.dot(p_mat, down_list[i], preferred_element_type=f32)

    # ---- attention: pre-LN multi-head self-attention + residual -------------
    s1 = jnp.sum(comp, axis=-1, keepdims=True)
    s2 = jnp.sum(comp * comp, axis=-1, keepdims=True)
    mu = s1 / float(c_hidden)
    var = jnp.maximum(s2 / float(c_hidden) - mu * mu, 0.0)
    xn = (comp - mu) * jax.lax.rsqrt(var + LN_EPS) * ln_g_ref[...] + ln_b_ref[...]

    dh = c_hidden // n_heads
    scale = 1.0 / math.sqrt(dh)
    xn_bf = xn.astype(bf16)
    attn = None
    for hh in range(n_heads):                                 # 128-aligned per-head blocks
        qh = jnp.dot(xn_bf, wq_ref[hh].astype(bf16), preferred_element_type=f32) + bq_ref[hh]
        kh = jnp.dot(xn_bf, wk_ref[hh].astype(bf16), preferred_element_type=f32) + bk_ref[hh]
        vh = jnp.dot(xn_bf, wv_ref[hh].astype(bf16), preferred_element_type=f32) + bv_ref[hh]
        s = jax.lax.dot_general(                              # q @ k^T (no explicit .T)
            qh.astype(bf16), kh.astype(bf16),
            dimension_numbers=(((1,), (1,)), ((), ())),
            preferred_element_type=f32) * scale
        s = s - jnp.max(s, axis=-1, keepdims=True)
        p = jnp.exp(s)
        p = p * pl.reciprocal(jnp.sum(p, axis=-1, keepdims=True), approx=True)
        ctx = jnp.dot(p.astype(bf16), vh.astype(bf16), preferred_element_type=f32)
        term = jnp.dot(ctx.astype(bf16), wo_ref[hh].astype(bf16), preferred_element_type=f32)
        attn = term if attn is None else attn + term
    cur = comp + attn + bo_ref[...]                           # residual connection

    # ---- decompress: progressive x2 nearest upsample + gated fusion ---------
    for i in range(q - 2, -1, -1):
        skip = down_list[i]
        u_mat = _upsample2_matrix(skip.shape[0], cur.shape[0])
        g = jnp.dot(u_mat, cur, preferred_element_type=f32)   # in-kernel upsample
        gate = jax.nn.sigmoid(mxu(g, fuse_wg_ref[i]) + fuse_bg_ref[i])
        r = mxu(g, fuse_wr_ref[i]) + fuse_br_ref[i]
        cur = skip * gate + r

    # ---- back projection (hidden -> embed) + block residual -----------------
    out = mxu(cur, back_w_ref[...]) + back_b_ref[...] + x_in
    o_ref[0] = out.astype(o_ref.dtype)


# ---------------------------------------------------------------------------
# Parameters (deterministic synthetic init, stored pre-padded / pre-stacked)
# ---------------------------------------------------------------------------
def init_params(key, embed_dim, hidden_dim, q, n_heads):
    assert q >= 2, "this implementation expects at least one compression stage"
    assert hidden_dim % n_heads == 0

    ce_pad = _round_up(embed_dim, LANE)
    ch_pad = _round_up(hidden_dim, LANE)
    dh = hidden_dim // n_heads
    dh_pad = _round_up(dh, LANE)

    keys = iter(jax.random.split(key, 16))

    def nrm(shape, scale=0.05):
        return (scale * jax.random.normal(next(keys), shape)).astype(jnp.float32)

    def pad_to(a, shape):
        return jnp.pad(a, [(0, t - s) for s, t in zip(a.shape, shape)])

    def ones_row(c_real, c_pad, lead=()):
        return pad_to(jnp.ones(lead + (1, c_real), jnp.float32), lead + (1, c_pad))

    return {
        "meta": {"embed_dim": embed_dim, "hidden_dim": hidden_dim,
                 "q": q, "n_heads": n_heads},
        "alphas": jnp.full((q,), 0.25, jnp.float32),           # nn.PReLU default
        "proj_w": pad_to(nrm((embed_dim, hidden_dim)), (ce_pad, ch_pad)),
        "proj_b": jnp.zeros((1, ch_pad), jnp.float32),
        "proj_gamma": ones_row(hidden_dim, ch_pad),
        "proj_beta": jnp.zeros((1, ch_pad), jnp.float32),
        "down_w": pad_to(nrm((q - 1, 4, hidden_dim)), (q - 1, 4, ch_pad)),
        "down_b": jnp.zeros((q - 1, 1, ch_pad), jnp.float32),
        "down_gamma": pad_to(jnp.ones((q - 1, 1, hidden_dim), jnp.float32),
                             (q - 1, 1, ch_pad)),
        "down_beta": jnp.zeros((q - 1, 1, ch_pad), jnp.float32),
        "ln_g": ones_row(hidden_dim, ch_pad),
        "ln_b": jnp.zeros((1, ch_pad), jnp.float32),
        "wq": pad_to(nrm((n_heads, hidden_dim, dh)), (n_heads, ch_pad, dh_pad)),
        "wk": pad_to(nrm((n_heads, hidden_dim, dh)), (n_heads, ch_pad, dh_pad)),
        "wv": pad_to(nrm((n_heads, hidden_dim, dh)), (n_heads, ch_pad, dh_pad)),
        "bq": jnp.zeros((n_heads, 1, dh_pad), jnp.float32),
        "bk": jnp.zeros((n_heads, 1, dh_pad), jnp.float32),
        "bv": jnp.zeros((n_heads, 1, dh_pad), jnp.float32),
        "wo": pad_to(nrm((n_heads, dh, hidden_dim)), (n_heads, dh_pad, ch_pad)),
        "bo": jnp.zeros((1, ch_pad), jnp.float32),
        "fuse_wg": pad_to(nrm((q - 1, hidden_dim, hidden_dim)), (q - 1, ch_pad, ch_pad)),
        "fuse_bg": jnp.zeros((q - 1, 1, ch_pad), jnp.float32),
        "fuse_wr": pad_to(nrm((q - 1, hidden_dim, hidden_dim)), (q - 1, ch_pad, ch_pad)),
        "fuse_br": jnp.zeros((q - 1, 1, ch_pad), jnp.float32),
        "back_w": pad_to(nrm((hidden_dim, embed_dim)), (ch_pad, ce_pad)),
        "back_b": jnp.zeros((1, ce_pad), jnp.float32),
    }


# ---------------------------------------------------------------------------
# Forward pass: one fused pallas_call, grid = (B,)
# ---------------------------------------------------------------------------
def vp_block_forward(params, x_bct):
    """x_bct: (B, C, T) like the PyTorch module; returns (B, C, T)."""
    meta = params["meta"]
    q, n_heads = meta["q"], meta["n_heads"]
    c_hidden = meta["hidden_dim"]

    B, C, T = x_bct.shape
    assert C == meta["embed_dim"]
    assert T % (2 ** (q - 1)) == 0, "T must be divisible by 2**(q-1)"

    ce_pad = params["proj_w"].shape[0]

    # channel-last, lane-padded to 128 (padded lanes stay exactly zero through the block)
    x = jnp.transpose(x_bct, (0, 2, 1)).astype(jnp.float32)
    x = jnp.pad(x, ((0, 0), (0, 0), (0, ce_pad - C)))

    param_order = [
        params["proj_w"], params["proj_b"], params["proj_gamma"], params["proj_beta"],
        params["down_w"], params["down_b"], params["down_gamma"], params["down_beta"],
        params["ln_g"], params["ln_b"],
        params["wq"], params["wk"], params["wv"],
        params["bq"], params["bk"], params["bv"],
        params["wo"], params["bo"],
        params["fuse_wg"], params["fuse_bg"], params["fuse_wr"], params["fuse_br"],
        params["back_w"], params["back_b"],
    ]

    def rep_spec(a):  # parameter replicated across the batch grid (fetched once)
        return pl.BlockSpec(a.shape, lambda b, n=a.ndim: (0,) * n)

    in_specs = (
        [pl.BlockSpec(memory_space=pltpu.MemorySpace.SMEM)]          # PReLU alphas
        + [pl.BlockSpec((1, T, ce_pad), lambda b: (b, 0, 0))]        # input slab
        + [rep_spec(a) for a in param_order]
    )

    kernel = functools.partial(_vp_block_kernel, q=q, n_heads=n_heads,
                               t_len=T, c_hidden=c_hidden)

    out = pl.pallas_call(
        kernel,
        out_shape=jax.ShapeDtypeStruct((B, T, ce_pad), jnp.float32),
        grid=(B,),
        in_specs=in_specs,
        out_specs=pl.BlockSpec((1, T, ce_pad), lambda b: (b, 0, 0)),
        compiler_params=pltpu.CompilerParams(
            dimension_semantics=("parallel",),                       # both v7x TCs when B>=2
        ),
    )(params["alphas"], x, *param_order)

    out = out[:, :, :C]
    return jnp.transpose(out, (0, 2, 1))                             # back to (B, C, T)


# ---------------------------------------------------------------------------
if __name__ == "__main__":
    # Small shapes consistent with the module: (B, C_v, T) video embeddings.
    B, EMBED, HIDDEN, T, Q, HEADS = 2, 32, 16, 16, 2, 4
    key = jax.random.PRNGKey(0)
    pkey, xkey = jax.random.split(key)

    params = init_params(pkey, EMBED, HIDDEN, Q, HEADS)
    x = jax.random.normal(xkey, (B, EMBED, T), dtype=jnp.float32)

    out = vp_block_forward(params, x)
    out = jax.block_until_ready(out)
    assert out.shape == (B, EMBED, T), out.shape
    assert bool(jnp.all(jnp.isfinite(out)))
    print("KERNEL_OK")
</pallas_src>

<mosaic_0001>
module attributes {stable_mosaic.version = 11 : i64} {
  func.func @_vp_block_kernel(%arg0: i32, %arg1: memref<2xf32, #tpu.memory_space<smem>>, %arg2: memref<1x16x128xf32, #tpu.memory_space<vmem>>, %arg3: memref<128x128xf32, #tpu.memory_space<vmem>>, %arg4: memref<1x128xf32, #tpu.memory_space<vmem>>, %arg5: memref<1x128xf32, #tpu.memory_space<vmem>>, %arg6: memref<1x128xf32, #tpu.memory_space<vmem>>, %arg7: memref<1x4x128xf32, #tpu.memory_space<vmem>>, %arg8: memref<1x1x128xf32, #tpu.memory_space<vmem>>, %arg9: memref<1x1x128xf32, #tpu.memory_space<vmem>>, %arg10: memref<1x1x128xf32, #tpu.memory_space<vmem>>, %arg11: memref<1x128xf32, #tpu.memory_space<vmem>>, %arg12: memref<1x128xf32, #tpu.memory_space<vmem>>, %arg13: memref<4x128x128xf32, #tpu.memory_space<vmem>>, %arg14: memref<4x128x128xf32, #tpu.memory_space<vmem>>, %arg15: memref<4x128x128xf32, #tpu.memory_space<vmem>>, %arg16: memref<4x1x128xf32, #tpu.memory_space<vmem>>, %arg17: memref<4x1x128xf32, #tpu.memory_space<vmem>>, %arg18: memref<4x1x128xf32, #tpu.memory_space<vmem>>, %arg19: memref<4x128x128xf32, #tpu.memory_space<vmem>>, %arg20: memref<1x128xf32, #tpu.memory_space<vmem>>, %arg21: memref<1x128x128xf32, #tpu.memory_space<vmem>>, %arg22: memref<1x1x128xf32, #tpu.memory_space<vmem>>, %arg23: memref<1x128x128xf32, #tpu.memory_space<vmem>>, %arg24: memref<1x1x128xf32, #tpu.memory_space<vmem>>, %arg25: memref<128x128xf32, #tpu.memory_space<vmem>>, %arg26: memref<1x128xf32, #tpu.memory_space<vmem>>, %arg27: memref<1x16x128xf32, #tpu.memory_space<vmem>>) attributes {dimension_semantics = [#tpu.dimension_semantics<parallel>], iteration_bounds = array<i64: 2>, scalar_prefetch = 0 : i64, scratch_operands = 0 : i64, tpu.core_type = #tpu.core_type<tc>, window_params = [{transform_indices = @transform_0, window_bounds = array<i64: 2>}, {transform_indices = @transform_1, window_bounds = array<i64: 1, 16, 128>}, {pipeline_mode = #tpu.pipeline_mode<synchronous>, transform_indices = @transform_2, window_bounds = array<i64: 128, 128>}, {pipeline_mode = #tpu.pipeline_mode<synchronous>, transform_indices = @transform_3, window_bounds = array<i64: 1, 128>}, {pipeline_mode = #tpu.pipeline_mode<synchronous>, transform_indices = @transform_4, window_bounds = array<i64: 1, 128>}, {pipeline_mode = #tpu.pipeline_mode<synchronous>, transform_indices = @transform_5, window_bounds = array<i64: 1, 128>}, {pipeline_mode = #tpu.pipeline_mode<synchronous>, transform_indices = @transform_6, window_bounds = array<i64: 1, 4, 128>}, {pipeline_mode = #tpu.pipeline_mode<synchronous>, transform_indices = @transform_7, window_bounds = array<i64: 1, 1, 128>}, {pipeline_mode = #tpu.pipeline_mode<synchronous>, transform_indices = @transform_8, window_bounds = array<i64: 1, 1, 128>}, {pipeline_mode = #tpu.pipeline_mode<synchronous>, transform_indices = @transform_9, window_bounds = array<i64: 1, 1, 128>}, {pipeline_mode = #tpu.pipeline_mode<synchronous>, transform_indices = @transform_10, window_bounds = array<i64: 1, 128>}, {pipeline_mode = #tpu.pipeline_mode<synchronous>, transform_indices = @transform_11, window_bounds = array<i64: 1, 128>}, {pipeline_mode = #tpu.pipeline_mode<synchronous>, transform_indices = @transform_12, window_bounds = array<i64: 4, 128, 128>}, {pipeline_mode = #tpu.pipeline_mode<synchronous>, transform_indices = @transform_13, window_bounds = array<i64: 4, 128, 128>}, {pipeline_mode = #tpu.pipeline_mode<synchronous>, transform_indices = @transform_14, window_bounds = array<i64: 4, 128, 128>}, {pipeline_mode = #tpu.pipeline_mode<synchronous>, transform_indices = @transform_15, window_bounds = array<i64: 4, 1, 128>}, {pipeline_mode = #tpu.pipeline_mode<synchronous>, transform_indices = @transform_16, window_bounds = array<i64: 4, 1, 128>}, {pipeline_mode = #tpu.pipeline_mode<synchronous>, transform_indices = @transform_17, window_bounds = array<i64: 4, 1, 128>}, {pipeline_mode = #tpu.pipeline_mode<synchronous>, transform_indices = @transform_18, window_bounds = array<i64: 4, 128, 128>}, {pipeline_mode = #tpu.pipeline_mode<synchronous>, transform_indices = @transform_19, window_bounds = array<i64: 1, 128>}, {pipeline_mode = #tpu.pipeline_mode<synchronous>, transform_indices = @transform_20, window_bounds = array<i64: 1, 128, 128>}, {pipeline_mode = #tpu.pipeline_mode<synchronous>, transform_indices = @transform_21, window_bounds = array<i64: 1, 1, 128>}, {pipeline_mode = #tpu.pipeline_mode<synchronous>, transform_indices = @transform_22, window_bounds = array<i64: 1, 128, 128>}, {pipeline_mode = #tpu.pipeline_mode<synchronous>, transform_indices = @transform_23, window_bounds = array<i64: 1, 1, 128>}, {pipeline_mode = #tpu.pipeline_mode<synchronous>, transform_indices = @transform_24, window_bounds = array<i64: 128, 128>}, {pipeline_mode = #tpu.pipeline_mode<synchronous>, transform_indices = @transform_25, window_bounds = array<i64: 1, 128>}, {transform_indices = @transform_26, window_bounds = array<i64: 1, 16, 128>}]} {
    %c0 = arith.constant 0 : index
    %c0_0 = arith.constant 0 : index
    %c0_1 = arith.constant 0 : index
    %0 = vector.load %arg2[%c0, %c0_0, %c0_1] : memref<1x16x128xf32, #tpu.memory_space<vmem>>, vector<1x16x128xf32>
    %1 = vector.shape_cast %0 : vector<1x16x128xf32> to vector<16x128xf32>
    %c0_2 = arith.constant 0 : index
    %c0_3 = arith.constant 0 : index
    %2 = vector.load %arg3[%c0_2, %c0_3] : memref<128x128xf32, #tpu.memory_space<vmem>>, vector<128x128xf32>
    %3 = arith.truncf %1 : vector<16x128xf32> to vector<16x128xbf16>
    %4 = arith.truncf %2 : vector<128x128xf32> to vector<128x128xbf16>
    %cst = arith.constant dense<0.000000e+00> : vector<16x128xf32>
    %5 = tpu.matmul %3, %4, %cst {dimension_numbers = #tpu.dot_dimension_numbers<[1], [0], [0], [1], [0, 0, 1, 1], [], []>} : vector<16x128xbf16>, vector<128x128xbf16>, vector<16x128xf32> -> vector<16x128xf32>
    %c0_4 = arith.constant 0 : index
    %c0_5 = arith.constant 0 : index
    %6 = vector.load %arg4[%c0_4, %c0_5] : memref<1x128xf32, #tpu.memory_space<vmem>>, vector<1x128xf32>
    %7 = vector.broadcast %6 : vector<1x128xf32> to vector<16x128xf32>
    %8 = arith.addf %5, %7 : vector<16x128xf32>
    %c0_6 = arith.constant 0 : index
    %9 = memref.load %arg1[%c0_6] : memref<2xf32, #tpu.memory_space<smem>>
    %cst_7 = arith.constant 0.000000e+00 : f32
    %10 = vector.broadcast %cst_7 : f32 to vector<16x128xf32>
    %11 = arith.cmpf ogt, %8, %10 : vector<16x128xf32>
    %12 = vector.broadcast %9 : f32 to vector<16x128xf32>
    %13 = arith.mulf %8, %12 : vector<16x128xf32>
    %14 = arith.select %11, %8, %13 : vector<16x128xi1>, vector<16x128xf32>
    %c0_8 = arith.constant 0 : index
    %c0_9 = arith.constant 0 : index
    %15 = vector.load %arg5[%c0_8, %c0_9] : memref<1x128xf32, #tpu.memory_space<vmem>>, vector<1x128xf32>
    %c0_10 = arith.constant 0 : index
    %c0_11 = arith.constant 0 : index
    %16 = vector.load %arg6[%c0_10, %c0_11] : memref<1x128xf32, #tpu.memory_space<vmem>>, vector<1x128xf32>
    %17 = vector.shape_cast %14 : vector<16x128xf32> to vector<1x16x128xf32>
    %cst_12 = arith.constant dense<0.000000e+00> : vector<1xf32>
    %18 = vector.multi_reduction <add>, %17, %cst_12 [1, 2] : vector<1x16x128xf32> to vector<1xf32>
    %19 = vector.shape_cast %18 : vector<1xf32> to vector<1x1x1xf32>
    %20 = vector.extract %19[0, 0, 0] : f32 from vector<1x1x1xf32>
    %21 = arith.mulf %14, %14 : vector<16x128xf32>
    %22 = vector.shape_cast %21 : vector<16x128xf32> to vector<1x16x128xf32>
    %cst_13 = arith.constant dense<0.000000e+00> : vector<1xf32>
    %23 = vector.multi_reduction <add>, %22, %cst_13 [1, 2] : vector<1x16x128xf32> to vector<1xf32>
    %24 = vector.shape_cast %23 : vector<1xf32> to vector<1x1x1xf32>
    %25 = vector.extract %24[0, 0, 0] : f32 from vector<1x1x1xf32>
    %cst_14 = arith.constant 2.560000e+02 : f32
    %26 = arith.divf %20, %cst_14 : f32
    %cst_15 = arith.constant 2.560000e+02 : f32
    %27 = arith.divf %25, %cst_15 : f32
    %28 = arith.mulf %26, %26 : f32
    %29 = arith.subf %27, %28 : f32
    %cst_16 = arith.constant 0.000000e+00 : f32
    %30 = arith.maximumf %29, %cst_16 : f32
    %31 = vector.broadcast %26 : f32 to vector<16x128xf32>
    %32 = arith.subf %14, %31 : vector<16x128xf32>
    %cst_17 = arith.constant 9.99999993E-9 : f32
    %33 = arith.addf %30, %cst_17 : f32
    %34 = math.rsqrt %33 : f32
    %35 = vector.broadcast %34 : f32 to vector<16x128xf32>
    %36 = arith.mulf %32, %35 : vector<16x128xf32>
    %37 = vector.broadcast %15 : vector<1x128xf32> to vector<16x128xf32>
    %38 = arith.mulf %36, %37 : vector<16x128xf32>
    %39 = vector.broadcast %16 : vector<1x128xf32> to vector<16x128xf32>
    %40 = arith.addf %38, %39 : vector<16x128xf32>
    %c0_18 = arith.constant 0 : index
    %c0_19 = arith.constant 0 : index
    %c0_20 = arith.constant 0 : index
    %41 = vector.load %arg7[%c0_18, %c0_19, %c0_20] : memref<1x4x128xf32, #tpu.memory_space<vmem>>, vector<1x4x128xf32>
    %42 = vector.shape_cast %41 : vector<1x4x128xf32> to vector<4x128xf32>
    %43 = tpu.iota {dimensions = array<i32: 0>} : vector<8x16xi32>
    %44 = tpu.iota {dimensions = array<i32: 1>} : vector<8x16xi32>
    %c2_i32 = arith.constant 2 : i32
    %45 = vector.broadcast %c2_i32 : i32 to vector<8x16xi32>
    %46 = arith.muli %45, %43 : vector<8x16xi32>
    %c-1_i32 = arith.constant -1 : i32
    %47 = vector.broadcast %c-1_i32 : i32 to vector<8x16xi32>
    %48 = arith.addi %46, %47 : vector<8x16xi32>
    %49 = arith.cmpi eq, %44, %48 : vector<8x16xi32>
    %50 = arith.extui %49 : vector<8x16xi1> to vector<8x16xi32>
    %51 = arith.sitofp %50 : vector<8x16xi32> to vector<8x16xf32>
    %52 = vector.extract_strided_slice %42 {offsets = [0, 0], sizes = [1, 128], strides = [1, 1]} : vector<4x128xf32> to vector<1x128xf32>
    %53 = vector.broadcast %52 : vector<1x128xf32> to vector<16x128xf32>
    %54 = arith.mulf %40, %53 : vector<16x128xf32>
    %cst_21 = arith.constant dense<0.000000e+00> : vector<8x128xf32>
    %55 = tpu.matmul %51, %54, %cst_21 {dimension_numbers = #tpu.dot_dimension_numbers<[1], [0], [0], [1], [0, 0, 1, 1], [], []>} : vector<8x16xf32>, vector<16x128xf32>, vector<8x128xf32> -> vector<8x128xf32>
    %56 = tpu.iota {dimensions = array<i32: 0>} : vector<8x16xi32>
    %57 = tpu.iota {dimensions = array<i32: 1>} : vector<8x16xi32>
    %c2_i32_22 = arith.constant 2 : i32
    %58 = vector.broadcast %c2_i32_22 : i32 to vector<8x16xi32>
    %59 = arith.muli %58, %56 : vector<8x16xi32>
    %c0_i32 = arith.constant 0 : i32
    %60 = vector.broadcast %c0_i32 : i32 to vector<8x16xi32>
    %61 = arith.addi %59, %60 : vector<8x16xi32>
    %62 = arith.cmpi eq, %57, %61 : vector<8x16xi32>
    %63 = arith.extui %62 : vector<8x16xi1> to vector<8x16xi32>
    %64 = arith.sitofp %63 : vector<8x16xi32> to vector<8x16xf32>
    %65 = vector.extract_strided_slice %42 {offsets = [1, 0], sizes = [1, 128], strides = [1, 1]} : vector<4x128xf32> to vector<1x128xf32>
    %66 = vector.broadcast %65 : vector<1x128xf32> to vector<16x128xf32>
    %67 = arith.mulf %40, %66 : vector<16x128xf32>
    %cst_23 = arith.constant dense<0.000000e+00> : vector<8x128xf32>
    %68 = tpu.matmul %64, %67, %cst_23 {dimension_numbers = #tpu.dot_dimension_numbers<[1], [0], [0], [1], [0, 0, 1, 1], [], []>} : vector<8x16xf32>, vector<16x128xf32>, vector<8x128xf32> -> vector<8x128xf32>
    %69 = arith.addf %55, %68 : vector<8x128xf32>
    %70 = tpu.iota {dimensions = array<i32: 0>} : vector<8x16xi32>
    %71 = tpu.iota {dimensions = array<i32: 1>} : vector<8x16xi32>
    %c2_i32_24 = arith.constant 2 : i32
    %72 = vector.broadcast %c2_i32_24 : i32 to vector<8x16xi32>
    %73 = arith.muli %72, %70 : vector<8x16xi32>
    %c1_i32 = arith.constant 1 : i32
    %74 = vector.broadcast %c1_i32 : i32 to vector<8x16xi32>
    %75 = arith.addi %73, %74 : vector<8x16xi32>
    %76 = arith.cmpi eq, %71, %75 : vector<8x16xi32>
    %77 = arith.extui %76 : vector<8x16xi1> to vector<8x16xi32>
    %78 = arith.sitofp %77 : vector<8x16xi32> to vector<8x16xf32>
    %79 = vector.extract_strided_slice %42 {offsets = [2, 0], sizes = [1, 128], strides = [1, 1]} : vector<4x128xf32> to vector<1x128xf32>
    %80 = vector.broadcast %79 : vector<1x128xf32> to vector<16x128xf32>
    %81 = arith.mulf %40, %80 : vector<16x128xf32>
    %cst_25 = arith.constant dense<0.000000e+00> : vector<8x128xf32>
    %82 = tpu.matmul %78, %81, %cst_25 {dimension_numbers = #tpu.dot_dimension_numbers<[1], [0], [0], [1], [0, 0, 1, 1], [], []>} : vector<8x16xf32>, vector<16x128xf32>, vector<8x128xf32> -> vector<8x128xf32>
    %83 = arith.addf %69, %82 : vector<8x128xf32>
    %84 = tpu.iota {dimensions = array<i32: 0>} : vector<8x16xi32>
    %85 = tpu.iota {dimensions = array<i32: 1>} : vector<8x16xi32>
    %c2_i32_26 = arith.constant 2 : i32
    %86 = vector.broadcast %c2_i32_26 : i32 to vector<8x16xi32>
    %87 = arith.muli %86, %84 : vector<8x16xi32>
    %c2_i32_27 = arith.constant 2 : i32
    %88 = vector.broadcast %c2_i32_27 : i32 to vector<8x16xi32>
    %89 = arith.addi %87, %88 : vector<8x16xi32>
    %90 = arith.cmpi eq, %85, %89 : vector<8x16xi32>
    %91 = arith.extui %90 : vector<8x16xi1> to vector<8x16xi32>
    %92 = arith.sitofp %91 : vector<8x16xi32> to vector<8x16xf32>
    %93 = vector.extract_strided_slice %42 {offsets = [3, 0], sizes = [1, 128], strides = [1, 1]} : vector<4x128xf32> to vector<1x128xf32>
    %94 = vector.broadcast %93 : vector<1x128xf32> to vector<16x128xf32>
    %95 = arith.mulf %40, %94 : vector<16x128xf32>
    %cst_28 = arith.constant dense<0.000000e+00> : vector<8x128xf32>
    %96 = tpu.matmul %92, %95, %cst_28 {dimension_numbers = #tpu.dot_dimension_numbers<[1], [0], [0], [1], [0, 0, 1, 1], [], []>} : vector<8x16xf32>, vector<16x128xf32>, vector<8x128xf32> -> vector<8x128xf32>
    %97 = arith.addf %83, %96 : vector<8x128xf32>
    %c0_29 = arith.constant 0 : index
    %c0_30 = arith.constant 0 : index
    %c0_31 = arith.constant 0 : index
    %98 = vector.load %arg8[%c0_29, %c0_30, %c0_31] : memref<1x1x128xf32, #tpu.memory_space<vmem>>, vector<1x1x128xf32>
    %99 = vector.shape_cast %98 : vector<1x1x128xf32> to vector<1x128xf32>
    %100 = vector.broadcast %99 : vector<1x128xf32> to vector<8x128xf32>
    %101 = arith.addf %97, %100 : vector<8x128xf32>
    %c1 = arith.constant 1 : index
    %102 = memref.load %arg1[%c1] : memref<2xf32, #tpu.memory_space<smem>>
    %cst_32 = arith.constant 0.000000e+00 : f32
    %103 = vector.broadcast %cst_32 : f32 to vector<8x128xf32>
    %104 = arith.cmpf ogt, %101, %103 : vector<8x128xf32>
    %105 = vector.broadcast %102 : f32 to vector<8x128xf32>
    %106 = arith.mulf %101, %105 : vector<8x128xf32>
    %107 = arith.select %104, %101, %106 : vector<8x128xi1>, vector<8x128xf32>
    %c0_33 = arith.constant 0 : index
    %c0_34 = arith.constant 0 : index
    %c0_35 = arith.constant 0 : index
    %108 = vector.load %arg9[%c0_33, %c0_34, %c0_35] : memref<1x1x128xf32, #tpu.memory_space<vmem>>, vector<1x1x128xf32>
    %109 = vector.shape_cast %108 : vector<1x1x128xf32> to vector<1x128xf32>
    %c0_36 = arith.constant 0 : index
    %c0_37 = arith.constant 0 : index
    %c0_38 = arith.constant 0 : index
    %110 = vector.load %arg10[%c0_36, %c0_37, %c0_38] : memref<1x1x128xf32, #tpu.memory_space<vmem>>, vector<1x1x128xf32>
    %111 = vector.shape_cast %110 : vector<1x1x128xf32> to vector<1x128xf32>
    %112 = vector.shape_cast %107 : vector<8x128xf32> to vector<1x8x128xf32>
    %cst_39 = arith.constant dense<0.000000e+00> : vector<1xf32>
    %113 = vector.multi_reduction <add>, %112, %cst_39 [1, 2] : vector<1x8x128xf32> to vector<1xf32>
    %114 = vector.shape_cast %113 : vector<1xf32> to vector<1x1x1xf32>
    %115 = vector.extract %114[0, 0, 0] : f32 from vector<1x1x1xf32>
    %116 = arith.mulf %107, %107 : vector<8x128xf32>
    %117 = vector.shape_cast %116 : vector<8x128xf32> to vector<1x8x128xf32>
    %cst_40 = arith.constant dense<0.000000e+00> : vector<1xf32>
    %118 = vector.multi_reduction <add>, %117, %cst_40 [1, 2] : vector<1x8x128xf32> to vector<1xf32>
    %119 = vector.shape_cast %118 : vector<1xf32> to vector<1x1x1xf32>
    %120 = vector.extract %119[0, 0, 0] : f32 from vector<1x1x1xf32>
    %cst_41 = arith.constant 1.280000e+02 : f32
    %121 = arith.divf %115, %cst_41 : f32
    %cst_42 = arith.constant 1.280000e+02 : f32
    %122 = arith.divf %120, %cst_42 : f32
    %123 = arith.mulf %121, %121 : f32
    %124 = arith.subf %122, %123 : f32
    %cst_43 = arith.constant 0.000000e+00 : f32
    %125 = arith.maximumf %124, %cst_43 : f32
    %126 = vector.broadcast %121 : f32 to vector<8x128xf32>
    %127 = arith.subf %107, %126 : vector<8x128xf32>
    %cst_44 = arith.constant 9.99999993E-9 : f32
    %128 = arith.addf %125, %cst_44 : f32
    %129 = math.rsqrt %128 : f32
    %130 = vector.broadcast %129 : f32 to vector<8x128xf32>
    %131 = arith.mulf %127, %130 : vector<8x128xf32>
    %132 = vector.broadcast %109 : vector<1x128xf32> to vector<8x128xf32>
    %133 = arith.mulf %131, %132 : vector<8x128xf32>
    %134 = vector.broadcast %111 : vector<1x128xf32> to vector<8x128xf32>
    %135 = arith.addf %133, %134 : vector<8x128xf32>
    %136 = tpu.iota {dimensions = array<i32: 0>} : vector<8x16xi32>
    %137 = tpu.iota {dimensions = array<i32: 1>} : vector<8x16xi32>
    %c2_i32_45 = arith.constant 2 : i32
    %138 = vector.broadcast %c2_i32_45 : i32 to vector<8x16xi32>
    %139 = arith.muli %136, %138 : vector<8x16xi32>
    %140 = arith.cmpi sge, %137, %139 : vector<8x16xi32>
    %c2_i32_46 = arith.constant 2 : i32
    %141 = vector.broadcast %c2_i32_46 : i32 to vector<8x16xi32>
    %142 = arith.muli %136, %141 : vector<8x16xi32>
    %c2_i32_47 = arith.constant 2 : i32
    %143 = vector.broadcast %c2_i32_47 : i32 to vector<8x16xi32>
    %144 = arith.addi %142, %143 : vector<8x16xi32>
    %145 = arith.cmpi slt, %137, %144 : vector<8x16xi32>
    %146 = arith.andi %140, %145 : vector<8x16xi1>
    %147 = arith.extui %146 : vector<8x16xi1> to vector<8x16xi32>
    %148 = arith.sitofp %147 : vector<8x16xi32> to vector<8x16xf32>
    %cst_48 = arith.constant 5.000000e-01 : f32
    %149 = vector.broadcast %cst_48 : f32 to vector<8x16xf32>
    %150 = arith.mulf %148, %149 : vector<8x16xf32>
    %cst_49 = arith.constant dense<0.000000e+00> : vector<8x128xf32>
    %151 = tpu.matmul %150, %40, %cst_49 {dimension_numbers = #tpu.dot_dimension_numbers<[1], [0], [0], [1], [0, 0, 1, 1], [], []>} : vector<8x16xf32>, vector<16x128xf32>, vector<8x128xf32> -> vector<8x128xf32>
    %152 = arith.addf %135, %151 : vector<8x128xf32>
    %cst_50 = arith.constant dense<0.000000e+00> : vector<8xf32>
    %153 = vector.multi_reduction <add>, %152, %cst_50 [1] : vector<8x128xf32> to vector<8xf32>
    %154 = vector.shape_cast %153 : vector<8xf32> to vector<8x1xf32>
    %155 = arith.mulf %152, %152 : vector<8x128xf32>
    %cst_51 = arith.constant dense<0.000000e+00> : vector<8xf32>
    %156 = vector.multi_reduction <add>, %155, %cst_51 [1] : vector<8x128xf32> to vector<8xf32>
    %157 = vector.shape_cast %156 : vector<8xf32> to vector<8x1xf32>
    %cst_52 = arith.constant 1.600000e+01 : f32
    %158 = vector.broadcast %cst_52 : f32 to vector<8x1xf32>
    %159 = arith.divf %154, %158 : vector<8x1xf32>
    %cst_53 = arith.constant 1.600000e+01 : f32
    %160 = vector.broadcast %cst_53 : f32 to vector<8x1xf32>
    %161 = arith.divf %157, %160 : vector<8x1xf32>
    %162 = arith.mulf %159, %159 : vector<8x1xf32>
    %163 = arith.subf %161, %162 : vector<8x1xf32>
    %cst_54 = arith.constant 0.000000e+00 : f32
    %164 = vector.broadcast %cst_54 : f32 to vector<8x1xf32>
    %165 = arith.maximumf %163, %164 : vector<8x1xf32>
    %166 = vector.broadcast %159 : vector<8x1xf32> to vector<8x128xf32>
    %167 = arith.subf %152, %166 : vector<8x128xf32>
    %cst_55 = arith.constant 9.99999974E-6 : f32
    %168 = vector.broadcast %cst_55 : f32 to vector<8x1xf32>
    %169 = arith.addf %165, %168 : vector<8x1xf32>
    %170 = math.rsqrt %169 : vector<8x1xf32>
    %171 = vector.broadcast %170 : vector<8x1xf32> to vector<8x128xf32>
    %172 = arith.mulf %167, %171 : vector<8x128xf32>
    %c0_56 = arith.constant 0 : index
    %c0_57 = arith.constant 0 : index
    %173 = vector.load %arg11[%c0_56, %c0_57] : memref<1x128xf32, #tpu.memory_space<vmem>>, vector<1x128xf32>
    %174 = vector.broadcast %173 : vector<1x128xf32> to vector<8x128xf32>
    %175 = arith.mulf %172, %174 : vector<8x128xf32>
    %c0_58 = arith.constant 0 : index
    %c0_59 = arith.constant 0 : index
    %176 = vector.load %arg12[%c0_58, %c0_59] : memref<1x128xf32, #tpu.memory_space<vmem>>, vector<1x128xf32>
    %177 = vector.broadcast %176 : vector<1x128xf32> to vector<8x128xf32>
    %178 = arith.addf %175, %177 : vector<8x128xf32>
    %179 = arith.truncf %178 : vector<8x128xf32> to vector<8x128xbf16>
    %c0_60 = arith.constant 0 : index
    %c0_61 = arith.constant 0 : index
    %c0_62 = arith.constant 0 : index
    %180 = vector.load %arg13[%c0_60, %c0_61, %c0_62] : memref<4x128x128xf32, #tpu.memory_space<vmem>>, vector<1x128x128xf32>
    %181 = vector.shape_cast %180 : vector<1x128x128xf32> to vector<128x128xf32>
    %182 = arith.truncf %181 : vector<128x128xf32> to vector<128x128xbf16>
    %cst_63 = arith.constant dense<0.000000e+00> : vector<8x128xf32>
    %183 = tpu.matmul %179, %182, %cst_63 {dimension_numbers = #tpu.dot_dimension_numbers<[1], [0], [0], [1], [0, 0, 1, 1], [], []>} : vector<8x128xbf16>, vector<128x128xbf16>, vector<8x128xf32> -> vector<8x128xf32>
    %c0_64 = arith.constant 0 : index
    %c0_65 = arith.constant 0 : index
    %c0_66 = arith.constant 0 : index
    %184 = vector.load %arg16[%c0_64, %c0_65, %c0_66] : memref<4x1x128xf32, #tpu.memory_space<vmem>>, vector<1x1x128xf32>
    %185 = vector.shape_cast %184 : vector<1x1x128xf32> to vector<1x128xf32>
    %186 = vector.broadcast %185 : vector<1x128xf32> to vector<8x128xf32>
    %187 = arith.addf %183, %186 : vector<8x128xf32>
    %c0_67 = arith.constant 0 : index
    %c0_68 = arith.constant 0 : index
    %c0_69 = arith.constant 0 : index
    %188 = vector.load %arg14[%c0_67, %c0_68, %c0_69] : memref<4x128x128xf32, #tpu.memory_space<vmem>>, vector<1x128x128xf32>
    %189 = vector.shape_cast %188 : vector<1x128x128xf32> to vector<128x128xf32>
    %190 = arith.truncf %189 : vector<128x128xf32> to vector<128x128xbf16>
    %cst_70 = arith.constant dense<0.000000e+00> : vector<8x128xf32>
    %191 = tpu.matmul %179, %190, %cst_70 {dimension_numbers = #tpu.dot_dimension_numbers<[1], [0], [0], [1], [0, 0, 1, 1], [], []>} : vector<8x128xbf16>, vector<128x128xbf16>, vector<8x128xf32> -> vector<8x128xf32>
    %c0_71 = arith.constant 0 : index
    %c0_72 = arith.constant 0 : index
    %c0_73 = arith.constant 0 : index
    %192 = vector.load %arg17[%c0_71, %c0_72, %c0_73] : memref<4x1x128xf32, #tpu.memory_space<vmem>>, vector<1x1x128xf32>
    %193 = vector.shape_cast %192 : vector<1x1x128xf32> to vector<1x128xf32>
    %194 = vector.broadcast %193 : vector<1x128xf32> to vector<8x128xf32>
    %195 = arith.addf %191, %194 : vector<8x128xf32>
    %c0_74 = arith.constant 0 : index
    %c0_75 = arith.constant 0 : index
    %c0_76 = arith.constant 0 : index
    %196 = vector.load %arg15[%c0_74, %c0_75, %c0_76] : memref<4x128x128xf32, #tpu.memory_space<vmem>>, vector<1x128x128xf32>
    %197 = vector.shape_cast %196 : vector<1x128x128xf32> to vector<128x128xf32>
    %198 = arith.truncf %197 : vector<128x128xf32> to vector<128x128xbf16>
    %cst_77 = arith.constant dense<0.000000e+00> : vector<8x128xf32>
    %199 = tpu.matmul %179, %198, %cst_77 {dimension_numbers = #tpu.dot_dimension_numbers<[1], [0], [0], [1], [0, 0, 1, 1], [], []>} : vector<8x128xbf16>, vector<128x128xbf16>, vector<8x128xf32> -> vector<8x128xf32>
    %c0_78 = arith.constant 0 : index
    %c0_79 = arith.constant 0 : index
    %c0_80 = arith.constant 0 : index
    %200 = vector.load %arg18[%c0_78, %c0_79, %c0_80] : memref<4x1x128xf32, #tpu.memory_space<vmem>>, vector<1x1x128xf32>
    %201 = vector.shape_cast %200 : vector<1x1x128xf32> to vector<1x128xf32>
    %202 = vector.broadcast %201 : vector<1x128xf32> to vector<8x128xf32>
    %203 = arith.addf %199, %202 : vector<8x128xf32>
    %204 = arith.truncf %187 : vector<8x128xf32> to vector<8x128xbf16>
    %205 = arith.truncf %195 : vector<8x128xf32> to vector<8x128xbf16>
    %cst_81 = arith.constant dense<0.000000e+00> : vector<8x8xf32>
    %206 = tpu.matmul %204, %205, %cst_81 {dimension_numbers = #tpu.dot_dimension_numbers<[1], [1], [0], [0], [0, 0, 1, 0], [], []>} : vector<8x128xbf16>, vector<8x128xbf16>, vector<8x8xf32> -> vector<8x8xf32>
    %cst_82 = arith.constant 5.000000e-01 : f32
    %207 = vector.broadcast %cst_82 : f32 to vector<8x8xf32>
    %208 = arith.mulf %206, %207 : vector<8x8xf32>
    %cst_83 = arith.constant dense<0xFF800000> : vector<8xf32>
    %209 = vector.multi_reduction <maximumf>, %208, %cst_83 [1] : vector<8x8xf32> to vector<8xf32>
    %210 = vector.shape_cast %209 : vector<8xf32> to vector<8x1xf32>
    %211 = vector.broadcast %210 : vector<8x1xf32> to vector<8x8xf32>
    %212 = arith.subf %208, %211 : vector<8x8xf32>
    %213 = math.exp %212 : vector<8x8xf32>
    %cst_84 = arith.constant dense<0.000000e+00> : vector<8xf32>
    %214 = vector.multi_reduction <add>, %213, %cst_84 [1] : vector<8x8xf32> to vector<8xf32>
    %215 = vector.shape_cast %214 : vector<8xf32> to vector<8x1xf32>
    %216 = tpu.reciprocal %215 {approx = true} : vector<8x1xf32> -> vector<8x1xf32>
    %217 = vector.broadcast %216 : vector<8x1xf32> to vector<8x8xf32>
    %218 = arith.mulf %213, %217 : vector<8x8xf32>
    %219 = arith.truncf %218 : vector<8x8xf32> to vector<8x8xbf16>
    %220 = arith.truncf %203 : vector<8x128xf32> to vector<8x128xbf16>
    %cst_85 = arith.constant dense<0.000000e+00> : vector<8x128xf32>
    %221 = tpu.matmul %219, %220, %cst_85 {dimension_numbers = #tpu.dot_dimension_numbers<[1], [0], [0], [1], [0, 0, 1, 1], [], []>} : vector<8x8xbf16>, vector<8x128xbf16>, vector<8x128xf32> -> vector<8x128xf32>
    %222 = arith.truncf %221 : vector<8x128xf32> to vector<8x128xbf16>
    %c0_86 = arith.constant 0 : index
    %c0_87 = arith.constant 0 : index
    %c0_88 = arith.constant 0 : index
    %223 = vector.load %arg19[%c0_86, %c0_87, %c0_88] : memref<4x128x128xf32, #tpu.memory_space<vmem>>, vector<1x128x128xf32>
    %224 = vector.shape_cast %223 : vector<1x128x128xf32> to vector<128x128xf32>
    %225 = arith.truncf %224 : vector<128x128xf32> to vector<128x128xbf16>
    %cst_89 = arith.constant dense<0.000000e+00> : vector<8x128xf32>
    %226 = tpu.matmul %222, %225, %cst_89 {dimension_numbers = #tpu.dot_dimension_numbers<[1], [0], [0], [1], [0, 0, 1, 1], [], []>} : vector<8x128xbf16>, vector<128x128xbf16>, vector<8x128xf32> -> vector<8x128xf32>
    %c1_90 = arith.constant 1 : index
    %c0_91 = arith.constant 0 : index
    %c0_92 = arith.constant 0 : index
    %227 = vector.load %arg13[%c1_90, %c0_91, %c0_92] : memref<4x128x128xf32, #tpu.memory_space<vmem>>, vector<1x128x128xf32>
    %228 = vector.shape_cast %227 : vector<1x128x128xf32> to vector<128x128xf32>
    %229 = arith.truncf %228 : vector<128x128xf32> to vector<128x128xbf16>
    %cst_93 = arith.constant dense<0.000000e+00> : vector<8x128xf32>
    %230 = tpu.matmul %179, %229, %cst_93 {dimension_numbers = #tpu.dot_dimension_numbers<[1], [0], [0], [1], [0, 0, 1, 1], [], []>} : vector<8x128xbf16>, vector<128x128xbf16>, vector<8x128xf32> -> vector<8x128xf32>
    %c1_94 = arith.constant 1 : index
    %c0_95 = arith.constant 0 : index
    %c0_96 = arith.constant 0 : index
    %231 = vector.load %arg16[%c1_94, %c0_95, %c0_96] : memref<4x1x128xf32, #tpu.memory_space<vmem>>, vector<1x1x128xf32>
    %232 = vector.shape_cast %231 : vector<1x1x128xf32> to vector<1x128xf32>
    %233 = vector.broadcast %232 : vector<1x128xf32> to vector<8x128xf32>
    %234 = arith.addf %230, %233 : vector<8x128xf32>
    %c1_97 = arith.constant 1 : index
    %c0_98 = arith.constant 0 : index
    %c0_99 = arith.constant 0 : index
    %235 = vector.load %arg14[%c1_97, %c0_98, %c0_99] : memref<4x128x128xf32, #tpu.memory_space<vmem>>, vector<1x128x128xf32>
    %236 = vector.shape_cast %235 : vector<1x128x128xf32> to vector<128x128xf32>
    %237 = arith.truncf %236 : vector<128x128xf32> to vector<128x128xbf16>
    %cst_100 = arith.constant dense<0.000000e+00> : vector<8x128xf32>
    %238 = tpu.matmul %179, %237, %cst_100 {dimension_numbers = #tpu.dot_dimension_numbers<[1], [0], [0], [1], [0, 0, 1, 1], [], []>} : vector<8x128xbf16>, vector<128x128xbf16>, vector<8x128xf32> -> vector<8x128xf32>
    %c1_101 = arith.constant 1 : index
    %c0_102 = arith.constant 0 : index
    %c0_103 = arith.constant 0 : index
    %239 = vector.load %arg17[%c1_101, %c0_102, %c0_103] : memref<4x1x128xf32, #tpu.memory_space<vmem>>, vector<1x1x128xf32>
    %240 = vector.shape_cast %239 : vector<1x1x128xf32> to vector<1x128xf32>
    %241 = vector.broadcast %240 : vector<1x128xf32> to vector<8x128xf32>
    %242 = arith.addf %238, %241 : vector<8x128xf32>
    %c1_104 = arith.constant 1 : index
    %c0_105 = arith.constant 0 : index
    %c0_106 = arith.constant 0 : index
    %243 = vector.load %arg15[%c1_104, %c0_105, %c0_106] : memref<4x128x128xf32, #tpu.memory_space<vmem>>, vector<1x128x128xf32>
    %244 = vector.shape_cast %243 : vector<1x128x128xf32> to vector<128x128xf32>
    %245 = arith.truncf %244 : vector<128x128xf32> to vector<128x128xbf16>
    %cst_107 = arith.constant dense<0.000000e+00> : vector<8x128xf32>
    %246 = tpu.matmul %179, %245, %cst_107 {dimension_numbers = #tpu.dot_dimension_numbers<[1], [0], [0], [1], [0, 0, 1, 1], [], []>} : vector<8x128xbf16>, vector<128x128xbf16>, vector<8x128xf32> -> vector<8x128xf32>
    %c1_108 = arith.constant 1 : index
    %c0_109 = arith.constant 0 : index
    %c0_110 = arith.constant 0 : index
    %247 = vector.load %arg18[%c1_108, %c0_109, %c0_110] : memref<4x1x128xf32, #tpu.memory_space<vmem>>, vector<1x1x128xf32>
    %248 = vector.shape_cast %247 : vector<1x1x128xf32> to vector<1x128xf32>
    %249 = vector.broadcast %248 : vector<1x128xf32> to vector<8x128xf32>
    %250 = arith.addf %246, %249 : vector<8x128xf32>
    %251 = arith.truncf %234 : vector<8x128xf32> to vector<8x128xbf16>
    %252 = arith.truncf %242 : vector<8x128xf32> to vector<8x128xbf16>
    %cst_111 = arith.constant dense<0.000000e+00> : vector<8x8xf32>
    %253 = tpu.matmul %251, %252, %cst_111 {dimension_numbers = #tpu.dot_dimension_numbers<[1], [1], [0], [0], [0, 0, 1, 0], [], []>} : vector<8x128xbf16>, vector<8x128xbf16>, vector<8x8xf32> -> vector<8x8xf32>
    %cst_112 = arith.constant 5.000000e-01 : f32
    %254 = vector.broadcast %cst_112 : f32 to vector<8x8xf32>
    %255 = arith.mulf %253, %254 : vector<8x8xf32>
    %cst_113 = arith.constant dense<0xFF800000> : vector<8xf32>
    %256 = vector.multi_reduction <maximumf>, %255, %cst_113 [1] : vector<8x8xf32> to vector<8xf32>
    %257 = vector.shape_cast %256 : vector<8xf32> to vector<8x1xf32>
    %258 = vector.broadcast %257 : vector<8x1xf32> to vector<8x8xf32>
    %259 = arith.subf %255, %258 : vector<8x8xf32>
    %260 = math.exp %259 : vector<8x8xf32>
    %cst_114 = arith.constant dense<0.000000e+00> : vector<8xf32>
    %261 = vector.multi_reduction <add>, %260, %cst_114 [1] : vector<8x8xf32> to vector<8xf32>
    %262 = vector.shape_cast %261 : vector<8xf32> to vector<8x1xf32>
    %263 = tpu.reciprocal %262 {approx = true} : vector<8x1xf32> -> vector<8x1xf32>
    %264 = vector.broadcast %263 : vector<8x1xf32> to vector<8x8xf32>
    %265 = arith.mulf %260, %264 : vector<8x8xf32>
    %266 = arith.truncf %265 : vector<8x8xf32> to vector<8x8xbf16>
    %267 = arith.truncf %250 : vector<8x128xf32> to vector<8x128xbf16>
    %cst_115 = arith.constant dense<0.000000e+00> : vector<8x128xf32>
    %268 = tpu.matmul %266, %267, %cst_115 {dimension_numbers = #tpu.dot_dimension_numbers<[1], [0], [0], [1], [0, 0, 1, 1], [], []>} : vector<8x8xbf16>, vector<8x128xbf16>, vector<8x128xf32> -> vector<8x128xf32>
    %269 = arith.truncf %268 : vector<8x128xf32> to vector<8x128xbf16>
    %c1_116 = arith.constant 1 : index
    %c0_117 = arith.constant 0 : index
    %c0_118 = arith.constant 0 : index
    %270 = vector.load %arg19[%c1_116, %c0_117, %c0_118] : memref<4x128x128xf32, #tpu.memory_space<vmem>>, vector<1x128x128xf32>
    %271 = vector.shape_cast %270 : vector<1x128x128xf32> to vector<128x128xf32>
    %272 = arith.truncf %271 : vector<128x128xf32> to vector<128x128xbf16>
    %cst_119 = arith.constant dense<0.000000e+00> : vector<8x128xf32>
    %273 = tpu.matmul %269, %272, %cst_119 {dimension_numbers = #tpu.dot_dimension_numbers<[1], [0], [0], [1], [0, 0, 1, 1], [], []>} : vector<8x128xbf16>, vector<128x128xbf16>, vector<8x128xf32> -> vector<8x128xf32>
    %274 = arith.addf %226, %273 : vector<8x128xf32>
    %c2 = arith.constant 2 : index
    %c0_120 = arith.constant 0 : index
    %c0_121 = arith.constant 0 : index
    %275 = vector.load %arg13[%c2, %c0_120, %c0_121] : memref<4x128x128xf32, #tpu.memory_space<vmem>>, vector<1x128x128xf32>
    %276 = vector.shape_cast %275 : vector<1x128x128xf32> to vector<128x128xf32>
    %277 = arith.truncf %276 : vector<128x128xf32> to vector<128x128xbf16>
    %cst_122 = arith.constant dense<0.000000e+00> : vector<8x128xf32>
    %278 = tpu.matmul %179, %277, %cst_122 {dimension_numbers = #tpu.dot_dimension_numbers<[1], [0], [0], [1], [0, 0, 1, 1], [], []>} : vector<8x128xbf16>, vector<128x128xbf16>, vector<8x128xf32> -> vector<8x128xf32>
    %c2_123 = arith.constant 2 : index
    %c0_124 = arith.constant 0 : index
    %c0_125 = arith.constant 0 : index
    %279 = vector.load %arg16[%c2_123, %c0_124, %c0_125] : memref<4x1x128xf32, #tpu.memory_space<vmem>>, vector<1x1x128xf32>
    %280 = vector.shape_cast %279 : vector<1x1x128xf32> to vector<1x128xf32>
    %281 = vector.broadcast %280 : vector<1x128xf32> to vector<8x128xf32>
    %282 = arith.addf %278, %281 : vector<8x128xf32>
    %c2_126 = arith.constant 2 : index
    %c0_127 = arith.constant 0 : index
    %c0_128 = arith.constant 0 : index
    %283 = vector.load %arg14[%c2_126, %c0_127, %c0_128] : memref<4x128x128xf32, #tpu.memory_space<vmem>>, vector<1x128x128xf32>
    %284 = vector.shape_cast %283 : vector<1x128x128xf32> to vector<128x128xf32>
    %285 = arith.truncf %284 : vector<128x128xf32> to vector<128x128xbf16>
    %cst_129 = arith.constant dense<0.000000e+00> : vector<8x128xf32>
    %286 = tpu.matmul %179, %285, %cst_129 {dimension_numbers = #tpu.dot_dimension_numbers<[1], [0], [0], [1], [0, 0, 1, 1], [], []>} : vector<8x128xbf16>, vector<128x128xbf16>, vector<8x128xf32> -> vector<8x128xf32>
    %c2_130 = arith.constant 2 : index
    %c0_131 = arith.constant 0 : index
    %c0_132 = arith.constant 0 : index
    %287 = vector.load %arg17[%c2_130, %c0_131, %c0_132] : memref<4x1x128xf32, #tpu.memory_space<vmem>>, vector<1x1x128xf32>
    %288 = vector.shape_cast %287 : vector<1x1x128xf32> to vector<1x128xf32>
    %289 = vector.broadcast %288 : vector<1x128xf32> to vector<8x128xf32>
    %290 = arith.addf %286, %289 : vector<8x128xf32>
    %c2_133 = arith.constant 2 : index
    %c0_134 = arith.constant 0 : index
    %c0_135 = arith.constant 0 : index
    %291 = vector.load %arg15[%c2_133, %c0_134, %c0_135] : memref<4x128x128xf32, #tpu.memory_space<vmem>>, vector<1x128x128xf32>
    %292 = vector.shape_cast %291 : vector<1x128x128xf32> to vector<128x128xf32>
    %293 = arith.truncf %292 : vector<128x128xf32> to vector<128x128xbf16>
    %cst_136 = arith.constant dense<0.000000e+00> : vector<8x128xf32>
    %294 = tpu.matmul %179, %293, %cst_136 {dimension_numbers = #tpu.dot_dimension_numbers<[1], [0], [0], [1], [0, 0, 1, 1], [], []>} : vector<8x128xbf16>, vector<128x128xbf16>, vector<8x128xf32> -> vector<8x128xf32>
    %c2_137 = arith.constant 2 : index
    %c0_138 = arith.constant 0 : index
    %c0_139 = arith.constant 0 : index
    %295 = vector.load %arg18[%c2_137, %c0_138, %c0_139] : memref<4x1x128xf32, #tpu.memory_space<vmem>>, vector<1x1x128xf32>
    %296 = vector.shape_cast %295 : vector<1x1x128xf32> to vector<1x128xf32>
    %297 = vector.broadcast %296 : vector<1x128xf32> to vector<8x128xf32>
    %298 = arith.addf %294, %297 : vector<8x128xf32>
    %299 = arith.truncf %282 : vector<8x128xf32> to vector<8x128xbf16>
    %300 = arith.truncf %290 : vector<8x128xf32> to vector<8x128xbf16>
    %cst_140 = arith.constant dense<0.000000e+00> : vector<8x8xf32>
    %301 = tpu.matmul %299, %300, %cst_140 {dimension_numbers = #tpu.dot_dimension_numbers<[1], [1], [0], [0], [0, 0, 1, 0], [], []>} : vector<8x128xbf16>, vector<8x128xbf16>, vector<8x8xf32> -> vector<8x8xf32>
    %cst_141 = arith.constant 5.000000e-01 : f32
    %302 = vector.broadcast %cst_141 : f32 to vector<8x8xf32>
    %303 = arith.mulf %301, %302 : vector<8x8xf32>
    %cst_142 = arith.constant dense<0xFF800000> : vector<8xf32>
    %304 = vector.multi_reduction <maximumf>, %303, %cst_142 [1] : vector<8x8xf32> to vector<8xf32>
    %305 = vector.shape_cast %304 : vector<8xf32> to vector<8x1xf32>
    %306 = vector.broadcast %305 : vector<8x1xf32> to vector<8x8xf32>
    %307 = arith.subf %303, %306 : vector<8x8xf32>
    %308 = math.exp %307 : vector<8x8xf32>
    %cst_143 = arith.constant dense<0.000000e+00> : vector<8xf32>
    %309 = vector.multi_reduction <add>, %308, %cst_143 [1] : vector<8x8xf32> to vector<8xf32>
    %310 = vector.shape_cast %309 : vector<8xf32> to vector<8x1xf32>
    %311 = tpu.reciprocal %310 {approx = true} : vector<8x1xf32> -> vector<8x1xf32>
    %312 = vector.broadcast %311 : vector<8x1xf32> to vector<8x8xf32>
    %313 = arith.mulf %308, %312 : vector<8x8xf32>
    %314 = arith.truncf %313 : vector<8x8xf32> to vector<8x8xbf16>
    %315 = arith.truncf %298 : vector<8x128xf32> to vector<8x128xbf16>
    %cst_144 = arith.constant dense<0.000000e+00> : vector<8x128xf32>
    %316 = tpu.matmul %314, %315, %cst_144 {dimension_numbers = #tpu.dot_dimension_numbers<[1], [0], [0], [1], [0, 0, 1, 1], [], []>} : vector<8x8xbf16>, vector<8x128xbf16>, vector<8x128xf32> -> vector<8x128xf32>
    %317 = arith.truncf %316 : vector<8x128xf32> to vector<8x128xbf16>
    %c2_145 = arith.constant 2 : index
    %c0_146 = arith.constant 0 : index
    %c0_147 = arith.constant 0 : index
    %318 = vector.load %arg19[%c2_145, %c0_146, %c0_147] : memref<4x128x128xf32, #tpu.memory_space<vmem>>, vector<1x128x128xf32>
    %319 = vector.shape_cast %318 : vector<1x128x128xf32> to vector<128x128xf32>
    %320 = arith.truncf %319 : vector<128x128xf32> to vector<128x128xbf16>
    %cst_148 = arith.constant dense<0.000000e+00> : vector<8x128xf32>
    %321 = tpu.matmul %317, %320, %cst_148 {dimension_numbers = #tpu.dot_dimension_numbers<[1], [0], [0], [1], [0, 0, 1, 1], [], []>} : vector<8x128xbf16>, vector<128x128xbf16>, vector<8x128xf32> -> vector<8x128xf32>
    %322 = arith.addf %274, %321 : vector<8x128xf32>
    %c3 = arith.constant 3 : index
    %c0_149 = arith.constant 0 : index
    %c0_150 = arith.constant 0 : index
    %323 = vector.load %arg13[%c3, %c0_149, %c0_150] : memref<4x128x128xf32, #tpu.memory_space<vmem>>, vector<1x128x128xf32>
    %324 = vector.shape_cast %323 : vector<1x128x128xf32> to vector<128x128xf32>
    %325 = arith.truncf %324 : vector<128x128xf32> to vector<128x128xbf16>
    %cst_151 = arith.constant dense<0.000000e+00> : vector<8x128xf32>
    %326 = tpu.matmul %179, %325, %cst_151 {dimension_numbers = #tpu.dot_dimension_numbers<[1], [0], [0], [1], [0, 0, 1, 1], [], []>} : vector<8x128xbf16>, vector<128x128xbf16>, vector<8x128xf32> -> vector<8x128xf32>
    %c3_152 = arith.constant 3 : index
    %c0_153 = arith.constant 0 : index
    %c0_154 = arith.constant 0 : index
    %327 = vector.load %arg16[%c3_152, %c0_153, %c0_154] : memref<4x1x128xf32, #tpu.memory_space<vmem>>, vector<1x1x128xf32>
    %328 = vector.shape_cast %327 : vector<1x1x128xf32> to vector<1x128xf32>
    %329 = vector.broadcast %328 : vector<1x128xf32> to vector<8x128xf32>
    %330 = arith.addf %326, %329 : vector<8x128xf32>
    %c3_155 = arith.constant 3 : index
    %c0_156 = arith.constant 0 : index
    %c0_157 = arith.constant 0 : index
    %331 = vector.load %arg14[%c3_155, %c0_156, %c0_157] : memref<4x128x128xf32, #tpu.memory_space<vmem>>, vector<1x128x128xf32>
    %332 = vector.shape_cast %331 : vector<1x128x128xf32> to vector<128x128xf32>
    %333 = arith.truncf %332 : vector<128x128xf32> to vector<128x128xbf16>
    %cst_158 = arith.constant dense<0.000000e+00> : vector<8x128xf32>
    %334 = tpu.matmul %179, %333, %cst_158 {dimension_numbers = #tpu.dot_dimension_numbers<[1], [0], [0], [1], [0, 0, 1, 1], [], []>} : vector<8x128xbf16>, vector<128x128xbf16>, vector<8x128xf32> -> vector<8x128xf32>
    %c3_159 = arith.constant 3 : index
    %c0_160 = arith.constant 0 : index
    %c0_161 = arith.constant 0 : index
    %335 = vector.load %arg17[%c3_159, %c0_160, %c0_161] : memref<4x1x128xf32, #tpu.memory_space<vmem>>, vector<1x1x128xf32>
    %336 = vector.shape_cast %335 : vector<1x1x128xf32> to vector<1x128xf32>
    %337 = vector.broadcast %336 : vector<1x128xf32> to vector<8x128xf32>
    %338 = arith.addf %334, %337 : vector<8x128xf32>
    %c3_162 = arith.constant 3 : index
    %c0_163 = arith.constant 0 : index
    %c0_164 = arith.constant 0 : index
    %339 = vector.load %arg15[%c3_162, %c0_163, %c0_164] : memref<4x128x128xf32, #tpu.memory_space<vmem>>, vector<1x128x128xf32>
    %340 = vector.shape_cast %339 : vector<1x128x128xf32> to vector<128x128xf32>
    %341 = arith.truncf %340 : vector<128x128xf32> to vector<128x128xbf16>
    %cst_165 = arith.constant dense<0.000000e+00> : vector<8x128xf32>
    %342 = tpu.matmul %179, %341, %cst_165 {dimension_numbers = #tpu.dot_dimension_numbers<[1], [0], [0], [1], [0, 0, 1, 1], [], []>} : vector<8x128xbf16>, vector<128x128xbf16>, vector<8x128xf32> -> vector<8x128xf32>
    %c3_166 = arith.constant 3 : index
    %c0_167 = arith.constant 0 : index
    %c0_168 = arith.constant 0 : index
    %343 = vector.load %arg18[%c3_166, %c0_167, %c0_168] : memref<4x1x128xf32, #tpu.memory_space<vmem>>, vector<1x1x128xf32>
    %344 = vector.shape_cast %343 : vector<1x1x128xf32> to vector<1x128xf32>
    %345 = vector.broadcast %344 : vector<1x128xf32> to vector<8x128xf32>
    %346 = arith.addf %342, %345 : vector<8x128xf32>
    %347 = arith.truncf %330 : vector<8x128xf32> to vector<8x128xbf16>
    %348 = arith.truncf %338 : vector<8x128xf32> to vector<8x128xbf16>
    %cst_169 = arith.constant dense<0.000000e+00> : vector<8x8xf32>
    %349 = tpu.matmul %347, %348, %cst_169 {dimension_numbers = #tpu.dot_dimension_numbers<[1], [1], [0], [0], [0, 0, 1, 0], [], []>} : vector<8x128xbf16>, vector<8x128xbf16>, vector<8x8xf32> -> vector<8x8xf32>
    %cst_170 = arith.constant 5.000000e-01 : f32
    %350 = vector.broadcast %cst_170 : f32 to vector<8x8xf32>
    %351 = arith.mulf %349, %350 : vector<8x8xf32>
    %cst_171 = arith.constant dense<0xFF800000> : vector<8xf32>
    %352 = vector.multi_reduction <maximumf>, %351, %cst_171 [1] : vector<8x8xf32> to vector<8xf32>
    %353 = vector.shape_cast %352 : vector<8xf32> to vector<8x1xf32>
    %354 = vector.broadcast %353 : vector<8x1xf32> to vector<8x8xf32>
    %355 = arith.subf %351, %354 : vector<8x8xf32>
    %356 = math.exp %355 : vector<8x8xf32>
    %cst_172 = arith.constant dense<0.000000e+00> : vector<8xf32>
    %357 = vector.multi_reduction <add>, %356, %cst_172 [1] : vector<8x8xf32> to vector<8xf32>
    %358 = vector.shape_cast %357 : vector<8xf32> to vector<8x1xf32>
    %359 = tpu.reciprocal %358 {approx = true} : vector<8x1xf32> -> vector<8x1xf32>
    %360 = vector.broadcast %359 : vector<8x1xf32> to vector<8x8xf32>
    %361 = arith.mulf %356, %360 : vector<8x8xf32>
    %362 = arith.truncf %361 : vector<8x8xf32> to vector<8x8xbf16>
    %363 = arith.truncf %346 : vector<8x128xf32> to vector<8x128xbf16>
    %cst_173 = arith.constant dense<0.000000e+00> : vector<8x128xf32>
    %364 = tpu.matmul %362, %363, %cst_173 {dimension_numbers = #tpu.dot_dimension_numbers<[1], [0], [0], [1], [0, 0, 1, 1], [], []>} : vector<8x8xbf16>, vector<8x128xbf16>, vector<8x128xf32> -> vector<8x128xf32>
    %365 = arith.truncf %364 : vector<8x128xf32> to vector<8x128xbf16>
    %c3_174 = arith.constant 3 : index
    %c0_175 = arith.constant 0 : index
    %c0_176 = arith.constant 0 : index
    %366 = vector.load %arg19[%c3_174, %c0_175, %c0_176] : memref<4x128x128xf32, #tpu.memory_space<vmem>>, vector<1x128x128xf32>
    %367 = vector.shape_cast %366 : vector<1x128x128xf32> to vector<128x128xf32>
    %368 = arith.truncf %367 : vector<128x128xf32> to vector<128x128xbf16>
    %cst_177 = arith.constant dense<0.000000e+00> : vector<8x128xf32>
    %369 = tpu.matmul %365, %368, %cst_177 {dimension_numbers = #tpu.dot_dimension_numbers<[1], [0], [0], [1], [0, 0, 1, 1], [], []>} : vector<8x128xbf16>, vector<128x128xbf16>, vector<8x128xf32> -> vector<8x128xf32>
    %370 = arith.addf %322, %369 : vector<8x128xf32>
    %371 = arith.addf %152, %370 : vector<8x128xf32>
    %c0_178 = arith.constant 0 : index
    %c0_179 = arith.constant 0 : index
    %372 = vector.load %arg20[%c0_178, %c0_179] : memref<1x128xf32, #tpu.memory_space<vmem>>, vector<1x128xf32>
    %373 = vector.broadcast %372 : vector<1x128xf32> to vector<8x128xf32>
    %374 = arith.addf %371, %373 : vector<8x128xf32>
    %375 = tpu.iota {dimensions = array<i32: 0>} : vector<16x8xi32>
    %376 = tpu.iota {dimensions = array<i32: 1>} : vector<16x8xi32>
    %c2_i32_180 = arith.constant 2 : i32
    %377 = vector.broadcast %c2_i32_180 : i32 to vector<16x8xi32>
    %378 = arith.muli %377, %376 : vector<16x8xi32>
    %379 = arith.cmpi eq, %378, %375 : vector<16x8xi32>
    %c2_i32_181 = arith.constant 2 : i32
    %380 = vector.broadcast %c2_i32_181 : i32 to vector<16x8xi32>
    %381 = arith.muli %380, %376 : vector<16x8xi32>
    %c1_i32_182 = arith.constant 1 : i32
    %382 = vector.broadcast %c1_i32_182 : i32 to vector<16x8xi32>
    %383 = arith.addi %381, %382 : vector<16x8xi32>
    %384 = arith.cmpi eq, %383, %375 : vector<16x8xi32>
    %385 = arith.ori %379, %384 : vector<16x8xi1>
    %386 = arith.extui %385 : vector<16x8xi1> to vector<16x8xi32>
    %387 = arith.sitofp %386 : vector<16x8xi32> to vector<16x8xf32>
    %cst_183 = arith.constant dense<0.000000e+00> : vector<16x128xf32>
    %388 = tpu.matmul %387, %374, %cst_183 {dimension_numbers = #tpu.dot_dimension_numbers<[1], [0], [0], [1], [0, 0, 1, 1], [], []>} : vector<16x8xf32>, vector<8x128xf32>, vector<16x128xf32> -> vector<16x128xf32>
    %c0_184 = arith.constant 0 : index
    %c0_185 = arith.constant 0 : index
    %c0_186 = arith.constant 0 : index
    %389 = vector.load %arg21[%c0_184, %c0_185, %c0_186] : memref<1x128x128xf32, #tpu.memory_space<vmem>>, vector<1x128x128xf32>
    %390 = vector.shape_cast %389 : vector<1x128x128xf32> to vector<128x128xf32>
    %391 = arith.truncf %388 : vector<16x128xf32> to vector<16x128xbf16>
    %392 = arith.truncf %390 : vector<128x128xf32> to vector<128x128xbf16>
    %cst_187 = arith.constant dense<0.000000e+00> : vector<16x128xf32>
    %393 = tpu.matmul %391, %392, %cst_187 {dimension_numbers = #tpu.dot_dimension_numbers<[1], [0], [0], [1], [0, 0, 1, 1], [], []>} : vector<16x128xbf16>, vector<128x128xbf16>, vector<16x128xf32> -> vector<16x128xf32>
    %c0_188 = arith.constant 0 : index
    %c0_189 = arith.constant 0 : index
    %c0_190 = arith.constant 0 : index
    %394 = vector.load %arg22[%c0_188, %c0_189, %c0_190] : memref<1x1x128xf32, #tpu.memory_space<vmem>>, vector<1x1x128xf32>
    %395 = vector.shape_cast %394 : vector<1x1x128xf32> to vector<1x128xf32>
    %396 = vector.broadcast %395 : vector<1x128xf32> to vector<16x128xf32>
    %397 = arith.addf %393, %396 : vector<16x128xf32>
    %398 = arith.negf %397 : vector<16x128xf32>
    %399 = math.exp %398 : vector<16x128xf32>
    %cst_191 = arith.constant 1.000000e+00 : f32
    %400 = vector.broadcast %cst_191 : f32 to vector<16x128xf32>
    %401 = arith.addf %400, %399 : vector<16x128xf32>
    %402 = arith.divf %400, %401 : vector<16x128xf32>
    %c0_192 = arith.constant 0 : index
    %c0_193 = arith.constant 0 : index
    %c0_194 = arith.constant 0 : index
    %403 = vector.load %arg23[%c0_192, %c0_193, %c0_194] : memref<1x128x128xf32, #tpu.memory_space<vmem>>, vector<1x128x128xf32>
    %404 = vector.shape_cast %403 : vector<1x128x128xf32> to vector<128x128xf32>
    %405 = arith.truncf %388 : vector<16x128xf32> to vector<16x128xbf16>
    %406 = arith.truncf %404 : vector<128x128xf32> to vector<128x128xbf16>
    %cst_195 = arith.constant dense<0.000000e+00> : vector<16x128xf32>
    %407 = tpu.matmul %405, %406, %cst_195 {dimension_numbers = #tpu.dot_dimension_numbers<[1], [0], [0], [1], [0, 0, 1, 1], [], []>} : vector<16x128xbf16>, vector<128x128xbf16>, vector<16x128xf32> -> vector<16x128xf32>
    %c0_196 = arith.constant 0 : index
    %c0_197 = arith.constant 0 : index
    %c0_198 = arith.constant 0 : index
    %408 = vector.load %arg24[%c0_196, %c0_197, %c0_198] : memref<1x1x128xf32, #tpu.memory_space<vmem>>, vector<1x1x128xf32>
    %409 = vector.shape_cast %408 : vector<1x1x128xf32> to vector<1x128xf32>
    %410 = vector.broadcast %409 : vector<1x128xf32> to vector<16x128xf32>
    %411 = arith.addf %407, %410 : vector<16x128xf32>
    %412 = arith.mulf %40, %402 : vector<16x128xf32>
    %413 = arith.addf %412, %411 : vector<16x128xf32>
    %c0_199 = arith.constant 0 : index
    %c0_200 = arith.constant 0 : index
    %414 = vector.load %arg25[%c0_199, %c0_200] : memref<128x128xf32, #tpu.memory_space<vmem>>, vector<128x128xf32>
    %415 = arith.truncf %413 : vector<16x128xf32> to vector<16x128xbf16>
    %416 = arith.truncf %414 : vector<128x128xf32> to vector<128x128xbf16>
    %cst_201 = arith.constant dense<0.000000e+00> : vector<16x128xf32>
    %417 = tpu.matmul %415, %416, %cst_201 {dimension_numbers = #tpu.dot_dimension_numbers<[1], [0], [0], [1], [0, 0, 1, 1], [], []>} : vector<16x128xbf16>, vector<128x128xbf16>, vector<16x128xf32> -> vector<16x128xf32>
    %c0_202 = arith.constant 0 : index
    %c0_203 = arith.constant 0 : index
    %418 = vector.load %arg26[%c0_202, %c0_203] : memref<1x128xf32, #tpu.memory_space<vmem>>, vector<1x128xf32>
    %419 = vector.broadcast %418 : vector<1x128xf32> to vector<16x128xf32>
    %420 = arith.addf %417, %419 : vector<16x128xf32>
    %421 = arith.addf %420, %1 : vector<16x128xf32>
    %c0_204 = arith.constant 0 : index
    %c0_205 = arith.constant 0 : index
    %c0_206 = arith.constant 0 : index
    %422 = vector.load %arg27[%c0_204, %c0_205, %c0_206] : memref<1x16x128xf32, #tpu.memory_space<vmem>>, vector<1x16x128xf32>
    %423 = vector.shape_cast %422 : vector<1x16x128xf32> to vector<16x128xf32>
    %424 = vector.shape_cast %421 : vector<16x128xf32> to vector<1x16x128xf32>
    tpu.vector_store %arg27[%c0_204, %c0_205, %c0_206], %424 {strides = array<i32>} : memref<1x16x128xf32, #tpu.memory_space<vmem>>, vector<1x16x128xf32>,
    return
  }
  func.func @transform_0(%arg0: i32) -> i32 {
    %c0_i32 = arith.constant 0 : i32
    %c0_i32_0 = arith.constant 0 : i32
    return %c0_i32 : i32
  }
  func.func @transform_1(%arg0: i32) -> (i32, i32, i32) {
    %c0_i32 = arith.constant 0 : i32
    %c0_i32_0 = arith.constant 0 : i32
    %c0_i32_1 = arith.constant 0 : i32
    return %arg0, %c0_i32, %c0_i32_0 : i32, i32, i32
  }
  func.func @transform_2(%arg0: i32) -> (i32, i32) {
    %c0_i32 = arith.constant 0 : i32
    %c0_i32_0 = arith.constant 0 : i32
    %c0_i32_1 = arith.constant 0 : i32
    return %c0_i32, %c0_i32_0 : i32, i32
  }
  func.func @transform_3(%arg0: i32) -> (i32, i32) {
    %c0_i32 = arith.constant 0 : i32
    %c0_i32_0 = arith.constant 0 : i32
    %c0_i32_1 = arith.constant 0 : i32
    return %c0_i32, %c0_i32_0 : i32, i32
  }
  func.func @transform_4(%arg0: i32) -> (i32, i32) {
    %c0_i32 = arith.constant 0 : i32
    %c0_i32_0 = arith.constant 0 : i32
    %c0_i32_1 = arith.constant 0 : i32
    return %c0_i32, %c0_i32_0 : i32, i32
  }
  func.func @transform_5(%arg0: i32) -> (i32, i32) {
    %c0_i32 = arith.constant 0 : i32
    %c0_i32_0 = arith.constant 0 : i32
    %c0_i32_1 = arith.constant 0 : i32
    return %c0_i32, %c0_i32_0 : i32, i32
  }
  func.func @transform_6(%arg0: i32) -> (i32, i32, i32) {
    %c0_i32 = arith.constant 0 : i32
    %c0_i32_0 = arith.constant 0 : i32
    %c0_i32_1 = arith.constant 0 : i32
    %c0_i32_2 = arith.constant 0 : i32
    return %c0_i32, %c0_i32_0, %c0_i32_1 : i32, i32, i32
  }
  func.func @transform_7(%arg0: i32) -> (i32, i32, i32) {
    %c0_i32 = arith.constant 0 : i32
    %c0_i32_0 = arith.constant 0 : i32
    %c0_i32_1 = arith.constant 0 : i32
    %c0_i32_2 = arith.constant 0 : i32
    return %c0_i32, %c0_i32_0, %c0_i32_1 : i32, i32, i32
  }
  func.func @transform_8(%arg0: i32) -> (i32, i32, i32) {
    %c0_i32 = arith.constant 0 : i32
    %c0_i32_0 = arith.constant 0 : i32
    %c0_i32_1 = arith.constant 0 : i32
    %c0_i32_2 = arith.constant 0 : i32
    return %c0_i32, %c0_i32_0, %c0_i32_1 : i32, i32, i32
  }
  func.func @transform_9(%arg0: i32) -> (i32, i32, i32) {
    %c0_i32 = arith.constant 0 : i32
    %c0_i32_0 = arith.constant 0 : i32
    %c0_i32_1 = arith.constant 0 : i32
    %c0_i32_2 = arith.constant 0 : i32
    return %c0_i32, %c0_i32_0, %c0_i32_1 : i32, i32, i32
  }
  func.func @transform_10(%arg0: i32) -> (i32, i32) {
    %c0_i32 = arith.constant 0 : i32
    %c0_i32_0 = arith.constant 0 : i32
    %c0_i32_1 = arith.constant 0 : i32
    return %c0_i32, %c0_i32_0 : i32, i32
  }
  func.func @transform_11(%arg0: i32) -> (i32, i32) {
    %c0_i32 = arith.constant 0 : i32
    %c0_i32_0 = arith.constant 0 : i32
    %c0_i32_1 = arith.constant 0 : i32
    return %c0_i32, %c0_i32_0 : i32, i32
  }
  func.func @transform_12(%arg0: i32) -> (i32, i32, i32) {
    %c0_i32 = arith.constant 0 : i32
    %c0_i32_0 = arith.constant 0 : i32
    %c0_i32_1 = arith.constant 0 : i32
    %c0_i32_2 = arith.constant 0 : i32
    return %c0_i32, %c0_i32_0, %c0_i32_1 : i32, i32, i32
  }
  func.func @transform_13(%arg0: i32) -> (i32, i32, i32) {
    %c0_i32 = arith.constant 0 : i32
    %c0_i32_0 = arith.constant 0 : i32
    %c0_i32_1 = arith.constant 0 : i32
    %c0_i32_2 = arith.constant 0 : i32
    return %c0_i32, %c0_i32_0, %c0_i32_1 : i32, i32, i32
  }
  func.func @transform_14(%arg0: i32) -> (i32, i32, i32) {
    %c0_i32 = arith.constant 0 : i32
    %c0_i32_0 = arith.constant 0 : i32
    %c0_i32_1 = arith.constant 0 : i32
    %c0_i32_2 = arith.constant 0 : i32
    return %c0_i32, %c0_i32_0, %c0_i32_1 : i32, i32, i32
  }
  func.func @transform_15(%arg0: i32) -> (i32, i32, i32) {
    %c0_i32 = arith.constant 0 : i32
    %c0_i32_0 = arith.constant 0 : i32
    %c0_i32_1 = arith.constant 0 : i32
    %c0_i32_2 = arith.constant 0 : i32
    return %c0_i32, %c0_i32_0, %c0_i32_1 : i32, i32, i32
  }
  func.func @transform_16(%arg0: i32) -> (i32, i32, i32) {
    %c0_i32 = arith.constant 0 : i32
    %c0_i32_0 = arith.constant 0 : i32
    %c0_i32_1 = arith.constant 0 : i32
    %c0_i32_2 = arith.constant 0 : i32
    return %c0_i32, %c0_i32_0, %c0_i32_1 : i32, i32, i32
  }
  func.func @transform_17(%arg0: i32) -> (i32, i32, i32) {
    %c0_i32 = arith.constant 0 : i32
    %c0_i32_0 = arith.constant 0 : i32
    %c0_i32_1 = arith.constant 0 : i32
    %c0_i32_2 = arith.constant 0 : i32
    return %c0_i32, %c0_i32_0, %c0_i32_1 : i32, i32, i32
  }
  func.func @transform_18(%arg0: i32) -> (i32, i32, i32) {
    %c0_i32 = arith.constant 0 : i32
    %c0_i32_0 = arith.constant 0 : i32
    %c0_i32_1 = arith.constant 0 : i32
    %c0_i32_2 = arith.constant 0 : i32
    return %c0_i32, %c0_i32_0, %c0_i32_1 : i32, i32, i32
  }
  func.func @transform_19(%arg0: i32) -> (i32, i32) {
    %c0_i32 = arith.constant 0 : i32
    %c0_i32_0 = arith.constant 0 : i32
    %c0_i32_1 = arith.constant 0 : i32
    return %c0_i32, %c0_i32_0 : i32, i32
  }
  func.func @transform_20(%arg0: i32) -> (i32, i32, i32) {
    %c0_i32 = arith.constant 0 : i32
    %c0_i32_0 = arith.constant 0 : i32
    %c0_i32_1 = arith.constant 0 : i32
    %c0_i32_2 = arith.constant 0 : i32
    return %c0_i32, %c0_i32_0, %c0_i32_1 : i32, i32, i32
  }
  func.func @transform_21(%arg0: i32) -> (i32, i32, i32) {
    %c0_i32 = arith.constant 0 : i32
    %c0_i32_0 = arith.constant 0 : i32
    %c0_i32_1 = arith.constant 0 : i32
    %c0_i32_2 = arith.constant 0 : i32
    return %c0_i32, %c0_i32_0, %c0_i32_1 : i32, i32, i32
  }
  func.func @transform_22(%arg0: i32) -> (i32, i32, i32) {
    %c0_i32 = arith.constant 0 : i32
    %c0_i32_0 = arith.constant 0 : i32
    %c0_i32_1 = arith.constant 0 : i32
    %c0_i32_2 = arith.constant 0 : i32
    return %c0_i32, %c0_i32_0, %c0_i32_1 : i32, i32, i32
  }
  func.func @transform_23(%arg0: i32) -> (i32, i32, i32) {
    %c0_i32 = arith.constant 0 : i32
    %c0_i32_0 = arith.constant 0 : i32
    %c0_i32_1 = arith.constant 0 : i32
    %c0_i32_2 = arith.constant 0 : i32
    return %c0_i32, %c0_i32_0, %c0_i32_1 : i32, i32, i32
  }
  func.func @transform_24(%arg0: i32) -> (i32, i32) {
    %c0_i32 = arith.constant 0 : i32
    %c0_i32_0 = arith.constant 0 : i32
    %c0_i32_1 = arith.constant 0 : i32
    return %c0_i32, %c0_i32_0 : i32, i32
  }
  func.func @transform_25(%arg0: i32) -> (i32, i32) {
    %c0_i32 = arith.constant 0 : i32
    %c0_i32_0 = arith.constant 0 : i32
    %c0_i32_1 = arith.constant 0 : i32
    return %c0_i32, %c0_i32_0 : i32, i32
  }
  func.func @transform_26(%arg0: i32) -> (i32, i32, i32) {
    %c0_i32 = arith.constant 0 : i32
    %c0_i32_0 = arith.constant 0 : i32
    %c0_i32_1 = arith.constant 0 : i32
    return %arg0, %c0_i32, %c0_i32_0 : i32, i32, i32
  }
}

</mosaic_0001>

<bundles_post_ra>
// kernel: tpu_custom_call.1
= control target key start
LH: loop header
LB: loop body
LE: loop exit
PB: predicated region body
PF: predicated region fallthrough
CT: control target
= control target key end

     0   :  { %s6101_s0 = inlined_call_operand.hbm [shape: f32[2], index: 0, kind: input, shape index: {}]   ;;  %s6102_s1 = inlined_call_operand.hbm [shape: f32[2,16,128], index: 1, kind: input, shape index: {}]   ;;  %s6103_s2 = inlined_call_operand.hbm [shape: f32[128,128], index: 2, kind: input, shape index: {}]   ;;  %s6104_s3 = inlined_call_operand.vmem [shape: f32[1,128], index: 3, kind: input, shape index: {}]   ;;  %s6105_s4 = inlined_call_operand.vmem [shape: f32[1,128], index: 4, kind: input, shape index: {}]   ;;  %s6106_s5 = inlined_call_operand.hbm [shape: f32[1,128], index: 5, kind: input, shape index: {}]   ;;  %s6107_s6 = inlined_call_operand.vmem [shape: f32[1,4,128], index: 6, kind: input, shape index: {}]   ;;  %s6108_s7 = inlined_call_operand.vmem [shape: f32[1,1,128], index: 7, kind: input, shape index: {}]   ;;  %s6109_s8 = inlined_call_operand.vmem [shape: f32[1,1,128], index: 8, kind: input, shape index: {}]   ;;  %s6110_s9 = inlined_call_operand.vmem [shape: f32[1,1,128], index: 9, kind: input, shape index: {}]   ;;  %s6111_s10 = inlined_call_operand.vmem [shape: f32[1,128], index: 10, kind: input, shape index: {}]   ;;  %s6112_s11 = inlined_call_operand.vmem [shape: f32[1,128], index: 11, kind: input, shape index: {}]   ;;  %s6113_s12 = inlined_call_operand.hbm [shape: f32[4,128,128], index: 12, kind: input, shape index: {}]   ;;  %s6114_s13 = inlined_call_operand.hbm [shape: f32[4,128,128], index: 13, kind: input, shape index: {}]   ;;  %s6115_s14 = inlined_call_operand.hbm [shape: f32[4,128,128], index: 14, kind: input, shape index: {}]   ;;  %s6116_s15 = inlined_call_operand.vmem [shape: f32[4,1,128], index: 15, kind: input, shape index: {}]   ;;  %s6117_s16 = inlined_call_operand.vmem [shape: f32[4,1,128], index: 16, kind: input, shape index: {}]   ;;  %s6118_s17 = inlined_call_operand.vmem [shape: f32[4,1,128], index: 17, kind: input, shape index: {}]   ;;  %s6119_s18 = inlined_call_operand.hbm [shape: f32[4,128,128], index: 18, kind: input, shape index: {}]   ;;  %s6120_s19 = inlined_call_operand.vmem [shape: f32[1,128], index: 19, kind: input, shape index: {}]   ;;  %s6121_s20 = inlined_call_operand.hbm [shape: f32[1,128,128], index: 20, kind: input, shape index: {}]   ;;  %s6122_s21 = inlined_call_operand.vmem [shape: f32[1,1,128], index: 21, kind: input, shape index: {}]   ;;  %s6123_s22 = inlined_call_operand.hbm [shape: f32[1,128,128], index: 22, kind: input, shape index: {}]   ;;  %s6124_s23 = inlined_call_operand.vmem [shape: f32[1,1,128], index: 23, kind: input, shape index: {}]   ;;  %s6125_s24 = inlined_call_operand.hbm [shape: f32[128,128], index: 24, kind: input, shape index: {}]   ;;  %s6126_s25 = inlined_call_operand.vmem [shape: f32[1,128], index: 25, kind: input, shape index: {}]   ;;  %s6127_s26 = inlined_call_operand.hbm [shape: f32[2,16,128], index: 26, kind: output, shape index: {}]  }
   0x1   :  { %6146 = sst [smem:[#allocation30_spill]] %s6101_s0 }
   0x2   :  { %6147 = sst [smem:[#allocation31_spill]] %s6102_s1 }
   0x3   :  { %6148 = sst [smem:[#allocation32_spill]] %s6103_s2 }
   0x4   :  { %6149 = sst [smem:[#allocation33_spill]] %s6104_s3 }
   0x5   :  { %6150 = sst [smem:[#allocation34_spill]] %s6105_s4 }
   0x6   :  { %6151 = sst [smem:[#allocation35_spill]] %s6106_s5 }
   0x7   :  { %6152 = sst [smem:[#allocation36_spill]] %s6107_s6 }
   0x8   :  { %6153 = sst [smem:[#allocation37_spill]] %s6108_s7 }
   0x9   :  { %6154 = sst [smem:[#allocation38_spill]] %s6109_s8 }
   0xa   :  { %6155 = sst [smem:[#allocation39_spill]] %s6110_s9 }
   0xb   :  { %6156 = sst [smem:[#allocation40_spill]] %s6111_s10 }
   0xc   :  { %6157 = sst [smem:[#allocation41_spill]] %s6113_s12 }
   0xd   :  { %6158 = sst [smem:[#allocation42_spill]] %s6114_s13 }
   0xe   :  { %6159 = sst [smem:[#allocation43_spill]] %s6115_s14 }
   0xf   :  { %6160 = sst [smem:[#allocation44_spill]] %s6116_s15 }
  0x10   :  { %6161 = sst [smem:[#allocation45_spill]] %s6117_s16 }
  0x11   :  { %6162 = sst [smem:[#allocation46_spill]] %s6118_s17 }
  0x12   :  { %6163 = sst [smem:[#allocation47_spill]] %s6119_s18 }
  0x13   :  { %6164 = sst [smem:[#allocation48_spill]] %s6120_s19 }
  0x14   :  { %6165 = sst [smem:[#allocation49_spill]] %s6122_s21 }
  0x15   :  { %6166 = sst [smem:[#allocation50_spill]] %s6124_s23 }
  0x16   :  { %6167 = sst [smem:[#allocation51_spill]] %s6126_s25 }
  0x17   :  { %6168 = sst [smem:[#allocation52_spill]] %s6127_s26 }
  0x18   :  { %31 = vsyncpa [#allocation5], 0 }
  0x19   :  { %32 = vsyncpa [#allocation3], 0 }
  0x1a   :  { %34 = vsyncpa [#allocation3 + $0x1], 0 }
  0x1b   :  { %35 = vsyncpa [#allocation8], 0 }
  0x1c   :  { %36 = vsyncpa [#allocation11], 0 }
  0x1d   :  { %37 = vsyncpa [#allocation14], 0 }
  0x1e   :  { %38 = vsyncpa [#allocation17], 0 }
  0x1f   :  { %39 = vsyncpa [#allocation20], 0 }
  0x20   :  { %40 = vsyncpa [#allocation4], 0 }
  0x21   :  { %42 = vsyncpa [#allocation4 + $0x1], 0  ;;  %s5230_s27 = smov 0   ;;  %s5232_s3 = smov 0  }
  0x22   :  { %s5234_s7 = smov 0   ;;  %s5236_s28 = smov 0  }
  0x23 LB: > { %s5075_s8 = smov [#allocation7]   ;;  %s5251_s29 = sadd.s32 4294967295, %s5073_s28   ;;  %s5073_s28 = sphi %s5236_s28, %s6227_s28   ;;  %s5069_s7 = sphi %s5234_s7, %s6226_s7   ;;  %s5065_s3 = sphi %s5232_s3, %s6225_s3   ;;  %s5061_s27 = sphi %s5230_s27, %s6224_s27  }
  0x24   : > { %s651_s4 = sshll.u32 %s5075_s8, 4  ;;  %p3683_p0 = scmp.ge.s32.totalorder %s5073_s28, 1  ;;  %s5256_s4 = int_to_ptr.vmem [resolvable:$true] %s651_s4 }
  0x25   : > { %p6136_p1 = scmp.eq.s32.totalorder %s5251_s29, 0  ;;  %p630_p2 = scmp.lt.s32.totalorder %s5073_s28, 3 }
  0x26   : > { %s5076_s9 = smov [#allocation10]   ;;  %s5077_s5 = smov [#allocation13]  }
  0x27   : > { %p5258_p3 = pnand %p3683_p0, %p630_p2  ;;  %s699_s30 = sshll.u32 %s5076_s9, 4  ;;  %s5271_s30 = int_to_ptr.vmem [resolvable:$true] %s699_s30 }
  0x28   : > { %s725_s10 = sshll.u32 %s5077_s5, 4  ;;  %s6171_s8 = sld [smem:[#allocation32_spill]]  ;;  %s5273_s10 = int_to_ptr.vmem [resolvable:$true] %s725_s10 }
  0x29   : > { %s6169_s0 = scalar_select %p5258_p3, 1, 0 }
  0x2a   : > { %p4545_p5 = pneg %p5258_p3 }
  0x2c   : > { %p5267_p6 = pnand %p4545_p5, %p6136_p1 }
  0x2e   : > { %s4688_s26 = scalar_lea.hbm %s6171_s8, 2048  ;;  %p5283_p8 = pneg %p5267_p6 }
  0x2f   : > { %p4689_p7 = scmp.ne.s32.totalorder %s6171_s8, %s4688_s26  ;;  %p4695_p11 = scmp.lt.u32.totalorder %s4688_s26, %s6171_s8 }
  0x31   : > { %p4691_p9 = pnand %p5283_p8, %p4689_p7 }
  0x33   : > { %p4692_p10 = pneg %p4691_p9 }
  0x35   : > { %p4697_p12 = pnand %p4695_p11, %p4692_p10 }
  0x37   : > { %4700 = shalt.err (!%p4697_p12)
}
  0x38   : > { %s4701_s23 = scalar_lea.vmem %s5256_s4, 2048  ;;  %p4709_p5 = scmp.lt.s32.totalorder %s5256_s4, %s5256_s4 }
  0x39   : > { %p4702_p13 = scmp.ne.s32.totalorder %s5256_s4, %s4701_s23  ;;  %p4710_p4 = scmp.lt.s32.totalorder %s4701_s23, %s4701_s23 }
  0x3b   : > { %p4704_p0 = pnand %p4702_p13, %p5283_p8  ;;  %p4711_p7 = por %p4710_p4, %p4709_p5 }
  0x3d   : > { %p4705_p2 = pneg %p4704_p0 }
  0x3f   : > { %p4712_p9 = pnand %p4711_p7, %p4705_p2 }
  0x41   : > { %4715 = shalt.err (!%p4712_p9)
}
  0x42   : > { %s6138_s25 = smov 128   ;;  %s6140_s21 = smov 8  }
  0x43   : > { %4551 = dma.hbm_to_vmem [thread:$0]  (!%p5267_p6), %s6171_s8, 2048, %s5256_s4, [#allocation8], %s6138_s25, %s6138_s25, %s6140_s21  }
  0x44   : > { %s6173_s12 = sld [smem:[#allocation41_spill]] }
  0x4a   : > { %s4716_s23 = scalar_lea.hbm %s6173_s12, 8192 }
  0x4b   : > { %p4717_p4 = scmp.ne.s32.totalorder %s6173_s12, %s4716_s23  ;;  %p4723_p12 = scmp.lt.u32.totalorder %s4716_s23, %s6173_s12 }
  0x4d   : > { %p4719_p10 = pnand %p4717_p4, %p5283_p8 }
  0x4f   : > { %p4720_p11 = pneg %p4719_p10 }
  0x51   : > { %p4725_p13 = pnand %p4723_p12, %p4720_p11 }
  0x53   : > { %4728 = shalt.err (!%p4725_p13)
}
  0x54   : > { %s4729_s4 = scalar_lea.vmem %s5271_s30, 8192  ;;  %p4737_p7 = scmp.lt.s32.totalorder %s5271_s30, %s5271_s30 }
  0x55   : > { %p4730_p0 = scmp.ne.s32.totalorder %s5271_s30, %s4729_s4  ;;  %p4738_p9 = scmp.lt.s32.totalorder %s4729_s4, %s4729_s4 }
  0x57   : > { %p4732_p2 = pnand %p4730_p0, %p5283_p8  ;;  %p4739_p4 = por %p4738_p9, %p4737_p7 }
  0x59   : > { %p4733_p5 = pneg %p4732_p2 }
  0x5b   : > { %p4740_p10 = pnand %p4739_p4, %p4733_p5 }
  0x5d   : > { %4743 = shalt.err (!%p4740_p10)
}
  0x5e   : > { %4557 = dma.hbm_to_vmem [thread:$0]  (!%p5267_p6), %s6173_s12, 8192, %s5271_s30, [#allocation11], %s6138_s25, %s6138_s25, %s6140_s21  }
  0x5f   : > { %s6174_s14 = sld [smem:[#allocation43_spill]] }
  0x65   : > { %s4744_s26 = scalar_lea.hbm %s6174_s14, 8192 }
  0x66   : > { %p4745_p11 = scmp.ne.s32.totalorder %s6174_s14, %s4744_s26  ;;  %p4751_p0 = scmp.lt.u32.totalorder %s4744_s26, %s6174_s14 }
  0x68   : > { %p4747_p12 = pnand %p4745_p11, %p5283_p8 }
  0x6a   : > { %p4748_p13 = pneg %p4747_p12 }
  0x6c   : > { %p4753_p2 = pnand %p4751_p0, %p4748_p13 }
  0x6e   : > { %4756 = shalt.err (!%p4753_p2)
}
  0x6f   : > { %s4757_s30 = scalar_lea.vmem %s5273_s10, 8192  ;;  %p4765_p4 = scmp.lt.s32.totalorder %s5273_s10, %s5273_s10 }
  0x70   : > { %p4758_p5 = scmp.ne.s32.totalorder %s5273_s10, %s4757_s30  ;;  %p4766_p10 = scmp.lt.s32.totalorder %s4757_s30, %s4757_s30 }
  0x72   : > { %p4760_p7 = pnand %p4758_p5, %p5283_p8  ;;  %p4767_p11 = por %p4766_p10, %p4765_p4 }
  0x74   : > { %p4761_p9 = pneg %p4760_p7 }
  0x76   : > { %p4768_p12 = pnand %p4767_p11, %p4761_p9 }
  0x78   : > { %4771 = shalt.err (!%p4768_p12)
}
  0x79   : > { %4563 = dma.hbm_to_vmem [thread:$0]  (!%p5267_p6), %s6174_s14, 8192, %s5273_s10, [#allocation14], %s6138_s25, %s6138_s25, %s6140_s21  }
  0x7a   : > { %s5080_s16 = smov [#allocation16]   ;;  %s4772_s6 = scalar_lea.hbm %s6121_s20, 2048 }
  0x7b   : > { %s763_s17 = sshll.u32 %s5080_s16, 4  ;;  %p4773_p13 = scmp.ne.s32.totalorder %s6121_s20, %s4772_s6  ;;  %s764_s17 = int_to_ptr.vmem [resolvable:$true] %s763_s17 }
  0x7c   : > { %p4779_p5 = scmp.lt.u32.totalorder %s4772_s6, %s6121_s20 }
  0x7d   : > { %p4775_p0 = pnand %p4773_p13, %p5283_p8 }
  0x7f   : > { %p4776_p2 = pneg %p4775_p0 }
  0x81   : > { %p4781_p7 = pnand %p4779_p5, %p4776_p2 }
  0x83   : > { %4784 = shalt.err (!%p4781_p7)
}
  0x84   : > { %s4785_s10 = scalar_lea.vmem %s764_s17, 2048  ;;  %p4793_p11 = scmp.lt.s32.totalorder %s764_s17, %s764_s17 }
  0x85   : > { %p4786_p9 = scmp.ne.s32.totalorder %s764_s17, %s4785_s10  ;;  %p4794_p12 = scmp.lt.s32.totalorder %s4785_s10, %s4785_s10 }
  0x87   : > { %p4788_p4 = pnand %p4786_p9, %p5283_p8  ;;  %p4795_p1 = por %p4794_p12, %p4793_p11 }
  0x89   : > { %p4789_p10 = pneg %p4788_p4 }
  0x8b   : > { %p4796_p3 = pnand %p4795_p1, %p4789_p10 }
  0x8d   : > { %4799 = shalt.err (!%p4796_p3)
}
  0x8e   : > { %4569 = dma.hbm_to_vmem [thread:$0]  (!%p5267_p6), %s6121_s20, 2048, %s764_s17, [#allocation17], %s6138_s25, %s6138_s25, %s6140_s21  }
  0x8f   : > { %s6175_s26 = sld [smem:[#allocation30_spill]] }
  0x95   : > { %s4800_s6 = scalar_lea.hbm %s6175_s26, 16 }
  0x96   : > { %p4801_p13 = scmp.ne.s32.totalorder %s6175_s26, %s4800_s6  ;;  %p4807_p0 = scmp.lt.u32.totalorder %s4800_s6, %s6175_s26 }
  0x98   : > { %p4803_p1 = pnand %p4801_p13, %p5283_p8 }
  0x9a   : > { %p4804_p3 = pneg %p4803_p1 }
  0x9c   : > { %p4809_p2 = pnand %p4807_p0, %p4804_p3 }
  0x9e   : > { %4812 = shalt.err (!%p4809_p2)
}
  0x9f   : > { %s5081_s10 = smov [#allocation2]   ;;  %s5082_s15 = smov [#allocation9]  }
  0xa0   : > { %4548 = dma.hbm_to_smem (!%p5267_p6), %s6175_s26, 16, %s5081_s10, [#allocation5]  }
  0xa1   : > { %s671_s16 = sshll.u32 %s5082_s15, 4  ;;  %s5083_s19 = smov [#allocation12]   ;;  %s672_s16 = int_to_ptr.vmem [resolvable:$true] %s671_s16 }
  0xa2   : > { %s712_s1 = sshll.u32 %s5083_s19, 4  ;;  %s6176_s21 = sld [smem:[#allocation35_spill]]  ;;  %s713_s1 = int_to_ptr.vmem [resolvable:$true] %s712_s1 }
  0xa8   : > { %s4813_s23 = scalar_lea.hbm %s6176_s21, 16 }
  0xa9   : > { %p4814_p5 = scmp.ne.s32.totalorder %s6176_s21, %s4813_s23  ;;  %p4820_p4 = scmp.lt.u32.totalorder %s4813_s23, %s6176_s21 }
  0xab   : > { %p4816_p7 = pnand %p4814_p5, %p5283_p8 }
  0xad   : > { %p4817_p9 = pneg %p4816_p7 }
  0xaf   : > { %p4822_p10 = pnand %p4820_p4, %p4817_p9 }
  0xb1   : > { %4825 = shalt.err (!%p4822_p10)
}
  0xb2   : > { %s4826_s10 = scalar_lea.vmem %s672_s16, 16  ;;  %s4833_s25 = scalar_lea.vmem %s672_s16, 32 }
  0xb3   : > { %p4827_p11 = scmp.ne.s32.totalorder %s672_s16, %s4826_s10  ;;  %p4834_p1 = scmp.lt.s32.totalorder %s672_s16, %s672_s16 }
  0xb4   : > { %p4835_p3 = scmp.lt.s32.totalorder %s4833_s25, %s4826_s10 }
  0xb5   : > { %p4829_p12 = pnand %p4827_p11, %p5283_p8 }
  0xb6   : > { %p4836_p0 = por %p4835_p3, %p4834_p1 }
  0xb7   : > { %p4830_p13 = pneg %p4829_p12 }
  0xb9   : > { %p4837_p2 = pnand %p4836_p0, %p4830_p13 }
  0xbb   : > { %4840 = shalt.err (!%p4837_p2)
}
  0xbc   : > { %4554 = dma.hbm_to_vmem [thread:$0]  (!%p5267_p6), %s6176_s21, 16, %s672_s16, [#allocation8]  }
  0xbd   : > { %s6177_s13 = sld [smem:[#allocation42_spill]] }
  0xc3   : > { %s4841_s5 = scalar_lea.hbm %s6177_s13, 8192 }
  0xc4   : > { %p4842_p5 = scmp.ne.s32.totalorder %s6177_s13, %s4841_s5  ;;  %p4848_p4 = scmp.lt.u32.totalorder %s4841_s5, %s6177_s13 }
  0xc6   : > { %p4844_p7 = pnand %p4842_p5, %p5283_p8 }
  0xc8   : > { %p4845_p9 = pneg %p4844_p7 }
  0xca   : > { %p4850_p10 = pnand %p4848_p4, %p4845_p9 }
  0xcc   : > { %4853 = shalt.err (!%p4850_p10)
}
  0xcd   : > { %s4854_s10 = scalar_lea.vmem %s713_s1, 8192  ;;  %p4862_p1 = scmp.lt.s32.totalorder %s713_s1, %s713_s1 }
  0xce   : > { %p4855_p11 = scmp.ne.s32.totalorder %s713_s1, %s4854_s10  ;;  %p4863_p3 = scmp.lt.s32.totalorder %s4854_s10, %s4854_s10 }
  0xd0   : > { %p4857_p12 = pnand %p4855_p11, %p5283_p8  ;;  %p4864_p0 = por %p4863_p3, %p4862_p1 }
  0xd2   : > { %p4858_p13 = pneg %p4857_p12 }
  0xd4   : > { %p4865_p2 = pnand %p4864_p0, %p4858_p13 }
  0xd6   : > { %4868 = shalt.err (!%p4865_p2)
}
  0xd7   : > { %s6178_s16 = smov 8   ;;  %s6179_s25 = smov 128  }
  0xd8   : > { %4560 = dma.hbm_to_vmem [thread:$0]  (!%p5267_p6), %s6177_s13, 8192, %s713_s1, [#allocation11], %s6179_s25, %s6179_s25, %s6178_s16  }
  0xd9   : > { %s5084_s8 = smov [#allocation15]   ;;  %s5085_s5 = smov [#allocation18]  }
  0xda   : > { %s747_s19 = sshll.u32 %s5084_s8, 4  ;;  %s779_s23 = sshll.u32 %s5085_s5, 4  ;;  %s748_s19 = int_to_ptr.vmem [resolvable:$true] %s747_s19  ;;  %s780_s23 = int_to_ptr.vmem [resolvable:$true] %s779_s23 }
  0xdb   : > { %s6180_s18 = sld [smem:[#allocation47_spill]] }
  0xe1   : > { %s4869_s17 = scalar_lea.hbm %s6180_s18, 8192 }
  0xe2   : > { %p4870_p5 = scmp.ne.s32.totalorder %s6180_s18, %s4869_s17  ;;  %p4876_p4 = scmp.lt.u32.totalorder %s4869_s17, %s6180_s18 }
  0xe4   : > { %p4872_p7 = pnand %p4870_p5, %p5283_p8 }
  0xe6   : > { %p4873_p9 = pneg %p4872_p7 }
  0xe8   : > { %p4878_p10 = pnand %p4876_p4, %p4873_p9 }
  0xea   : > { %4881 = shalt.err (!%p4878_p10)
}
  0xeb   : > { %s4882_s1 = scalar_lea.vmem %s748_s19, 8192  ;;  %p4890_p1 = scmp.lt.s32.totalorder %s748_s19, %s748_s19 }
  0xec   : > { %p4883_p11 = scmp.ne.s32.totalorder %s748_s19, %s4882_s1  ;;  %p4891_p3 = scmp.lt.s32.totalorder %s4882_s1, %s4882_s1 }
  0xee   : > { %p4885_p12 = pnand %p4883_p11, %p5283_p8  ;;  %p4892_p0 = por %p4891_p3, %p4890_p1 }
  0xf0   : > { %p4886_p13 = pneg %p4885_p12 }
  0xf2   : > { %p4893_p2 = pnand %p4892_p0, %p4886_p13 }
  0xf4   : > { %4896 = shalt.err (!%p4893_p2)
}
  0xf5   : > { %4566 = dma.hbm_to_vmem [thread:$0]  (!%p5267_p6), %s6180_s18, 8192, %s748_s19, [#allocation14], %s6179_s25, %s6179_s25, %s6178_s16  }
  0xf6   : > { %s4897_s5 = scalar_lea.hbm %s6123_s22, 2048 }
  0xf7   : > { %p4898_p5 = scmp.ne.s32.totalorder %s6123_s22, %s4897_s5  ;;  %p4904_p4 = scmp.lt.u32.totalorder %s4897_s5, %s6123_s22 }
  0xf9   : > { %p4900_p7 = pnand %p4898_p5, %p5283_p8 }
  0xfb   : > { %p4901_p9 = pneg %p4900_p7 }
  0xfd   : > { %p4906_p10 = pnand %p4904_p4, %p4901_p9 }
  0xff   : > { %4909 = shalt.err (!%p4906_p10)
}
 0x100   : > { %s4910_s4 = scalar_lea.vmem %s780_s23, 2048  ;;  %p4918_p1 = scmp.lt.s32.totalorder %s780_s23, %s780_s23 }
 0x101   : > { %p4911_p11 = scmp.ne.s32.totalorder %s780_s23, %s4910_s4  ;;  %p4919_p3 = scmp.lt.s32.totalorder %s4910_s4, %s4910_s4 }
 0x103   : > { %p4913_p12 = pnand %p4911_p11, %p5283_p8  ;;  %p4920_p0 = por %p4919_p3, %p4918_p1 }
 0x105   : > { %p4914_p13 = pneg %p4913_p12 }
 0x107   : > { %p4921_p2 = pnand %p4920_p0, %p4914_p13 }
 0x109   : > { %4924 = shalt.err (!%p4921_p2)
}
 0x10a   : > { %4572 = dma.hbm_to_vmem [thread:$0]  (!%p5267_p6), %s6123_s22, 2048, %s780_s23, [#allocation17], %s6179_s25, %s6179_s25, %s6178_s16  }
 0x10b   : > { %s5086_s12 = smov [#allocation19]   ;;  %s4925_s5 = scalar_lea.hbm %s6125_s24, 2048 }
 0x10c   : > { %s795_s14 = sshll.u32 %s5086_s12, 4  ;;  %p4926_p5 = scmp.ne.s32.totalorder %s6125_s24, %s4925_s5  ;;  %s796_s14 = int_to_ptr.vmem [resolvable:$true] %s795_s14 }
 0x10d   : > { %p4932_p4 = scmp.lt.u32.totalorder %s4925_s5, %s6125_s24 }
 0x10e   : > { %p4928_p7 = pnand %p4926_p5, %p5283_p8 }
 0x110   : > { %p4929_p9 = pneg %p4928_p7 }
 0x112   : > { %p4934_p10 = pnand %p4932_p4, %p4929_p9 }
 0x114   : > { %4937 = shalt.err (!%p4934_p10)
}
 0x115   : > { %s4938_s23 = scalar_lea.vmem %s796_s14, 2048  ;;  %p4946_p1 = scmp.lt.s32.totalorder %s796_s14, %s796_s14 }
 0x116   : > { %p4939_p11 = scmp.ne.s32.totalorder %s796_s14, %s4938_s23  ;;  %p4947_p3 = scmp.lt.s32.totalorder %s4938_s23, %s4938_s23 }
 0x118   : > { %p4941_p12 = pnand %p4939_p11, %p5283_p8  ;;  %p4948_p0 = por %p4947_p3, %p4946_p1 }
 0x11a   : > { %p4942_p13 = pneg %p4941_p12 }
 0x11c   : > { %p4949_p2 = pnand %p4948_p0, %p4942_p13 }
 0x11e   : > { %4952 = shalt.err (!%p4949_p2)
}
 0x11f   : > { %4575 = dma.hbm_to_vmem [thread:$0]  (!%p5267_p6), %s6125_s24, 2048, %s796_s14, [#allocation20], %s6179_s25, %s6179_s25, %s6178_s16  }
 0x120   : > { %s3682_s2 = sadd.s32 4294967294, %s5073_s28   ;;  %s5500_s9 = sadd.s32 1, %s5073_s28  }
 0x121   : > { %s73_s1 = ssub.s32 %s5073_s28, %s5500_s9  ;;  %s76_s12 = sadd.s32 1, %s5069_s7 }
 0x122   : > { %p74_p8 = scmp.eq.s32.totalorder %s73_s1, 0  ;;  %p83_p5 = scmp.ne.s32.totalorder %s5069_s7, %s5065_s3 }
 0x123   : > { %p84_p7 = scmp.eq.s32.totalorder %s5073_s28, 0  ;;  %p89_p9 = scmp.ne.s32.totalorder %s5065_s3, %s5061_s27 }
 0x124   : > { %s5511_s15 = scalar_select %p74_p8, %s5069_s7, %s76_s12  }
 0x125   : > { %p5513_p4 = por %p84_p7, %p83_p5  ;;  %p6182_p10 = scmp.eq.s32.totalorder %s5251_s29, 0 }
 0x126   : > { %p617_p11 = scmp.eq.s32.totalorder %s5251_s29, 1  ;;  %p623_p12 = scmp.eq.s32.totalorder %s3682_s2, 1 }
 0x127   : > { %p5519_p6 = por %p6182_p10, %p89_p9  ;;  %p4594_p13 = scmp.lt.s32.totalorder %s5073_s28, 2 }
 0x128   : > { %s812_s5 = sand.u32 1, %s5069_s7   ;;  %p5526_p1 = por %p617_p11, %p83_p5 }
 0x129   : > { %p5530_p3 = por %p623_p12, %p89_p9  ;;  %s3695_s17 = sshll.u32 %s812_s5, 4 }
 0x12a   : > { %s6184_s6 = scalar_select %p5526_p1, 1, 0 }
 0x12b   : > { %s6185_s30 = scalar_select %p5530_p3, 1, 0 }
 0x12c   : > { %s3770_s10 = sshll.u32 %s5073_s28, 8  ;;  %s6186_s19 = sld [smem:[#allocation31_spill]] }
 0x12d   : > { %s816_s2 = scalar_lea.vmem [#allocation6], %s3695_s17  ;;  %p5544_p0 = pnand %p4594_p13, %p5513_p4 }
 0x12e   : > { %s823_s12 = sshll.u32 %s816_s2, 4  ;;  %s5548_s18 = scalar_lea.sflag [#allocation3], %s812_s5  ;;  %s5540_s12 = int_to_ptr.vmem [resolvable:$true] %s823_s12 }
 0x12f   : > { %p4955_p8 = pneg %p5544_p0 }
 0x132   : > { %s5538_s1 = scalar_lea.hbm %s6186_s19, %s3770_s10  ;;  %s4958_s8 = scalar_lea.hbm %s6186_s19, 512 }
 0x133   : > { %s4953_s23 = scalar_lea.hbm %s5538_s1, 256  ;;  %p4959_p9 = scmp.lt.u32.totalorder %s5538_s1, %s6186_s19 }
 0x134   : > { %p4954_p2 = scmp.ne.s32.totalorder %s5538_s1, %s4953_s23  ;;  %p4960_p4 = scmp.lt.u32.totalorder %s4958_s8, %s4953_s23 }
 0x135   : > { %p4962_p11 = scmp.lt.u32.totalorder %s4953_s23, %s5538_s1 }
 0x136   : > { %p4956_p5 = pnand %p4955_p8, %p4954_p2  ;;  %p4961_p10 = por %p4960_p4, %p4959_p9 }
 0x138   : > { %p4957_p7 = pneg %p4956_p5  ;;  %p4963_p12 = por %p4962_p11, %p4961_p10 }
 0x13a   : > { %p4964_p13 = pnand %p4963_p12, %p4957_p7 }
 0x13c   : > { %4967 = shalt.err (!%p4964_p13)
}
 0x13d   : > { %s4968_s5 = scalar_lea.vmem %s5540_s12, 256  ;;  %s5087_s17 = smov [#allocation6]  }
 0x13e   : > { %p4969_p2 = scmp.ne.s32.totalorder %s5540_s12, %s4968_s5  ;;  %s4973_s10 = sshll.u32 %s5087_s17, 4  ;;  %s4974_s10 = int_to_ptr.vmem [resolvable:$false] %s4973_s10 }
 0x13f   : > { %s4975_s4 = scalar_lea.vmem %s4974_s10, 512  ;;  %p4976_p1 = scmp.lt.s32.totalorder %s5540_s12, %s4974_s10 }
 0x140   : > { %p4971_p5 = pnand %p4969_p2, %p4955_p8  ;;  %p4977_p9 = scmp.lt.s32.totalorder %s4975_s4, %s4968_s5 }
 0x142   : > { %p4972_p3 = pneg %p4971_p5  ;;  %p4978_p4 = por %p4977_p9, %p4976_p1 }
 0x144   : > { %p4979_p10 = pnand %p4978_p4, %p4972_p3 }
 0x146   : > { %4982 = shalt.err (!%p4979_p10)
}
 0x147   : > { %4579 = dma.hbm_to_vmem [thread:$0]  (!%p5544_p0), %s5538_s1, 256, %s5540_s12, %s5548_s18, %s6179_s25, %s6179_s25, %s6178_s16  }
 0x148   : > { %p6188_p8 = scmp.ne.s32.totalorder %s6169_s0, 0 }
 0x149   : > { %p6189_p7 = scmp.eq.s32.totalorder (!%p6188_p8), %s5251_s29, 0 }
 0x14a   : > { %835 = sbr.rel (%p6188_p8) target bundleno = 6242 (0x1862), region = 124 }
 0x151   : > { %5028 = dma.done.wait (%p6189_p7), [#allocation5], 16   ;;  %p6190_p11 = pmov %p6189_p7 }
 0x152   : > { %s5586_s23 = sand.u32 1, %s5065_s3  }
 0x153   : > { %5030 = vsyncadd (%p6190_p11), [#allocation5], 4294967280  ;;  %s6144_s13 = sshll.u32 %s5586_s23, 4  ;;  %s842_s8 = scalar_lea.sflag [#allocation3], %s5586_s23 }
 0x154   : > { %s5592_s18 = scalar_lea.vmem [#allocation6], %s6144_s13 }
 0x155   : > { %5032 = dma.done.wait (%p5519_p6), %s842_s8, 256  }
 0x156   : > { %5034 = vsyncadd (%p5519_p6), %s842_s8, 4294967040  ;;  %p6191_p1 = pmov %p6189_p7 }
 0x158   : > { %5036 = dma.done.wait (%p6191_p1), [#allocation8], 2064   ;;  %p6192_p3 = pmov %p6191_p1 }
 0x159   : > { %p6193_p0 = pmov %p6191_p1 }
 0x15a   : > { %5038 = vsyncadd (%p6192_p3), [#allocation8], 4294965232 }
 0x15b   : > { %5040 = dma.done.wait (%p6193_p0), [#allocation11], 16384   ;;  %p6194_p12 = pmov %p6193_p0 }
 0x15c   : > { %p6195_p13 = pmov %p6193_p0 }
 0x15d   : > { %5042 = vsyncadd (%p6194_p12), [#allocation11], 4294950912 }
 0x15e   : > { %5044 = dma.done.wait (%p6195_p13), [#allocation14], 16384   ;;  %p6196_p2 = pmov %p6193_p0 }
 0x15f   : > { %p6197_p6 = pmov %p6193_p0 }
 0x160   : > { %5046 = vsyncadd (%p6196_p2), [#allocation14], 4294950912 }
 0x161   : > { %5048 = dma.done.wait (%p6197_p6), [#allocation17], 4096   ;;  %p6198_p5 = pmov %p6193_p0 }
 0x162   : > { %p6199_p9 = pmov %p6193_p0 }
 0x163   : > { %5050 = vsyncadd (%p6198_p5), [#allocation17], 4294963200 }
 0x164   : > { %5052 = dma.done.wait (%p6199_p9), [#allocation20], 2048   ;;  %p6200_p4 = pmov %p6193_p0 }
 0x166   : > { %5054 = vsyncadd (%p6200_p4), [#allocation20], 4294965248 }
 0x167   : > { %886 = sfence }
 0x168   : > { %v954_v0 = vld [vmem:[#allocation7] sm:$0xff]  ;;  %v955_v1 = vld [vmem:[#allocation7 + $0x8] sm:$0xff]  ;;  %v956_v2 = vld [vmem:[#allocation7 + $0x10] sm:$0xff]  ;;  %v5088_v3 = vmov 0.0   ;;  %vm5089_vm0 = vmmov 0   ;;  %s1027_s0 = sld [smem:[#allocation2]]  ;;  %v1095_v59 = vlaneseq }
 0x169   : > { %3986 = vmatprep.subr.bf16.mxu0 %v5088_v3  ;;  %v971_v4 = vpack.c.bf16 %v955_v1, %v954_v0  ;;  %v957_v5 = vld [vmem:[#allocation7 + $0x18] sm:$0xff]  ;;  %4002 = vmatprep.mubr.msk.bf16.mxu0 %vm5089_vm0, %v5088_v3  ;;  %v958_v7 = vld [vmem:[#allocation7 + $0x20] sm:$0xff]  ;;  %v959_v8 = vld [vmem:[#allocation7 + $0x28] sm:$0xff]  ;;  %s6201_s14 = sld [smem:[#allocation33_spill]]  ;;  %v5090_v57 = vmov 0.0|0.0   ;;  %s5091_s4 = smov 0.0  }
 0x16a   : > { %4017 = vmatprep.mubr.msk.f32.mxu1 %vm5089_vm0, %v5088_v3  ;;  %v972_v6 = vpack.c.bf16 %v957_v5, %v956_v2  ;;  %v973_v9 = vpack.c.bf16 %v959_v8, %v958_v7  ;;  %v960_v10 = vld [vmem:[#allocation7 + $0x30] sm:$0xff]  ;;  %v961_v11 = vld [vmem:[#allocation7 + $0x38] sm:$0xff]  ;;  %v962_v13 = vld [vmem:[#allocation7 + $0x40] sm:$0xff]  ;;  %4477 = vmatprep.subr.bf16.mxu1 %v5090_v57  ;;  %v5639_v60 = vshrl.u32 %v1095_v59, 7  ;;  %v5642_v62 = vand.u32 127, %v1095_v59  ;;  %s6207_s13 = sld [smem:[#allocation38_spill]] }
 0x16b   : > { %3987 = vmatpush3.bf16.msra.mxu0 %v971_v4  ;;  %v974_v12 = vpack.c.bf16 %v961_v11, %v960_v10  ;;  %v963_v14 = vld [vmem:[#allocation7 + $0x48] sm:$0xff]  ;;  %v964_v16 = vld [vmem:[#allocation7 + $0x50] sm:$0xff]  ;;  %v965_v17 = vld [vmem:[#allocation7 + $0x58] sm:$0xff]  ;;  %vm1119_vm8 = vcmask 130048   ;;  %vm1884_vm12 = vcmask 1043456   ;;  %vm1867_vm13 = vcmask 64512  }
 0x16c   : > { %3988 = vmatprep.subr.bf16.mxu0 %v5088_v3  ;;  %v975_v15 = vpack.c.bf16 %v963_v14, %v962_v13  ;;  %v976_v18 = vpack.c.bf16 %v965_v17, %v964_v16  ;;  %v966_v19 = vld [vmem:[#allocation7 + $0x60] sm:$0xff]  ;;  %v967_v20 = vld [vmem:[#allocation7 + $0x68] sm:$0xff]  ;;  %v968_v22 = vld [vmem:[#allocation7 + $0x70] sm:$0xff]  ;;  %v1099_v61 = vmul.u32 2, %v5639_v60  ;;  %v1115_v7 = vsub.s32 1, %v5639_v60  ;;  %s3771_s19 = sshll.u32 %s5251_s29, 8 }
 0x16d   : > { %v977_v21 = vpack.c.bf16 %v967_v20, %v966_v19  ;;  %v969_v23 = vld [vmem:[#allocation7 + $0x78] sm:$0xff]  ;;  %v952_v25 = vld [vmem:[%s5592_s18] sm:$0xff]  ;;  %v1106_v8 = vsub.s32 0, %v5639_v60  ;;  %v1272_v14 = vsub.s32 2, %v5639_v60  ;;  %s3498_s29 = scalar_lea.sflag [#allocation4], %s5586_s23  ;;  %p6221_p8 = scmp.ne.s32.totalorder %s6184_s6, 0 }
 0x16e   : > { %v978_v24 = vpack.c.bf16 %v969_v23, %v968_v22  ;;  %v953_v26 = vld [vmem:[%s5592_s18 + $0x8] sm:$0xff]  ;;  %v1030_v30 = vstv %s1027_s0  ;;  %v5644_v63 = vadd.s32 2, %v1099_v61  ;;  %vm1499_vm3 = vcmp.ge.s32.totalorder %v5642_v62, %v1099_v61 }
 0x16f   : > { %3989 = vmatpush3.bf16.msra.mxu0 %v972_v6  ;;  %v970_v27 = vpack.c.bf16 %v953_v26, %v952_v25  ;;  %v3711_v28 = vld [vmem:[%s6201_s14] ss:$0 sm:$0xff]  ;;  %v1100_v20 = vadd.s32 4294967295, %v1099_v61  ;;  %vm1110_vm6 = vcmp.eq.s32.totalorder %v5642_v62, %v1099_v61 }
 0x170   : > { %3990 = vmatprep.subr.bf16.mxu0 %v5088_v3  ;;  %vm1500_vm4 = vcmp.lt.s32.totalorder %v5642_v62, %v5644_v63  ;;  %vm1351_vm10 = vcmp.eq.s32.totalorder %v5642_v62, %v5644_v63 }
 0x171   : > { %vm5649_vm5 = vmand %vm1499_vm3, %vm1500_vm4  ;;  %vm1101_vm7 = vcmp.eq.s32.totalorder %v5642_v62, %v1100_v20  ;;  %v1682_v20 = vld [vmem:[#allocation12] sm:$0xff] }
 0x173   : > { %3991 = vmatpush3.bf16.msra.mxu0 %v973_v9 }
 0x174   : > { %3992 = vmatprep.subr.bf16.mxu0 %v5088_v3 }
 0x177   : > { %3993 = vmatpush3.bf16.msra.mxu0 %v974_v12 }
 0x178   : > { %3994 = vmatprep.subr.bf16.mxu0 %v5088_v3 }
 0x17b   : > { %3995 = vmatpush3.bf16.msra.mxu0 %v975_v15  ;;  %v3713_v15 = vld [vmem:[#allocation9] ss:$0 sm:$0xff] }
 0x17c   : > { %3996 = vmatprep.subr.bf16.mxu0 %v5088_v3 }
 0x17f   : > { %3997 = vmatpush3.bf16.msra.mxu0 %v976_v18 }
 0x180   : > { %3998 = vmatprep.subr.bf16.mxu0 %v5088_v3 }
 0x183   : > { %3999 = vmatpush3.bf16.msra.mxu0 %v977_v21  ;;  %v1356_v21 = vsub.s32 3, %v5639_v60 }
 0x184   : > { %4000 = vmatprep.subr.bf16.mxu0 %v5088_v3 }
 0x187   : > { %4001 = vmatpush3.bf16.msra.mxu0 %v978_v24 }
 0x188   : > { %4474 = vmatprep.subr.bf16.mxu0 %v5090_v57 }
 0x18a   : > { %4003 = vmatmul.mubr.bf16.vlgmr.msra.gmra.mrb[0].mxu0 %v970_v27 }
 0x18b   : > { %4010 = vmatprep.mubr.msk.f32.mxu0 %vm5089_vm0, %v5088_v3 }
 0x25d   : > { %v1020_v29 = vpop.f32.mrb[0].mxu0 }
 0x25e   : > { %v1021_v31 = vadd.f32 %v3711_v28, %v1020_v29  ;;  %v4004_v32 = vpop.f32.mrb[1].mxu0  ;;  %v1266_v29 = vadd.s32 1, %v1099_v61 }
 0x25f   : > { %v1023_v33 = vpop.f32.mrb[2].mxu0 }
 0x260   : > { %v1031_v34 = vmul.f32 %v1030_v30, %v1021_v31  ;;  %v1024_v35 = vadd.f32 %v3711_v28, %v1023_v33  ;;  %v4005_v36 = vpop.f32.mrb[3].mxu0  ;;  %vm1028_vm1 = vcmp.gt.f32.partialorder %v1021_v31, 0.0  ;;  %vm1267_vm9 = vcmp.eq.s32.totalorder %v5642_v62, %v1266_v29 }
 0x261   : > { %v3714_v36 = vsel %vm1101_vm7, 1.0, %v5088_v3 }
 0x262   : > { %v1032_v37 = vmul.f32 %v1030_v30, %v1024_v35  ;;  %vm1029_vm2 = vcmp.gt.f32.partialorder %v1024_v35, 0.0  ;;  %v1033_v38 = vsel %vm1028_vm1, %v1021_v31, %v1031_v34 }
 0x263   : > { %v1047_v42 = vmul.f32 %v1033_v38, %v1033_v38 }
 0x264   : > { %v1034_v39 = vsel %vm1029_vm2, %v1024_v35, %v1032_v37  ;;  %v3715_v35 = vsel %vm1110_vm6, 1.0, %v5088_v3 }
 0x265   : > { %v1037_v40 = vadd.f32 %v1034_v39, %v1033_v38  ;;  %v1048_v41 = vmul.f32 %v1034_v39, %v1034_v39 }
 0x267   : > { %1038 = vadd.xlane.f32.xlu0 %v1037_v40  ;;  %v1049_v43 = vadd.f32 %v1048_v41, %v1047_v42  ;;  %v3718_v40 = vsel %vm1267_vm9, 1.0, %v5088_v3  ;;  %v3720_v42 = vsel %vm1351_vm10, 1.0, %v5088_v3 }
 0x26b   : > { %1050 = vadd.xlane.f32.xlu0 %v1049_v43 }
 0x2f4   : > { %v1039_v44 = vpop.xlane.xlu0 %1038 }
 0x2f5   : > { %v1040_v45 = vrot.slane %v1039_v44, 4 }
 0x2f7   : > { %v1041_v46 = vadd.f32 %v1040_v45, %v1039_v44  ;;  %v3726_v44 = vsel %vm5649_vm5, 1.0, %v5088_v3 }
 0x2f8   : > { %v1051_v47 = vpop.xlane.xlu0 %1050  ;;  %v1504_v45 = vmul.f32 0.5, %v3726_v44  ;;  %v1615_v44 = vld [vmem:[#allocation10 + $0x20] sm:$0xff] }
 0x2f9   : > { %v1042_v48 = vrot.slane %v1041_v46, 2  ;;  %v1052_v49 = vrot.slane %v1051_v47, 4 }
 0x2fb   : > { %v1053_v50 = vadd.f32 %v1052_v49, %v1051_v47  ;;  %v1043_v51 = vadd.f32 %v1042_v48, %v1041_v46 }
 0x2fd   : > { %v1054_v52 = vrot.slane %v1053_v50, 2  ;;  %v1044_v53 = vrot.slane %v1043_v51, 1 }
 0x2ff   : > { %v1045_v54 = vadd.f32 %v1044_v53, %v1043_v51  ;;  %v1055_v55 = vadd.f32 %v1054_v52, %v1053_v50 }
 0x301   : > { %4489 = vpush %v1045_v54  ;;  %v1056_v56 = vrot.slane %v1055_v55, 1 }
 0x303   : > { %v1057_v58 = vadd.f32 %v1056_v56, %v1055_v55 }
 0x305   : > { %4491 = vpush %v1057_v58 }
 0x332   : > { %s4490_s1 = spop %4489 }
 0x333   : > { %s1061_s12 = smul.f32 0.00390625, %s4490_s1  ;;  %s6204_s1 = sld [smem:[#allocation34_spill]] }
 0x335   : > { %s1065_s2 = smul.f32 %s1061_s12, %s1061_s12  ;;  %v1068_v4 = vstv %s1061_s12  ;;  %s3723_s12 = sld [smem:[#allocation2 + $0x1]] }
 0x336   : > { %s4492_s5 = spop %4491  ;;  %v1069_v5 = vsub.f32 %v1033_v38, %v1068_v4  ;;  %v1070_v6 = vsub.f32 %v1034_v39, %v1068_v4 }
 0x337   : > { %s1064_s17 = smul.f32 0.00390625, %s4492_s5 }
 0x339   : > { %s1066_s10 = ssub.f32 %s1064_s17, %s1065_s2  ;;  %v3712_v9 = vld [vmem:[%s6204_s1] ss:$0 sm:$0xff]  ;;  %s6205_s17 = sld [smem:[#allocation36_spill]] }
 0x33b   : > { %s1067_s8 = smax.f32 %s5091_s4, %s1066_s10  ;;  %v1444_v58 = vstv %s3723_s12 }
 0x33c   : > { %s1071_s0 = sadd.f32 1e-08, %s1067_s8  ;;  %s6211_s8 = sld [smem:[#allocation44_spill]] }
 0x33e   : > { %v1072_v1 = vstv %s1071_s0  ;;  %s6206_s0 = sld [smem:[#allocation37_spill]] }
 0x33f   : > { %4656 = vrsqrt.f32 %v1072_v1  ;;  %v1094_v11 = vld [vmem:[%s6205_s17] sm:$0xf] }
 0x340   : > { %v1116_v18 = vrot.slane %v1094_v11, %v1115_v7  ;;  %v1107_v19 = vrot.slane %v1094_v11, %v1106_v8  ;;  %v1273_v24 = vrot.slane %v1094_v11, %v1272_v14  ;;  %v1357_v30 = vrot.slane %v1094_v11, %v1356_v21 }
 0x344   : > { %v3722_v55 = vld [vmem:[%s6206_s0] ss:$0 sm:$0xff]  ;;  %s6215_s0 = sld [smem:[#allocation48_spill]] }
 0x349   : > { %v4657_v2 = vpop.eup %4656 }
 0x34a   : > { %4493 = vpush %v4657_v2 }
 0x37b   : > { %s4494_s16 = spop %4493 }
 0x37c   : > { %v1075_v10 = vstv %s4494_s16 }
 0x37d   : > { %v1076_v12 = vmul.f32 %v1075_v10, %v1069_v5  ;;  %v1077_v13 = vmul.f32 %v1075_v10, %v1070_v6 }
 0x37f   : > { %v1084_v16 = vmul.f32 %v3712_v9, %v1076_v12  ;;  %v1085_v17 = vmul.f32 %v3712_v9, %v1077_v13 }
 0x381   : > { %v5664_v22 = vadd.f32 %v3713_v15, %v1084_v16  ;;  %v5666_v23 = vadd.f32 %v3713_v15, %v1085_v17 }
 0x383   : > { %v1117_v25 = vmul.f32 %v1116_v18, %v5664_v22  ;;  %v1118_v26 = vmul.f32 %v1116_v18, %v5666_v23  ;;  %v1108_v27 = vmul.f32 %v1107_v19, %v5664_v22  ;;  %v1109_v28 = vmul.f32 %v1107_v19, %v5666_v23  ;;  %v1611_v18 = vld [vmem:[#allocation10] sm:$0xff]  ;;  %v1612_v19 = vld [vmem:[#allocation10 + $0x8] sm:$0xff] }
 0x384   : > { %v1274_v33 = vmul.f32 %v1273_v24, %v5664_v22  ;;  %v1275_v34 = vmul.f32 %v1273_v24, %v5666_v23  ;;  %v1358_v38 = vmul.f32 %v1357_v30, %v5664_v22  ;;  %v1359_v39 = vmul.f32 %v1357_v30, %v5666_v23  ;;  %v1683_v24 = vld [vmem:[#allocation12 + $0x8] sm:$0xff]  ;;  %v3724_v30 = vld [vmem:[%s6207_s13] ss:$0 sm:$0xff]  ;;  %s6216_s13 = sld [smem:[#allocation49_spill]] }
 0x385   : > { %v4475_v31 = vpack.c.bf16 %v1118_v26, %v1117_v25  ;;  %v4478_v32 = vpack.c.bf16 %v1109_v28, %v1108_v27  ;;  %v4487_v43 = vpack.c.bf16 %v5666_v23, %v5664_v22  ;;  %v1627_v21 = vpack.c.bf16 %v1612_v19, %v1611_v18 }
 0x386   : > { %v4481_v37 = vpack.c.bf16 %v1275_v34, %v1274_v33  ;;  %v4484_v41 = vpack.c.bf16 %v1359_v39, %v1358_v38  ;;  %v1698_v25 = vpack.c.bf16 %v1683_v24, %v1682_v20  ;;  %v1613_v38 = vld [vmem:[#allocation10 + $0x10] sm:$0xff]  ;;  %v1614_v39 = vld [vmem:[#allocation10 + $0x18] sm:$0xff] }
 0x387   : > { %4476 = vmatpush3.bf16.msra.mxu0 %v4475_v31  ;;  %4479 = vmatpush3.bf16.msra.mxu1 %v4478_v32 }
 0x388   : > { %4480 = vmatprep.subr.bf16.mxu1 %v5090_v57  ;;  %4061 = vmatprep.subr.bf16.mxu0 %v5088_v3 }
 0x38a   : > { %4011 = vmatmul.mubr.msk.f32.vlgmr.msra.gmra.mrb[4].mxu0 %vm1119_vm8, %v3715_v35  ;;  %4018 = vmatmul.mubr.msk.f32.vlgmr.msra.gmra.mrb[0].mxu1 %vm1119_vm8, %v3714_v36 }
 0x38b   : > { %4482 = vmatpush3.bf16.msra.mxu1 %v4481_v37  ;;  %4024 = vmatprep.mubr.msk.f32.mxu1 %vm5089_vm0, %v5088_v3 }
 0x38c   : > { %4483 = vmatprep.subr.bf16.mxu1 %v5090_v57  ;;  %4077 = vmatprep.mubr.msk.bf16.mxu0 %vm5089_vm0, %v5088_v3 }
 0x38d   : > { %4062 = vmatpush3.bf16.msra.mxu0 %v1698_v25 }
 0x38e   : > { %4025 = vmatmul.mubr.msk.f32.vlgmr.msra.gmra.mrb[2].mxu1 %vm1119_vm8, %v3718_v40  ;;  %4063 = vmatprep.subr.bf16.mxu0 %v5088_v3  ;;  %v1628_v40 = vpack.c.bf16 %v1614_v39, %v1613_v38 }
 0x38f   : > { %4485 = vmatpush3.bf16.msra.mxu1 %v4484_v41  ;;  %4031 = vmatprep.mubr.msk.f32.mxu1 %vm5089_vm0, %v5088_v3  ;;  %v1684_v41 = vld [vmem:[#allocation12 + $0x10] sm:$0xff] }
 0x390   : > { %4486 = vmatprep.subr.bf16.mxu1 %v5090_v57 }
 0x392   : > { %4032 = vmatmul.mubr.msk.f32.vlgmr.msra.gmra.mrb[4].mxu1 %vm1119_vm8, %v3720_v42  ;;  %v1685_v42 = vld [vmem:[#allocation12 + $0x18] sm:$0xff] }
 0x393   : > { %4488 = vmatpush3.bf16.msra.mxu1 %v4487_v43  ;;  %4038 = vmatprep.mubr.msk.f32.mxu1 %vm5089_vm0, %v5088_v3  ;;  %v1699_v43 = vpack.c.bf16 %v1685_v42, %v1684_v41  ;;  %v1755_v41 = vld [vmem:[#allocation13 + $0x10] sm:$0xff]  ;;  %v1756_v42 = vld [vmem:[#allocation13 + $0x18] sm:$0xff] }
 0x394   : > { %4041 = vmatprep.subr.bf16.mxu1 %v5088_v3 }
 0x395   : > { %4064 = vmatpush3.bf16.msra.mxu0 %v1699_v43  ;;  %v1770_v43 = vpack.c.bf16 %v1756_v42, %v1755_v41 }
 0x396   : > { %4039 = vmatmul.mubr.msk.f32.vlgmr.msra.gmra.mrb[6].mxu1 %vm1119_vm8, %v1504_v45  ;;  %v1616_v45 = vld [vmem:[#allocation10 + $0x28] sm:$0xff]  ;;  %4065 = vmatprep.subr.bf16.mxu0 %v5088_v3 }
 0x397   : > { %4057 = vmatprep.mubr.msk.bf16.mxu1 %vm5089_vm0, %v5088_v3  ;;  %4042 = vmatpush3.bf16.msra.mxu1 %v1627_v21 }
 0x398   : > { %4043 = vmatprep.subr.bf16.mxu1 %v5088_v3 }
 0x39b   : > { %4044 = vmatpush3.bf16.msra.mxu1 %v1628_v40 }
 0x39c   : > { %4045 = vmatprep.subr.bf16.mxu1 %v5088_v3 }
 0x45d   : > { %v1189_v46 = vpop.f32.mrb[4].mxu0  ;;  %v1262_v47 = vpop.f32.mrb[0].mxu1 }
 0x45e   : > { %v1263_v48 = vadd.f32 %v1262_v47, %v1189_v46  ;;  %v4019_v49 = vpop.f32.mrb[1].mxu1  ;;  %v4012_v50 = vpop.f32.mrb[5].mxu0  ;;  %v1629_v46 = vpack.c.bf16 %v1616_v45, %v1615_v44  ;;  %v1686_v47 = vld [vmem:[#allocation12 + $0x20] sm:$0xff]  ;;  %v1758_v45 = vld [vmem:[#allocation13 + $0x28] sm:$0xff] }
 0x45f   : > { %v1617_v50 = vld [vmem:[#allocation10 + $0x30] sm:$0xff]  ;;  %v1757_v44 = vld [vmem:[#allocation13 + $0x20] sm:$0xff] }
 0x460   : > { %4046 = vmatpush3.bf16.msra.mxu1 %v1629_v46  ;;  %v1771_v46 = vpack.c.bf16 %v1758_v45, %v1757_v44 }
 0x461   : > { %v1345_v51 = vpop.f32.mrb[2].mxu1  ;;  %4047 = vmatprep.subr.bf16.mxu1 %v5088_v3 }
 0x462   : > { %v1349_v52 = vadd.f32 %v1345_v51, %v1263_v48  ;;  %v4026_v53 = vpop.f32.mrb[3].mxu1  ;;  %v1687_v48 = vld [vmem:[#allocation12 + $0x28] sm:$0xff]  ;;  %v1618_v51 = vld [vmem:[#allocation10 + $0x38] sm:$0xff] }
 0x463   : > { %v1700_v49 = vpack.c.bf16 %v1687_v48, %v1686_v47  ;;  %v1688_v53 = vld [vmem:[#allocation12 + $0x30] sm:$0xff]  ;;  %v1760_v48 = vld [vmem:[#allocation13 + $0x38] sm:$0xff] }
 0x464   : > { %v1759_v47 = vld [vmem:[#allocation13 + $0x30] sm:$0xff] }
 0x465   : > { %v1429_v54 = vpop.f32.mrb[4].mxu1  ;;  %4066 = vmatpush3.bf16.msra.mxu0 %v1700_v49  ;;  %v1772_v49 = vpack.c.bf16 %v1760_v48, %v1759_v47 }
 0x466   : > { %v1433_v56 = vadd.f32 %v1429_v54, %v1349_v52  ;;  %v4033_v57 = vpop.f32.mrb[5].mxu1  ;;  %v1630_v52 = vpack.c.bf16 %v1618_v51, %v1617_v50  ;;  %4067 = vmatprep.subr.bf16.mxu0 %v5088_v3  ;;  %v1689_v54 = vld [vmem:[#allocation12 + $0x38] sm:$0xff]  ;;  %v1761_v50 = vld [vmem:[#allocation13 + $0x40] sm:$0xff]  ;;  %v1762_v51 = vld [vmem:[#allocation13 + $0x48] sm:$0xff] }
 0x467   : > { %v1620_v57 = vld [vmem:[#allocation10 + $0x48] sm:$0xff] }
 0x468   : > { %v1441_v59 = vadd.f32 %v3722_v55, %v1433_v56  ;;  %v1701_v55 = vpack.c.bf16 %v1689_v54, %v1688_v53  ;;  %4048 = vmatpush3.bf16.msra.mxu1 %v1630_v52  ;;  %v1619_v56 = vld [vmem:[#allocation10 + $0x40] sm:$0xff]  ;;  %v1773_v52 = vpack.c.bf16 %v1762_v51, %v1761_v50  ;;  %v1763_v53 = vld [vmem:[#allocation13 + $0x50] sm:$0xff]  ;;  %v1764_v54 = vld [vmem:[#allocation13 + $0x58] sm:$0xff] }
 0x469   : > { %v1574_v15 = vpop.f32.mrb[6].mxu1  ;;  %4049 = vmatprep.subr.bf16.mxu1 %v5088_v3 }
 0x46a   : > { %vm1443_vm11 = vcmp.gt.f32.partialorder %v1441_v59, 0.0  ;;  %v1445_v61 = vmul.f32 %v1444_v58, %v1441_v59  ;;  %v4040_v16 = vpop.f32.mrb[7].mxu1  ;;  %4068 = vmatpush3.bf16.msra.mxu0 %v1701_v55  ;;  %v1631_v58 = vpack.c.bf16 %v1620_v57, %v1619_v56  ;;  %v1774_v55 = vpack.c.bf16 %v1764_v54, %v1763_v53  ;;  %v1765_v56 = vld [vmem:[#allocation13 + $0x60] sm:$0xff]  ;;  %v1766_v57 = vld [vmem:[#allocation13 + $0x68] sm:$0xff] }
 0x46b   : > { %4069 = vmatprep.subr.bf16.mxu0 %v5088_v3  ;;  %v1696_v16 = vld [vmem:[#allocation12 + $0x70] sm:$0xff] }
 0x46c   : > { %v1446_v63 = vsel %vm1443_vm11, %v1441_v59, %v1445_v61  ;;  %v1690_v59 = vld [vmem:[#allocation12 + $0x40] sm:$0xff]  ;;  %v1691_v61 = vld [vmem:[#allocation12 + $0x48] sm:$0xff]  ;;  %4050 = vmatpush3.bf16.msra.mxu1 %v1631_v58  ;;  %v1775_v58 = vpack.c.bf16 %v1766_v57, %v1765_v56 }
 0x46d   : > { %1449 = vadd.xlane.f32.xlu1 %v1446_v63  ;;  %v1458_v0 = vmul.f32 %v1446_v63, %v1446_v63  ;;  %4051 = vmatprep.subr.bf16.mxu1 %v5088_v3 }
 0x471   : > { %1459 = vadd.xlane.f32.xlu1 %v1458_v0  ;;  %v1621_v0 = vld [vmem:[#allocation10 + $0x50] sm:$0xff] }
 0x4fa   : > { %v1450_v1 = vpop.xlane.xlu1 %1449 }
 0x4fb   : > { %v1451_v2 = vrot.slane %v1450_v1, 4 }
 0x4fd   : > { %v1452_v4 = vadd.f32 %v1451_v2, %v1450_v1  ;;  %v1622_v1 = vld [vmem:[#allocation10 + $0x58] sm:$0xff] }
 0x4fe   : > { %v1460_v5 = vpop.xlane.xlu1 %1459  ;;  %v1632_v2 = vpack.c.bf16 %v1622_v1, %v1621_v0  ;;  %v2027_v0 = vld [vmem:[#allocation12 + $0x80] sm:$0xff]  ;;  %v2028_v1 = vld [vmem:[#allocation12 + $0x88] sm:$0xff] }
 0x4ff   : > { %v1453_v6 = vrot.slane %v1452_v4, 2  ;;  %v1461_v7 = vrot.slane %v1460_v5, 4 }
 0x500   : > { %4052 = vmatpush3.bf16.msra.mxu1 %v1632_v2  ;;  %v2043_v2 = vpack.c.bf16 %v2028_v1, %v2027_v0 }
 0x501   : > { %v1462_v8 = vadd.f32 %v1461_v7, %v1460_v5  ;;  %v1454_v9 = vadd.f32 %v1453_v6, %v1452_v4  ;;  %v1692_v4 = vld [vmem:[#allocation12 + $0x50] sm:$0xff]  ;;  %v1693_v5 = vld [vmem:[#allocation12 + $0x58] sm:$0xff]  ;;  %4053 = vmatprep.subr.bf16.mxu1 %v5088_v3  ;;  %v1623_v7 = vld [vmem:[#allocation10 + $0x60] sm:$0xff] }
 0x502   : > { %v1703_v6 = vpack.c.bf16 %v1693_v5, %v1692_v4  ;;  %v2029_v4 = vld [vmem:[#allocation12 + $0x90] sm:$0xff]  ;;  %v2030_v5 = vld [vmem:[#allocation12 + $0x98] sm:$0xff] }
 0x503   : > { %v1463_v10 = vrot.slane %v1462_v8, 2  ;;  %v1455_v11 = vrot.slane %v1454_v9, 1 }
 0x505   : > { %v1456_v12 = vadd.f32 %v1455_v11, %v1454_v9  ;;  %v1464_v13 = vadd.f32 %v1463_v10, %v1462_v8  ;;  %v1624_v8 = vld [vmem:[#allocation10 + $0x68] sm:$0xff]  ;;  %v1694_v10 = vld [vmem:[#allocation12 + $0x60] sm:$0xff] }
 0x506   : > { %v1633_v9 = vpack.c.bf16 %v1624_v8, %v1623_v7  ;;  %v1695_v11 = vld [vmem:[#allocation12 + $0x68] sm:$0xff]  ;;  %v2031_v7 = vld [vmem:[#allocation12 + $0xa0] sm:$0xff] }
 0x507   : > { %4495 = vpush %v1456_v12  ;;  %v1465_v14 = vrot.slane %v1464_v13, 1  ;;  %v1704_v12 = vpack.c.bf16 %v1695_v11, %v1694_v10  ;;  %v2032_v8 = vld [vmem:[#allocation12 + $0xa8] sm:$0xff]  ;;  %v2033_v10 = vld [vmem:[#allocation12 + $0xb0] sm:$0xff]  ;;  %v2034_v11 = vld [vmem:[#allocation12 + $0xb8] sm:$0xff] }
 0x508   : > { %4054 = vmatpush3.bf16.msra.mxu1 %v1633_v9  ;;  %v2045_v9 = vpack.c.bf16 %v2032_v8, %v2031_v7 }
 0x509   : > { %v1466_v17 = vadd.f32 %v1465_v14, %v1464_v13  ;;  %4055 = vmatprep.subr.bf16.mxu1 %v5088_v3  ;;  %v1625_v13 = vld [vmem:[#allocation10 + $0x70] sm:$0xff]  ;;  %v1626_v14 = vld [vmem:[#allocation10 + $0x78] sm:$0xff] }
 0x50b   : > { %4497 = vpush %v1466_v17  ;;  %v1697_v17 = vld [vmem:[#allocation12 + $0x78] sm:$0xff] }
 0x50c   : > { %v1705_v18 = vpack.c.bf16 %v1697_v17, %v1696_v16  ;;  %v2037_v16 = vld [vmem:[#allocation12 + $0xd0] sm:$0xff]  ;;  %v2038_v17 = vld [vmem:[#allocation12 + $0xd8] sm:$0xff] }
 0x538   : > { %s4496_s16 = spop %4495 }
 0x539   : > { %s1470_s25 = smul.f32 0.0078125, %s4496_s16 }
 0x53b   : > { %s1474_s14 = smul.f32 %s1470_s25, %s1470_s25  ;;  %v1477_v28 = vstv %s1470_s25  ;;  %s6220_s25 = sld [smem:[#allocation52_spill]] }
 0x53c   : > { %s4498_s1 = spop %4497  ;;  %v1478_v29 = vsub.f32 %v1446_v63, %v1477_v28  ;;  %v1702_v63 = vpack.c.bf16 %v1691_v61, %v1690_v59  ;;  %v1767_v59 = vld [vmem:[#allocation13 + $0x70] sm:$0xff]  ;;  %v1768_v61 = vld [vmem:[#allocation13 + $0x78] sm:$0xff] }
 0x53d   : > { %s1473_s2 = smul.f32 0.0078125, %s4498_s1  ;;  %s6208_s1 = sld [smem:[#allocation39_spill]] }
 0x53e   : > { %4070 = vmatpush3.bf16.msra.mxu0 %v1702_v63  ;;  %v1776_v63 = vpack.c.bf16 %v1768_v61, %v1767_v59 }
 0x53f   : > { %s1475_s5 = ssub.f32 %s1473_s2, %s1474_s14  ;;  %4071 = vmatprep.subr.bf16.mxu0 %v5088_v3  ;;  %s6217_s14 = sld [smem:[#allocation50_spill]] }
 0x541   : > { %s1476_s17 = smax.f32 %s5091_s4, %s1475_s5  ;;  %s6209_s4 = sld [smem:[#allocation40_spill]] }
 0x542   : > { %s1479_s12 = sadd.f32 1e-08, %s1476_s17  ;;  %4072 = vmatpush3.bf16.msra.mxu0 %v1703_v6  ;;  %v2044_v6 = vpack.c.bf16 %v2030_v5, %v2029_v4  ;;  %s6210_s17 = sld [smem:[#allocation45_spill]] }
 0x543   : > { %v3725_v33 = vld [vmem:[%s6208_s1] ss:$0 sm:$0xff]  ;;  %4073 = vmatprep.subr.bf16.mxu0 %v5088_v3  ;;  %s6212_s1 = sld [smem:[#allocation46_spill]]  ;;  %s5092_s5 = smov [#allocation21]  }
 0x544   : > { %v1480_v26 = vstv %s1479_s12  ;;  %s6218_s12 = sld [smem:[#allocation51_spill]] }
 0x545   : > { %4658 = vrsqrt.f32 %v1480_v26 }
 0x546   : > { %4074 = vmatpush3.bf16.msra.mxu0 %v1704_v12  ;;  %v2046_v12 = vpack.c.bf16 %v2034_v11, %v2033_v10  ;;  %v1955_v10 = vld [vmem:[#allocation10 + $0x88] sm:$0xff] }
 0x547   : > { %4075 = vmatprep.subr.bf16.mxu0 %v5088_v3 }
 0x548   : > { %v3737_v51 = vld [vmem:[%s6210_s17 + $0x1] ss:$0 sm:$0xff] }
 0x54a   : > { %4076 = vmatpush3.bf16.msra.mxu0 %v1705_v18  ;;  %v2048_v18 = vpack.c.bf16 %v2038_v17, %v2037_v16  ;;  %v1957_v16 = vld [vmem:[#allocation10 + $0x98] sm:$0xff] }
 0x54b   : > { %4101 = vmatprep.subr.bf16.mxu0 %v5088_v3 }
 0x54f   : > { %v4659_v27 = vpop.eup %4658 }
 0x550   : > { %4499 = vpush %v4659_v27 }
 0x581   : > { %s4500_s10 = spop %4499 }
 0x582   : > { %v1483_v31 = vstv %s4500_s10  ;;  %s6219_s10 = sshll.u32 %s5586_s23, 4 }
 0x583   : > { %v1484_v32 = vmul.f32 %v1483_v31, %v1478_v29  ;;  %v3728_v31 = vld [vmem:[%s6209_s4] ss:$0 sm:$0xff] }
 0x585   : > { %v1491_v34 = vmul.f32 %v3724_v30, %v1484_v32 }
 0x587   : > { %v1498_v35 = vadd.f32 %v3725_v33, %v1491_v34  ;;  %v3729_v33 = vld [vmem:[%s6112_s11] ss:$0 sm:$0xff] }
 0x589   : > { %v5722_v36 = vadd.f32 %v1574_v15, %v1498_v35  ;;  %v1634_v15 = vpack.c.bf16 %v1626_v14, %v1625_v13  ;;  %v1753_v35 = vld [vmem:[#allocation13] sm:$0xff]  ;;  %v2036_v14 = vld [vmem:[#allocation12 + $0xc8] sm:$0xff] }
 0x58a   : > { %v2035_v13 = vld [vmem:[#allocation12 + $0xc0] sm:$0xff] }
 0x58b   : > { %1579 = vadd.xlane.f32.xlu0 %v5722_v36  ;;  %v1581_v37 = vmul.f32 %v5722_v36, %v5722_v36  ;;  %4056 = vmatpush3.bf16.msra.mxu1 %v1634_v15  ;;  %v2047_v15 = vpack.c.bf16 %v2036_v14, %v2035_v13 }
 0x58c   : > { %4081 = vmatprep.subr.bf16.mxu1 %v5088_v3 }
 0x58d   : > { %1582 = vadd.xlane.f32.xlu1 %v1581_v37  ;;  %v1754_v37 = vld [vmem:[#allocation13 + $0x8] sm:$0xff] }
 0x58e   : > { %v1769_v39 = vpack.c.bf16 %v1754_v37, %v1753_v35  ;;  %v3730_v35 = vld [vmem:[%s6211_s8] ss:$0 sm:$0xff] }
 0x618   : > { %v1580_v19 = vpop.xlane.xlu0 %1579 }
 0x619   : > { %v1585_v20 = vmul.f32 0.0625, %v1580_v19  ;;  %v2039_v19 = vld [vmem:[#allocation12 + $0xe0] sm:$0xff] }
 0x61a   : > { %v1583_v21 = vpop.xlane.xlu1 %1582 }
 0x61b   : > { %v1587_v24 = vmul.f32 %v1585_v20, %v1585_v20  ;;  %v1586_v25 = vmul.f32 0.0625, %v1583_v21  ;;  %v1590_v29 = vsub.f32 %v5722_v36, %v1585_v20  ;;  %v2040_v20 = vld [vmem:[#allocation12 + $0xe8] sm:$0xff] }
 0x61c   : > { %v2049_v21 = vpack.c.bf16 %v2040_v20, %v2039_v19  ;;  %v1959_v19 = vld [vmem:[#allocation10 + $0xa8] sm:$0xff] }
 0x61d   : > { %v1588_v26 = vsub.f32 %v1586_v25, %v1587_v24  ;;  %v2041_v24 = vld [vmem:[#allocation12 + $0xf0] sm:$0xff]  ;;  %v2042_v25 = vld [vmem:[#allocation12 + $0xf8] sm:$0xff] }
 0x61f   : > { %v1589_v27 = vmax.f32 %v1588_v26, 0.0  ;;  %v2050_v26 = vpack.c.bf16 %v2042_v25, %v2041_v24  ;;  %v1961_v24 = vld [vmem:[#allocation10 + $0xb8] sm:$0xff] }
 0x621   : > { %v1591_v28 = vadd.f32 1e-05, %v1589_v27  ;;  %v3731_v27 = vld [vmem:[%s6210_s17] ss:$0 sm:$0xff] }
 0x623   : > { %4660 = vrsqrt.f32 %v1591_v28 }
 0x62d   : > { %v4661_v30 = vpop.eup %4660 }
 0x62e   : > { %v1593_v32 = vmul.f32 %v4661_v30, %v1590_v29 }
 0x630   : > { %v1601_v34 = vmul.f32 %v3728_v31, %v1593_v32 }
 0x632   : > { %v1609_v38 = vadd.f32 %v3729_v33, %v1601_v34 }
 0x634   : > { %v5748_v40 = vpack.c.bf16 %v1609_v38, %v1609_v38 }
 0x636   : > { %4058 = vmatmul.mubr.bf16.vlgmr.msra.gmra.mrb[8].mxu1 %v5748_v40  ;;  %4078 = vmatmul.mubr.bf16.vlgmr.msra.gmra.mrb[8].mxu0 %v5748_v40 }
 0x637   : > { %4082 = vmatpush3.bf16.msra.mxu1 %v1769_v39  ;;  %4097 = vmatprep.mubr.msk.bf16.mxu1 %vm5089_vm0, %v5088_v3 }
 0x638   : > { %4083 = vmatprep.subr.bf16.mxu1 %v5088_v3  ;;  %4103 = vmatprep.mubr.msk.bf16.mxu0 %vm5089_vm0, %v5088_v3 }
 0x63b   : > { %4084 = vmatpush3.bf16.msra.mxu1 %v1770_v43  ;;  %v3732_v43 = vld [vmem:[%s6212_s1] ss:$0 sm:$0xff] }
 0x63c   : > { %4085 = vmatprep.subr.bf16.mxu1 %v5088_v3 }
 0x63f   : > { %4086 = vmatpush3.bf16.msra.mxu1 %v1771_v46 }
 0x640   : > { %4087 = vmatprep.subr.bf16.mxu1 %v5088_v3 }
 0x643   : > { %4088 = vmatpush3.bf16.msra.mxu1 %v1772_v49 }
 0x644   : > { %4089 = vmatprep.subr.bf16.mxu1 %v5088_v3 }
 0x647   : > { %4090 = vmatpush3.bf16.msra.mxu1 %v1773_v52 }
 0x648   : > { %4091 = vmatprep.subr.bf16.mxu1 %v5088_v3 }
 0x64b   : > { %4092 = vmatpush3.bf16.msra.mxu1 %v1774_v55 }
 0x64c   : > { %4093 = vmatprep.subr.bf16.mxu1 %v5088_v3 }
 0x64f   : > { %4094 = vmatpush3.bf16.msra.mxu1 %v1775_v58 }
 0x650   : > { %4095 = vmatprep.subr.bf16.mxu1 %v5088_v3 }
 0x653   : > { %4096 = vmatpush3.bf16.msra.mxu1 %v1776_v63 }
 0x654   : > { %4133 = vmatprep.subr.bf16.mxu1 %v5088_v3 }
 0x656   : > { %4098 = vmatmul.mubr.bf16.vlgmr.msra.gmra.mrb[12].mxu1 %v5748_v40 }
 0x657   : > { %4134 = vmatpush3.bf16.msra.mxu1 %v2043_v2  ;;  %4149 = vmatprep.mubr.msk.bf16.mxu1 %vm5089_vm0, %v5088_v3 }
 0x658   : > { %4135 = vmatprep.subr.bf16.mxu1 %v5088_v3 }
 0x65b   : > { %4136 = vmatpush3.bf16.msra.mxu1 %v2044_v6 }
 0x65c   : > { %4137 = vmatprep.subr.bf16.mxu1 %v5088_v3 }
 0x65f   : > { %4138 = vmatpush3.bf16.msra.mxu1 %v2045_v9  ;;  %v1954_v9 = vld [vmem:[#allocation10 + $0x80] sm:$0xff] }
 0x660   : > { %4139 = vmatprep.subr.bf16.mxu1 %v5088_v3  ;;  %v1970_v13 = vpack.c.bf16 %v1955_v10, %v1954_v9  ;;  %v1933_v9 = vld [vmem:[#allocation15 + $0x20] sm:$0xff]  ;;  %v1934_v10 = vld [vmem:[#allocation15 + $0x28] sm:$0xff] }
 0x663   : > { %4140 = vmatpush3.bf16.msra.mxu1 %v2046_v12 }
 0x664   : > { %4141 = vmatprep.subr.bf16.mxu1 %v5088_v3 }
 0x667   : > { %4142 = vmatpush3.bf16.msra.mxu1 %v2047_v15  ;;  %v1956_v15 = vld [vmem:[#allocation10 + $0x90] sm:$0xff] }
 0x668   : > { %4143 = vmatprep.subr.bf16.mxu1 %v5088_v3  ;;  %v1971_v17 = vpack.c.bf16 %v1957_v16, %v1956_v15  ;;  %v1937_v15 = vld [vmem:[#allocation15 + $0x40] sm:$0xff]  ;;  %v1938_v16 = vld [vmem:[#allocation15 + $0x48] sm:$0xff] }
 0x66b   : > { %4144 = vmatpush3.bf16.msra.mxu1 %v2048_v18  ;;  %v1958_v18 = vld [vmem:[#allocation10 + $0xa0] sm:$0xff] }
 0x66c   : > { %4145 = vmatprep.subr.bf16.mxu1 %v5088_v3  ;;  %v1972_v20 = vpack.c.bf16 %v1959_v19, %v1958_v18  ;;  %v1939_v18 = vld [vmem:[#allocation15 + $0x50] sm:$0xff]  ;;  %v1940_v19 = vld [vmem:[#allocation15 + $0x58] sm:$0xff] }
 0x66f   : > { %4146 = vmatpush3.bf16.msra.mxu1 %v2049_v21  ;;  %v1960_v21 = vld [vmem:[#allocation10 + $0xb0] sm:$0xff] }
 0x670   : > { %4147 = vmatprep.subr.bf16.mxu1 %v5088_v3  ;;  %v1973_v25 = vpack.c.bf16 %v1961_v24, %v1960_v21  ;;  %v1941_v21 = vld [vmem:[#allocation15 + $0x60] sm:$0xff]  ;;  %v1942_v24 = vld [vmem:[#allocation15 + $0x68] sm:$0xff] }
 0x673   : > { %4148 = vmatpush3.bf16.msra.mxu1 %v2050_v26  ;;  %v1962_v26 = vld [vmem:[#allocation10 + $0xc0] sm:$0xff] }
 0x674   : > { %4173 = vmatprep.subr.bf16.mxu1 %v5088_v3 }
 0x676   : > { %4150 = vmatmul.mubr.bf16.vlgmr.msra.gmra.mrb[16].mxu1 %v5748_v40 }
 0x677   : > { %4175 = vmatprep.mubr.msk.bf16.mxu1 %vm5089_vm0, %v5088_v3 }
 0x709   : > { %v1676_v28 = vpop.f32.mrb[8].mxu1  ;;  %v1747_v29 = vpop.f32.mrb[8].mxu0 }
 0x70a   : > { %v1748_v30 = vadd.f32 %v3731_v27, %v1747_v29  ;;  %v4059_v31 = vpop.f32.mrb[9].mxu1  ;;  %v4079_v32 = vpop.f32.mrb[9].mxu0  ;;  %v1677_v41 = vadd.f32 %v3730_v35, %v1676_v28  ;;  %v1963_v27 = vld [vmem:[#allocation10 + $0xc8] sm:$0xff]  ;;  %v1964_v29 = vld [vmem:[#allocation10 + $0xd0] sm:$0xff] }
 0x70b   : > { %v1679_v33 = vpop.f32.mrb[10].mxu1  ;;  %v1750_v34 = vpop.f32.mrb[10].mxu0  ;;  %v1974_v28 = vpack.c.bf16 %v1963_v27, %v1962_v26  ;;  %v1966_v32 = vld [vmem:[#allocation10 + $0xe0] sm:$0xff]  ;;  %v1968_v35 = vld [vmem:[#allocation10 + $0xf0] sm:$0xff]  ;;  %v1944_v27 = vld [vmem:[#allocation15 + $0x78] sm:$0xff] }
 0x70c   : > { %v1825_v37 = vpack.c.bf16 %v1748_v30, %v1748_v30  ;;  %v4060_v38 = vpop.f32.mrb[11].mxu1  ;;  %v4080_v39 = vpop.f32.mrb[11].mxu0  ;;  %v1824_v42 = vpack.c.bf16 %v1677_v41, %v1677_v41  ;;  %v1965_v30 = vld [vmem:[#allocation10 + $0xd8] sm:$0xff]  ;;  %v1967_v33 = vld [vmem:[#allocation10 + $0xe8] sm:$0xff]  ;;  %v1943_v26 = vld [vmem:[#allocation15 + $0x70] sm:$0xff] }
 0x70d   : > { %v1975_v31 = vpack.c.bf16 %v1965_v30, %v1964_v29  ;;  %v1976_v34 = vpack.c.bf16 %v1967_v33, %v1966_v32  ;;  %v2100_v39 = vld [vmem:[#allocation13 + $0x80] sm:$0xff]  ;;  %v2101_v41 = vld [vmem:[#allocation13 + $0x88] sm:$0xff] }
 0x70e   : > { %4102 = vmatpush3.bf16.xpose.msra.mxu0 %v1825_v37  ;;  %v1969_v37 = vld [vmem:[#allocation10 + $0xf8] sm:$0xff]  ;;  %v2454_v29 = vld [vmem:[#allocation12 + $0x100] sm:$0xff]  ;;  %v2455_v30 = vld [vmem:[#allocation12 + $0x108] sm:$0xff] }
 0x70f   : > { %4107 = vmatprep.subr.bf16.mxu0 %v5088_v3  ;;  %v1977_v38 = vpack.c.bf16 %v1969_v37, %v1968_v35  ;;  %v2470_v32 = vpack.c.bf16 %v2455_v30, %v2454_v29  ;;  %v2456_v35 = vld [vmem:[#allocation12 + $0x110] sm:$0xff]  ;;  %v2457_v37 = vld [vmem:[#allocation12 + $0x118] sm:$0xff] }
 0x715   : > { %4104 = vmatmul.mubr.bf16.vlgmr.msra.gmra.mrb[12].mxu0 %v1824_v42  ;;  %v2116_v42 = vpack.c.bf16 %v2101_v41, %v2100_v39  ;;  %v2471_v41 = vpack.c.bf16 %v2457_v37, %v2456_v35 }
 0x716   : > { %4109 = vmatprep.mubr.msk.bf16.mxu0 %vm5089_vm0, %v5088_v3 }
 0x729   : > { %v1818_v44 = vpop.f32.mrb[12].mxu1 }
 0x72a   : > { %v1819_v45 = vadd.f32 %v3732_v43, %v1818_v44  ;;  %v4099_v46 = vpop.f32.mrb[13].mxu1  ;;  %v2102_v43 = vld [vmem:[#allocation13 + $0x90] sm:$0xff]  ;;  %v2103_v44 = vld [vmem:[#allocation13 + $0x98] sm:$0xff] }
 0x72b   : > { %v1821_v47 = vpop.f32.mrb[14].mxu1  ;;  %v2104_v46 = vld [vmem:[#allocation13 + $0xa0] sm:$0xff] }
 0x72c   : > { %v1880_v48 = vpack.c.bf16 %v1819_v45, %v1819_v45  ;;  %v4100_v49 = vpop.f32.mrb[15].mxu1  ;;  %v2117_v45 = vpack.c.bf16 %v2103_v44, %v2102_v43  ;;  %v2105_v47 = vld [vmem:[#allocation13 + $0xa8] sm:$0xff] }
 0x72d   : > { %v2106_v49 = vld [vmem:[#allocation13 + $0xb0] sm:$0xff]  ;;  %v2459_v43 = vld [vmem:[#allocation12 + $0x128] sm:$0xff] }
 0x72e   : > { %v1886_v50 = vsel %vm1884_vm12, %v1880_v48, 0  ;;  %v2118_v48 = vpack.c.bf16 %v2105_v47, %v2104_v46  ;;  %v2461_v46 = vld [vmem:[#allocation12 + $0x138] sm:$0xff] }
 0x72f   : > { %4108 = vmatpush3.bf16.msra.mxu0 %v1886_v50  ;;  %v2107_v50 = vld [vmem:[#allocation13 + $0xb8] sm:$0xff] }
 0x730   : > { %4113 = vmatprep.subr.bf16.mxu0 %v5088_v3 }
 0x749   : > { %v2093_v52 = vpop.f32.mrb[16].mxu1 }
 0x74a   : > { %v2094_v53 = vadd.f32 %v3737_v51, %v2093_v52  ;;  %v4151_v54 = vpop.f32.mrb[17].mxu1  ;;  %v2119_v51 = vpack.c.bf16 %v2107_v50, %v2106_v49  ;;  %v2108_v52 = vld [vmem:[#allocation13 + $0xc0] sm:$0xff]  ;;  %v2463_v49 = vld [vmem:[#allocation12 + $0x148] sm:$0xff] }
 0x74b   : > { %v2096_v55 = vpop.f32.mrb[18].mxu1 }
 0x74c   : > { %v2173_v56 = vpack.c.bf16 %v2094_v53, %v2094_v53  ;;  %v4152_v57 = vpop.f32.mrb[19].mxu1  ;;  %v2109_v53 = vld [vmem:[#allocation13 + $0xc8] sm:$0xff]  ;;  %v2110_v55 = vld [vmem:[#allocation13 + $0xd0] sm:$0xff] }
 0x74d   : > { %v2120_v54 = vpack.c.bf16 %v2109_v53, %v2108_v52  ;;  %v2465_v52 = vld [vmem:[#allocation12 + $0x158] sm:$0xff] }
 0x74e   : > { %4174 = vmatpush3.bf16.xpose.msra.mxu1 %v2173_v56  ;;  %v2111_v56 = vld [vmem:[#allocation13 + $0xd8] sm:$0xff] }
 0x74f   : > { %4179 = vmatprep.subr.bf16.mxu1 %v5088_v3  ;;  %v2121_v57 = vpack.c.bf16 %v2111_v56, %v2110_v55  ;;  %v2467_v55 = vld [vmem:[#allocation12 + $0x168] sm:$0xff] }
 0x7e8   : > { %v1860_v58 = vpop.f32.mrb[12].mxu0 }
 0x7e9   : > { %v1866_v59 = vmul.f32 0.5, %v1860_v58  ;;  %v4105_v61 = vpop.f32.mrb[13].mxu0  ;;  %v2112_v58 = vld [vmem:[#allocation13 + $0xe0] sm:$0xff] }
 0x7ea   : > { %v1863_v63 = vpop.f32.mrb[14].mxu0 }
 0x7eb   : > { %v4106_v0 = vpop.f32.mrb[15].mxu0  ;;  %v1868_v1 = vsel %vm1867_vm13, %v1866_v59, -inf  ;;  %v2114_v63 = vld [vmem:[#allocation13 + $0xf0] sm:$0xff] }
 0x7ec   : > { %1869 = vmax.xlane.f32.xlu0 %v1868_v1  ;;  %v2115_v0 = vld [vmem:[#allocation13 + $0xf8] sm:$0xff] }
 0x7ed   : > { %v2123_v1 = vpack.c.bf16 %v2115_v0, %v2114_v63 }
 0x879   : > { %v1870_v2 = vpop.xlane.xlu0 %1869 }
 0x87a   : > { %v1871_v4 = vsub.f32 %v1866_v59, %v1870_v2  ;;  %v2113_v59 = vld [vmem:[#allocation13 + $0xe8] sm:$0xff]  ;;  %v1929_v2 = vld [vmem:[#allocation15] sm:$0xff] }
 0x87b   : > { %v2122_v61 = vpack.c.bf16 %v2113_v59, %v2112_v58  ;;  %v2469_v58 = vld [vmem:[#allocation12 + $0x178] sm:$0xff] }
 0x87c   : > { %v1872_v5 = vmul.f32 1.442695, %v1871_v4  ;;  %v1930_v4 = vld [vmem:[#allocation15 + $0x8] sm:$0xff] }
 0x87e   : > { %4662 = vpow2.f32 %v1872_v5  ;;  %v1945_v5 = vpack.c.bf16 %v1930_v4, %v1929_v2 }
 0x888   : > { %v4663_v6 = vpop.eup %4662 }
 0x889   : > { %v1874_v7 = vsel %vm1867_vm13, %v4663_v6, 0.0 }
 0x88a   : > { %1875 = vadd.xlane.f32.xlu1 %v1874_v7  ;;  %v1932_v7 = vld [vmem:[#allocation15 + $0x18] sm:$0xff] }
 0x917   : > { %v1876_v8 = vpop.xlane.xlu1 %1875 }
 0x918   : > { %4664 = vrcp.f32 %v1876_v8 }
 0x922   : > { %v4665_v11 = vpop.eup %4664 }
 0x923   : > { %v1878_v12 = vmul.f32 %v4665_v11, %v4663_v6  ;;  %v1931_v6 = vld [vmem:[#allocation15 + $0x10] sm:$0xff]  ;;  %v1947_v11 = vpack.c.bf16 %v1934_v10, %v1933_v9 }
 0x924   : > { %v1946_v8 = vpack.c.bf16 %v1932_v7, %v1931_v6  ;;  %v3739_v6 = vld [vmem:[%s6212_s1 + $0x1] ss:$0 sm:$0xff] }
 0x925   : > { %v1879_v14 = vpack.c.bf16 %v1878_v12, %v1878_v12  ;;  %v1935_v12 = vld [vmem:[#allocation15 + $0x30] sm:$0xff] }
 0x927   : > { %4110 = vmatmul.mubr.msk.bf16.vlgmr.msra.gmra.mrb[16].mxu0 %vm1867_vm13, %v1879_v14 }
 0x928   : > { %4114 = vmatpush3.bf16.msra.mxu0 %v1970_v13  ;;  %4129 = vmatprep.mubr.msk.bf16.mxu0 %vm5089_vm0, %v5088_v3  ;;  %v1936_v13 = vld [vmem:[#allocation15 + $0x38] sm:$0xff] }
 0x929   : > { %4115 = vmatprep.subr.bf16.mxu0 %v5088_v3  ;;  %v1948_v14 = vpack.c.bf16 %v1936_v13, %v1935_v12 }
 0x92c   : > { %4116 = vmatpush3.bf16.msra.mxu0 %v1971_v17  ;;  %v1949_v17 = vpack.c.bf16 %v1938_v16, %v1937_v15 }
 0x92d   : > { %4117 = vmatprep.subr.bf16.mxu0 %v5088_v3 }
 0x930   : > { %4118 = vmatpush3.bf16.msra.mxu0 %v1972_v20  ;;  %v1950_v20 = vpack.c.bf16 %v1940_v19, %v1939_v18  ;;  %v3744_v18 = vld [vmem:[%s6210_s17 + $0x2] ss:$0 sm:$0xff] }
 0x931   : > { %4119 = vmatprep.subr.bf16.mxu0 %v5088_v3 }
 0x934   : > { %4120 = vmatpush3.bf16.msra.mxu0 %v1973_v25  ;;  %v1951_v25 = vpack.c.bf16 %v1942_v24, %v1941_v21 }
 0x935   : > { %4121 = vmatprep.subr.bf16.mxu0 %v5088_v3 }
 0x938   : > { %4122 = vmatpush3.bf16.msra.mxu0 %v1974_v28  ;;  %v1952_v28 = vpack.c.bf16 %v1944_v27, %v1943_v26 }
 0x939   : > { %4123 = vmatprep.subr.bf16.mxu0 %v5088_v3 }
 0x93c   : > { %4124 = vmatpush3.bf16.msra.mxu0 %v1975_v31 }
 0x93d   : > { %4125 = vmatprep.subr.bf16.mxu0 %v5088_v3 }
 0x940   : > { %4126 = vmatpush3.bf16.msra.mxu0 %v1976_v34 }
 0x941   : > { %4127 = vmatprep.subr.bf16.mxu0 %v5088_v3 }
 0x944   : > { %4128 = vmatpush3.bf16.msra.mxu0 %v1977_v38 }
 0x945   : > { %4153 = vmatprep.subr.bf16.mxu0 %v5088_v3 }
 0x947   : > { %4130 = vmatmul.mubr.bf16.vlgmr.msra.gmra.mrb[20].mxu0 %v5748_v40 }
 0x948   : > { %4154 = vmatpush3.bf16.msra.mxu0 %v2116_v42  ;;  %4169 = vmatprep.mubr.msk.bf16.mxu0 %vm5089_vm0, %v5088_v3  ;;  %v2458_v42 = vld [vmem:[#allocation12 + $0x120] sm:$0xff] }
 0x949   : > { %4155 = vmatprep.subr.bf16.mxu0 %v5088_v3  ;;  %v2472_v44 = vpack.c.bf16 %v2459_v43, %v2458_v42  ;;  %v2277_v42 = vld [vmem:[#allocation15 + $0x88] sm:$0xff] }
 0x94c   : > { %4156 = vmatpush3.bf16.msra.mxu0 %v2117_v45  ;;  %v2460_v45 = vld [vmem:[#allocation12 + $0x130] sm:$0xff] }
 0x94d   : > { %4157 = vmatprep.subr.bf16.mxu0 %v5088_v3  ;;  %v2473_v47 = vpack.c.bf16 %v2461_v46, %v2460_v45 }
 0x950   : > { %4158 = vmatpush3.bf16.msra.mxu0 %v2118_v48  ;;  %v2462_v48 = vld [vmem:[#allocation12 + $0x140] sm:$0xff] }
 0x951   : > { %4159 = vmatprep.subr.bf16.mxu0 %v5088_v3  ;;  %v2474_v50 = vpack.c.bf16 %v2463_v49, %v2462_v48  ;;  %v2279_v48 = vld [vmem:[#allocation15 + $0x98] sm:$0xff] }
 0x954   : > { %4160 = vmatpush3.bf16.msra.mxu0 %v2119_v51  ;;  %v2464_v51 = vld [vmem:[#allocation12 + $0x150] sm:$0xff] }
 0x955   : > { %4161 = vmatprep.subr.bf16.mxu0 %v5088_v3  ;;  %v2475_v53 = vpack.c.bf16 %v2465_v52, %v2464_v51  ;;  %v2281_v51 = vld [vmem:[#allocation15 + $0xa8] sm:$0xff] }
 0x958   : > { %4162 = vmatpush3.bf16.msra.mxu0 %v2120_v54  ;;  %v2466_v54 = vld [vmem:[#allocation12 + $0x160] sm:$0xff] }
 0x959   : > { %4163 = vmatprep.subr.bf16.mxu0 %v5088_v3  ;;  %v2476_v56 = vpack.c.bf16 %v2467_v55, %v2466_v54  ;;  %v2283_v54 = vld [vmem:[#allocation15 + $0xb8] sm:$0xff] }
 0x95c   : > { %4164 = vmatpush3.bf16.msra.mxu0 %v2121_v57  ;;  %v2468_v57 = vld [vmem:[#allocation12 + $0x170] sm:$0xff] }
 0x95d   : > { %4165 = vmatprep.subr.bf16.mxu0 %v5088_v3  ;;  %v2477_v59 = vpack.c.bf16 %v2469_v58, %v2468_v57  ;;  %v2285_v57 = vld [vmem:[#allocation15 + $0xc8] sm:$0xff] }
 0x960   : > { %4166 = vmatpush3.bf16.msra.mxu0 %v2122_v61  ;;  %v3735_v61 = vld [vmem:[%s6211_s8 + $0x1] ss:$0 sm:$0xff] }
 0x961   : > { %4167 = vmatprep.subr.bf16.mxu0 %v5088_v3 }
 0x964   : > { %4168 = vmatpush3.bf16.msra.mxu0 %v2123_v1 }
 0x965   : > { %4205 = vmatprep.subr.bf16.mxu0 %v5088_v3 }
 0x967   : > { %4170 = vmatmul.mubr.bf16.vlgmr.msra.gmra.mrb[24].mxu0 %v5748_v40 }
 0x968   : > { %4206 = vmatpush3.bf16.msra.mxu0 %v1945_v5  ;;  %4221 = vmatprep.mubr.msk.bf16.mxu0 %vm5089_vm0, %v5088_v3 }
 0x969   : > { %4207 = vmatprep.subr.bf16.mxu0 %v5088_v3 }
 0x96c   : > { %4208 = vmatpush3.bf16.msra.mxu0 %v1946_v8 }
 0x96d   : > { %4209 = vmatprep.subr.bf16.mxu0 %v5088_v3 }
 0x970   : > { %4210 = vmatpush3.bf16.msra.mxu0 %v1947_v11 }
 0x971   : > { %4211 = vmatprep.subr.bf16.mxu0 %v5088_v3 }
 0x974   : > { %4212 = vmatpush3.bf16.msra.mxu0 %v1948_v14 }
 0x975   : > { %4213 = vmatprep.subr.bf16.mxu0 %v5088_v3 }
 0x978   : > { %4214 = vmatpush3.bf16.msra.mxu0 %v1949_v17 }
 0x979   : > { %4215 = vmatprep.subr.bf16.mxu0 %v5088_v3 }
 0x97c   : > { %4216 = vmatpush3.bf16.msra.mxu0 %v1950_v20 }
 0x97d   : > { %4217 = vmatprep.subr.bf16.mxu0 %v5088_v3 }
 0x980   : > { %4218 = vmatpush3.bf16.msra.mxu0 %v1951_v25 }
 0x981   : > { %4219 = vmatprep.subr.bf16.mxu0 %v5088_v3 }
 0x984   : > { %4220 = vmatpush3.bf16.msra.mxu0 %v1952_v28 }
 0x985   : > { %4245 = vmatprep.subr.bf16.mxu0 %v5088_v3 }
 0x9fa   : > { %v1922_v31 = vpop.f32.mrb[16].mxu0 }
 0x9fb   : > { %v1928_v33 = vpack.c.bf16 %v1922_v31, %v1922_v31  ;;  %v4111_v34 = vpop.f32.mrb[17].mxu0 }
 0x9fc   : > { %v1925_v38 = vpop.f32.mrb[18].mxu0 }
 0x9fd   : > { %v4112_v39 = vpop.f32.mrb[19].mxu0  ;;  %4222 = vmatmul.mubr.bf16.vlgmr.msra.gmra.mrb[28].mxu0 %v1928_v33 }
 0x9fe   : > { %4246 = vmatpush3.bf16.msra.mxu0 %v2470_v32  ;;  %4261 = vmatprep.mubr.msk.bf16.mxu0 %vm5089_vm0, %v5088_v3 }
 0x9ff   : > { %4247 = vmatprep.subr.bf16.mxu0 %v5088_v3 }
 0xa02   : > { %4248 = vmatpush3.bf16.msra.mxu0 %v2471_v41  ;;  %v2276_v41 = vld [vmem:[#allocation15 + $0x80] sm:$0xff] }
 0xa03   : > { %4249 = vmatprep.subr.bf16.mxu0 %v5088_v3  ;;  %v2292_v45 = vpack.c.bf16 %v2277_v42, %v2276_v41  ;;  %v2527_v41 = vld [vmem:[#allocation13 + $0x100] sm:$0xff]  ;;  %v2528_v42 = vld [vmem:[#allocation13 + $0x108] sm:$0xff] }
 0xa06   : > { %4250 = vmatpush3.bf16.msra.mxu0 %v2472_v44 }
 0xa07   : > { %4251 = vmatprep.subr.bf16.mxu0 %v5088_v3 }
 0xa0a   : > { %4252 = vmatpush3.bf16.msra.mxu0 %v2473_v47  ;;  %v2278_v47 = vld [vmem:[#allocation15 + $0x90] sm:$0xff] }
 0xa0b   : > { %4253 = vmatprep.subr.bf16.mxu0 %v5088_v3  ;;  %v2293_v49 = vpack.c.bf16 %v2279_v48, %v2278_v47  ;;  %v2531_v47 = vld [vmem:[#allocation13 + $0x120] sm:$0xff]  ;;  %v2532_v48 = vld [vmem:[#allocation13 + $0x128] sm:$0xff] }
 0xa0e   : > { %4254 = vmatpush3.bf16.msra.mxu0 %v2474_v50  ;;  %v2280_v50 = vld [vmem:[#allocation15 + $0xa0] sm:$0xff] }
 0xa0f   : > { %4255 = vmatprep.subr.bf16.mxu0 %v5088_v3  ;;  %v2294_v52 = vpack.c.bf16 %v2281_v51, %v2280_v50  ;;  %v2533_v50 = vld [vmem:[#allocation13 + $0x130] sm:$0xff]  ;;  %v2534_v51 = vld [vmem:[#allocation13 + $0x138] sm:$0xff] }
 0xa12   : > { %4256 = vmatpush3.bf16.msra.mxu0 %v2475_v53  ;;  %v2282_v53 = vld [vmem:[#allocation15 + $0xb0] sm:$0xff] }
 0xa13   : > { %4257 = vmatprep.subr.bf16.mxu0 %v5088_v3  ;;  %v2295_v55 = vpack.c.bf16 %v2283_v54, %v2282_v53  ;;  %v2535_v53 = vld [vmem:[#allocation13 + $0x140] sm:$0xff]  ;;  %v2536_v54 = vld [vmem:[#allocation13 + $0x148] sm:$0xff] }
 0xa16   : > { %4258 = vmatpush3.bf16.msra.mxu0 %v2476_v56  ;;  %v2284_v56 = vld [vmem:[#allocation15 + $0xc0] sm:$0xff] }
 0xa17   : > { %4259 = vmatprep.subr.bf16.mxu0 %v5088_v3  ;;  %v2296_v58 = vpack.c.bf16 %v2285_v57, %v2284_v56  ;;  %v2537_v56 = vld [vmem:[#allocation13 + $0x150] sm:$0xff]  ;;  %v2538_v57 = vld [vmem:[#allocation13 + $0x158] sm:$0xff] }
 0xa1a   : > { %v2020_v63 = vpop.f32.mrb[20].mxu0  ;;  %4260 = vmatpush3.bf16.msra.mxu0 %v2477_v59  ;;  %v2286_v59 = vld [vmem:[#allocation15 + $0xd0] sm:$0xff] }
 0xa1b   : > { %v2021_v0 = vadd.f32 %v3735_v61, %v2020_v63  ;;  %v4131_v1 = vpop.f32.mrb[21].mxu0  ;;  %4285 = vmatprep.subr.bf16.mxu0 %v5088_v3  ;;  %v2287_v61 = vld [vmem:[#allocation15 + $0xd8] sm:$0xff] }
 0xa1c   : > { %v2023_v2 = vpop.f32.mrb[22].mxu0  ;;  %v2297_v63 = vpack.c.bf16 %v2287_v61, %v2286_v59  ;;  %v2289_v1 = vld [vmem:[#allocation15 + $0xe8] sm:$0xff]  ;;  %v2539_v59 = vld [vmem:[#allocation13 + $0x160] sm:$0xff] }
 0xa1d   : > { %v2172_v4 = vpack.c.bf16 %v2021_v0, %v2021_v0  ;;  %v4132_v5 = vpop.f32.mrb[23].mxu0  ;;  %4262 = vmatmul.mubr.bf16.vlgmr.msra.gmra.mrb[32].mxu0 %v5748_v40  ;;  %v2288_v0 = vld [vmem:[#allocation15 + $0xe0] sm:$0xff]  ;;  %v2540_v61 = vld [vmem:[#allocation13 + $0x168] sm:$0xff] }
 0xa1e   : > { %4287 = vmatprep.mubr.msk.bf16.mxu0 %vm5089_vm0, %v5088_v3  ;;  %v2298_v2 = vpack.c.bf16 %v2289_v1, %v2288_v0  ;;  %v2291_v5 = vld [vmem:[#allocation15 + $0xf8] sm:$0xff]  ;;  %v2541_v0 = vld [vmem:[#allocation13 + $0x170] sm:$0xff] }
 0xa1f   : > { %4176 = vmatmul.mubr.bf16.vlgmr.msra.gmra.mrb[20].mxu1 %v2172_v4  ;;  %v2290_v4 = vld [vmem:[#allocation15 + $0xf0] sm:$0xff]  ;;  %v2542_v1 = vld [vmem:[#allocation13 + $0x178] sm:$0xff] }
 0xa20   : > { %4181 = vmatprep.mubr.msk.bf16.mxu1 %vm5089_vm0, %v5088_v3 }
 0xa3a   : > { %v2166_v7 = vpop.f32.mrb[24].mxu0 }
 0xa3b   : > { %v2167_v8 = vadd.f32 %v3739_v6, %v2166_v7  ;;  %v4171_v9 = vpop.f32.mrb[25].mxu0  ;;  %v2299_v6 = vpack.c.bf16 %v2291_v5, %v2290_v4  ;;  %v2381_v7 = vld [vmem:[#allocation10 + $0x100] sm:$0xff]  ;;  %v2770_v5 = vld [vmem:[#allocation10 + $0x188] sm:$0xff] }
 0xa3c   : > { %v2169_v10 = vpop.f32.mrb[26].mxu0  ;;  %v2769_v4 = vld [vmem:[#allocation10 + $0x180] sm:$0xff] }
 0xa3d   : > { %v2227_v11 = vpack.c.bf16 %v2167_v8, %v2167_v8  ;;  %v4172_v12 = vpop.f32.mrb[27].mxu0  ;;  %v2382_v8 = vld [vmem:[#allocation10 + $0x108] sm:$0xff] }
 0xa3e   : > { %v2397_v10 = vpack.c.bf16 %v2382_v8, %v2381_v7  ;;  %v2771_v7 = vld [vmem:[#allocation10 + $0x190] sm:$0xff]  ;;  %v2772_v8 = vld [vmem:[#allocation10 + $0x198] sm:$0xff] }
 0xa3f   : > { %v2232_v13 = vsel %vm1884_vm12, %v2227_v11, 0 }
 0xa40   : > { %4180 = vmatpush3.bf16.msra.mxu1 %v2232_v13  ;;  %v2383_v13 = vld [vmem:[#allocation10 + $0x110] sm:$0xff] }
 0xa41   : > { %4185 = vmatprep.subr.bf16.mxu1 %v5088_v3 }
 0xad0   : > { %v5854_v14 = vpop.f32.mrb[28].mxu0 }
 0xad1   : > { %v4223_v15 = vpop.f32.mrb[29].mxu0 }
 0xad2   : > { %v2377_v16 = vpop.f32.mrb[30].mxu0  ;;  %v2384_v15 = vld [vmem:[#allocation10 + $0x118] sm:$0xff] }
 0xad3   : > { %v4224_v17 = vpop.f32.mrb[31].mxu0 }
 0xaf0   : > { %v2520_v19 = vpop.f32.mrb[32].mxu0 }
 0xaf1   : > { %v2521_v20 = vadd.f32 %v3744_v18, %v2520_v19  ;;  %v4263_v21 = vpop.f32.mrb[33].mxu0  ;;  %v2398_v18 = vpack.c.bf16 %v2384_v15, %v2383_v13  ;;  %v2385_v19 = vld [vmem:[#allocation10 + $0x120] sm:$0xff]  ;;  %v2775_v13 = vld [vmem:[#allocation10 + $0x1b0] sm:$0xff]  ;;  %v2776_v15 = vld [vmem:[#allocation10 + $0x1b8] sm:$0xff] }
 0xaf2   : > { %v2208_v24 = vpop.f32.mrb[20].mxu1  ;;  %v2523_v25 = vpop.f32.mrb[34].mxu0 }
 0xaf3   : > { %v2600_v26 = vpack.c.bf16 %v2521_v20, %v2521_v20  ;;  %v2214_v27 = vmul.f32 0.5, %v2208_v24  ;;  %v4177_v28 = vpop.f32.mrb[21].mxu1  ;;  %v4264_v29 = vpop.f32.mrb[35].mxu0  ;;  %v2386_v20 = vld [vmem:[#allocation10 + $0x128] sm:$0xff]  ;;  %v2387_v24 = vld [vmem:[#allocation10 + $0x130] sm:$0xff]  ;;  %v2388_v25 = vld [vmem:[#allocation10 + $0x138] sm:$0xff] }
 0xaf4   : > { %v2211_v30 = vpop.f32.mrb[22].mxu1  ;;  %v2399_v21 = vpack.c.bf16 %v2386_v20, %v2385_v19  ;;  %v2390_v28 = vld [vmem:[#allocation10 + $0x148] sm:$0xff]  ;;  %v2779_v20 = vld [vmem:[#allocation10 + $0x1d0] sm:$0xff] }
 0xaf5   : > { %v4178_v31 = vpop.f32.mrb[23].mxu1  ;;  %4286 = vmatpush3.bf16.xpose.msra.mxu0 %v2600_v26  ;;  %v2215_v32 = vsel %vm1867_vm13, %v2214_v27, -inf  ;;  %v2400_v26 = vpack.c.bf16 %v2388_v25, %v2387_v24  ;;  %v2391_v30 = vld [vmem:[#allocation10 + $0x150] sm:$0xff]  ;;  %v2781_v25 = vld [vmem:[#allocation10 + $0x1e0] sm:$0xff] }
 0xaf6   : > { %2216 = vmax.xlane.f32.xlu0 %v2215_v32  ;;  %4291 = vmatprep.subr.bf16.mxu0 %v5088_v3  ;;  %v2392_v31 = vld [vmem:[#allocation10 + $0x158] sm:$0xff] }
 0xaf7   : > { %v2402_v32 = vpack.c.bf16 %v2392_v31, %v2391_v30  ;;  %v2915_v31 = vld [vmem:[#allocation13 + $0x180] sm:$0xff] }
 0xb83   : > { %v2217_v33 = vpop.xlane.xlu0 %2216 }
 0xb84   : > { %v2218_v34 = vsub.f32 %v2214_v27, %v2217_v33  ;;  %v2389_v27 = vld [vmem:[#allocation10 + $0x140] sm:$0xff] }
 0xb85   : > { %v2401_v29 = vpack.c.bf16 %v2390_v28, %v2389_v27  ;;  %v2393_v33 = vld [vmem:[#allocation10 + $0x160] sm:$0xff]  ;;  %v2783_v28 = vld [vmem:[#allocation10 + $0x1f0] sm:$0xff] }
 0xb86   : > { %v2219_v35 = vmul.f32 1.442695, %v2218_v34  ;;  %v2394_v34 = vld [vmem:[#allocation10 + $0x168] sm:$0xff] }
 0xb88   : > { %4666 = vpow2.f32 %v2219_v35  ;;  %v2403_v35 = vpack.c.bf16 %v2394_v34, %v2393_v33  ;;  %v2917_v34 = vld [vmem:[#allocation13 + $0x190] sm:$0xff] }
 0xb92   : > { %v4667_v37 = vpop.eup %4666 }
 0xb93   : > { %v2221_v38 = vsel %vm1867_vm13, %v4667_v37, 0.0 }
 0xb94   : > { %2222 = vadd.xlane.f32.xlu1 %v2221_v38  ;;  %v2396_v38 = vld [vmem:[#allocation10 + $0x178] sm:$0xff] }
 0xc21   : > { %v2223_v39 = vpop.xlane.xlu1 %2222 }
 0xc22   : > { %4668 = vrcp.f32 %v2223_v39 }
 0xc2c   : > { %v4669_v43 = vpop.eup %4668 }
 0xc2d   : > { %v2225_v44 = vmul.f32 %v4669_v43, %v4667_v37  ;;  %v2395_v37 = vld [vmem:[#allocation10 + $0x170] sm:$0xff]  ;;  %v2543_v43 = vpack.c.bf16 %v2528_v42, %v2527_v41 }
 0xc2e   : > { %v2404_v39 = vpack.c.bf16 %v2396_v38, %v2395_v37  ;;  %v2919_v38 = vld [vmem:[#allocation13 + $0x1a0] sm:$0xff]  ;;  %v2921_v42 = vld [vmem:[#allocation13 + $0x1b0] sm:$0xff] }
 0xc2f   : > { %v2226_v46 = vpack.c.bf16 %v2225_v44, %v2225_v44  ;;  %v2529_v44 = vld [vmem:[#allocation13 + $0x110] sm:$0xff] }
 0xc31   : > { %4182 = vmatmul.mubr.msk.bf16.vlgmr.msra.gmra.mrb[24].mxu1 %vm1867_vm13, %v2226_v46 }
 0xc32   : > { %4186 = vmatpush3.bf16.msra.mxu1 %v2292_v45  ;;  %4201 = vmatprep.mubr.msk.bf16.mxu1 %vm5089_vm0, %v5088_v3  ;;  %v2530_v45 = vld [vmem:[#allocation13 + $0x118] sm:$0xff] }
 0xc33   : > { %4187 = vmatprep.subr.bf16.mxu1 %v5088_v3  ;;  %v2544_v46 = vpack.c.bf16 %v2530_v45, %v2529_v44  ;;  %v2923_v45 = vld [vmem:[#allocation13 + $0x1c0] sm:$0xff] }
 0xc36   : > { %4188 = vmatpush3.bf16.msra.mxu1 %v2293_v49  ;;  %v2545_v49 = vpack.c.bf16 %v2532_v48, %v2531_v47  ;;  %v2925_v48 = vld [vmem:[#allocation13 + $0x1d0] sm:$0xff] }
 0xc37   : > { %4189 = vmatprep.subr.bf16.mxu1 %v5088_v3 }
 0xc3a   : > { %4190 = vmatpush3.bf16.msra.mxu1 %v2294_v52  ;;  %v2546_v52 = vpack.c.bf16 %v2534_v51, %v2533_v50  ;;  %v2927_v51 = vld [vmem:[#allocation13 + $0x1e0] sm:$0xff] }
 0xc3b   : > { %4191 = vmatprep.subr.bf16.mxu1 %v5088_v3 }
 0xc3e   : > { %4192 = vmatpush3.bf16.msra.mxu1 %v2295_v55  ;;  %v2547_v55 = vpack.c.bf16 %v2536_v54, %v2535_v53  ;;  %v2929_v54 = vld [vmem:[#allocation13 + $0x1f0] sm:$0xff] }
 0xc3f   : > { %4193 = vmatprep.subr.bf16.mxu1 %v5088_v3 }
 0xc42   : > { %4194 = vmatpush3.bf16.msra.mxu1 %v2296_v58  ;;  %v2548_v58 = vpack.c.bf16 %v2538_v57, %v2537_v56 }
 0xc43   : > { %4195 = vmatprep.subr.bf16.mxu1 %v5088_v3 }
 0xc46   : > { %4196 = vmatpush3.bf16.msra.mxu1 %v2297_v63  ;;  %v2549_v63 = vpack.c.bf16 %v2540_v61, %v2539_v59 }
 0xc47   : > { %4197 = vmatprep.subr.bf16.mxu1 %v5088_v3 }
 0xc4a   : > { %4198 = vmatpush3.bf16.msra.mxu1 %v2298_v2  ;;  %v2550_v2 = vpack.c.bf16 %v2542_v1, %v2541_v0  ;;  %v3742_v0 = vld [vmem:[%s6211_s8 + $0x2] ss:$0 sm:$0xff] }
 0xc4b   : > { %4199 = vmatprep.subr.bf16.mxu1 %v5088_v3 }
 0xc4e   : > { %4200 = vmatpush3.bf16.msra.mxu1 %v2299_v6  ;;  %v2785_v6 = vpack.c.bf16 %v2770_v5, %v2769_v4 }
 0xc4f   : > { %4225 = vmatprep.subr.bf16.mxu1 %v5088_v3 }
 0xd04   : > { %v2268_v9 = vpop.f32.mrb[24].mxu1 }
 0xd05   : > { %v2274_v11 = vpack.c.bf16 %v2268_v9, %v2268_v9  ;;  %v4183_v12 = vpop.f32.mrb[25].mxu1  ;;  %v2786_v9 = vpack.c.bf16 %v2772_v8, %v2771_v7 }
 0xd06   : > { %v2271_v16 = vpop.f32.mrb[26].mxu1 }
 0xd07   : > { %v4184_v17 = vpop.f32.mrb[27].mxu1  ;;  %4202 = vmatmul.mubr.bf16.vlgmr.msra.gmra.mrb[28].mxu1 %v2274_v11  ;;  %v2774_v11 = vld [vmem:[#allocation10 + $0x1a8] sm:$0xff]  ;;  %v2788_v16 = vpack.c.bf16 %v2776_v15, %v2775_v13 }
 0xd08   : > { %4226 = vmatpush3.bf16.msra.mxu1 %v2397_v10  ;;  %4241 = vmatprep.mubr.msk.bf16.mxu1 %vm5089_vm0, %v5088_v3  ;;  %v2773_v10 = vld [vmem:[#allocation10 + $0x1a0] sm:$0xff] }
 0xd09   : > { %4227 = vmatprep.subr.bf16.mxu1 %v5088_v3  ;;  %v2787_v12 = vpack.c.bf16 %v2774_v11, %v2773_v10  ;;  %v2777_v17 = vld [vmem:[#allocation10 + $0x1c0] sm:$0xff] }
 0xd0c   : > { %4228 = vmatpush3.bf16.msra.mxu1 %v2398_v18  ;;  %v2778_v18 = vld [vmem:[#allocation10 + $0x1c8] sm:$0xff] }
 0xd0d   : > { %4229 = vmatprep.subr.bf16.mxu1 %v5088_v3  ;;  %v2789_v19 = vpack.c.bf16 %v2778_v18, %v2777_v17 }
 0xd10   : > { %4230 = vmatpush3.bf16.msra.mxu1 %v2399_v21  ;;  %v2780_v21 = vld [vmem:[#allocation10 + $0x1d8] sm:$0xff] }
 0xd11   : > { %4231 = vmatprep.subr.bf16.mxu1 %v5088_v3  ;;  %v2790_v24 = vpack.c.bf16 %v2780_v21, %v2779_v20  ;;  %v3753_v20 = vld [vmem:[%s6212_s1 + $0x3] ss:$0 sm:$0xff] }
 0xd14   : > { %4232 = vmatpush3.bf16.msra.mxu1 %v2400_v26  ;;  %v2782_v26 = vld [vmem:[#allocation10 + $0x1e8] sm:$0xff] }
 0xd15   : > { %4233 = vmatprep.subr.bf16.mxu1 %v5088_v3  ;;  %v2791_v27 = vpack.c.bf16 %v2782_v26, %v2781_v25 }
 0xd18   : > { %4234 = vmatpush3.bf16.msra.mxu1 %v2401_v29  ;;  %v2784_v29 = vld [vmem:[#allocation10 + $0x1f8] sm:$0xff] }
 0xd19   : > { %4235 = vmatprep.subr.bf16.mxu1 %v5088_v3  ;;  %v2792_v30 = vpack.c.bf16 %v2784_v29, %v2783_v28 }
 0xd1c   : > { %4236 = vmatpush3.bf16.msra.mxu1 %v2402_v32  ;;  %v2916_v32 = vld [vmem:[#allocation13 + $0x188] sm:$0xff] }
 0xd1d   : > { %4237 = vmatprep.subr.bf16.mxu1 %v5088_v3  ;;  %v2931_v33 = vpack.c.bf16 %v2916_v32, %v2915_v31 }
 0xd20   : > { %4238 = vmatpush3.bf16.msra.mxu1 %v2403_v35  ;;  %v2918_v35 = vld [vmem:[#allocation13 + $0x198] sm:$0xff] }
 0xd21   : > { %4239 = vmatprep.subr.bf16.mxu1 %v5088_v3  ;;  %v2932_v37 = vpack.c.bf16 %v2918_v35, %v2917_v34 }
 0xd24   : > { %4240 = vmatpush3.bf16.msra.mxu1 %v2404_v39  ;;  %v2920_v39 = vld [vmem:[#allocation13 + $0x1a8] sm:$0xff] }
 0xd25   : > { %4265 = vmatprep.subr.bf16.mxu1 %v5088_v3  ;;  %v2933_v41 = vpack.c.bf16 %v2920_v39, %v2919_v38 }
 0xd27   : > { %4242 = vmatmul.mubr.bf16.vlgmr.msra.gmra.mrb[32].mxu1 %v5748_v40 }
 0xd28   : > { %4266 = vmatpush3.bf16.msra.mxu1 %v2543_v43  ;;  %4281 = vmatprep.mubr.msk.bf16.mxu1 %vm5089_vm0, %v5088_v3  ;;  %v2922_v43 = vld [vmem:[#allocation13 + $0x1b8] sm:$0xff] }
 0xd29   : > { %4267 = vmatprep.subr.bf16.mxu1 %v5088_v3  ;;  %v2934_v44 = vpack.c.bf16 %v2922_v43, %v2921_v42 }
 0xd2c   : > { %4268 = vmatpush3.bf16.msra.mxu1 %v2544_v46  ;;  %v2924_v46 = vld [vmem:[#allocation13 + $0x1c8] sm:$0xff] }
 0xd2d   : > { %4269 = vmatprep.subr.bf16.mxu1 %v5088_v3  ;;  %v2935_v47 = vpack.c.bf16 %v2924_v46, %v2923_v45  ;;  %v2704_v45 = vld [vmem:[#allocation15 + $0x108] sm:$0xff] }
 0xd30   : > { %4270 = vmatpush3.bf16.msra.mxu1 %v2545_v49  ;;  %v2926_v49 = vld [vmem:[#allocation13 + $0x1d8] sm:$0xff] }
 0xd31   : > { %4271 = vmatprep.subr.bf16.mxu1 %v5088_v3  ;;  %v2936_v50 = vpack.c.bf16 %v2926_v49, %v2925_v48 }
 0xd34   : > { %4272 = vmatpush3.bf16.msra.mxu1 %v2546_v52  ;;  %v2928_v52 = vld [vmem:[#allocation13 + $0x1e8] sm:$0xff] }
 0xd35   : > { %4273 = vmatprep.subr.bf16.mxu1 %v5088_v3  ;;  %v2937_v53 = vpack.c.bf16 %v2928_v52, %v2927_v51  ;;  %v2706_v51 = vld [vmem:[#allocation15 + $0x118] sm:$0xff] }
 0xd38   : > { %4274 = vmatpush3.bf16.msra.mxu1 %v2547_v55  ;;  %v2930_v55 = vld [vmem:[#allocation13 + $0x1f8] sm:$0xff] }
 0xd39   : > { %4275 = vmatprep.subr.bf16.mxu1 %v5088_v3  ;;  %v2938_v56 = vpack.c.bf16 %v2930_v55, %v2929_v54  ;;  %v2708_v54 = vld [vmem:[#allocation15 + $0x128] sm:$0xff] }
 0xd3c   : > { %4276 = vmatpush3.bf16.msra.mxu1 %v2548_v58 }
 0xd3d   : > { %4277 = vmatprep.subr.bf16.mxu1 %v5088_v3 }
 0xd40   : > { %4278 = vmatpush3.bf16.msra.mxu1 %v2549_v63 }
 0xd41   : > { %4279 = vmatprep.subr.bf16.mxu1 %v5088_v3 }
 0xd44   : > { %4280 = vmatpush3.bf16.msra.mxu1 %v2550_v2 }
 0xd45   : > { %4317 = vmatprep.subr.bf16.mxu1 %v5088_v3 }
 0xd47   : > { %4282 = vmatmul.mubr.bf16.vlgmr.msra.gmra.mrb[36].mxu1 %v5748_v40 }
 0xd48   : > { %4318 = vmatpush3.bf16.msra.mxu1 %v2785_v6  ;;  %4333 = vmatprep.mubr.msk.bf16.mxu1 %vm5089_vm0, %v5088_v3 }
 0xd49   : > { %4319 = vmatprep.subr.bf16.mxu1 %v5088_v3 }
 0xd4c   : > { %4320 = vmatpush3.bf16.msra.mxu1 %v2786_v9 }
 0xd4d   : > { %4321 = vmatprep.subr.bf16.mxu1 %v5088_v3 }
 0xd50   : > { %4322 = vmatpush3.bf16.msra.mxu1 %v2787_v12 }
 0xd51   : > { %4323 = vmatprep.subr.bf16.mxu1 %v5088_v3 }
 0xd54   : > { %4324 = vmatpush3.bf16.msra.mxu1 %v2788_v16 }
 0xd55   : > { %4325 = vmatprep.subr.bf16.mxu1 %v5088_v3 }
 0xd58   : > { %4326 = vmatpush3.bf16.msra.mxu1 %v2789_v19 }
 0xd59   : > { %4327 = vmatprep.subr.bf16.mxu1 %v5088_v3 }
 0xd5c   : > { %4328 = vmatpush3.bf16.msra.mxu1 %v2790_v24 }
 0xd5d   : > { %4329 = vmatprep.subr.bf16.mxu1 %v5088_v3 }
 0xd60   : > { %4330 = vmatpush3.bf16.msra.mxu1 %v2791_v27 }
 0xd61   : > { %4331 = vmatprep.subr.bf16.mxu1 %v5088_v3 }
 0xd64   : > { %4332 = vmatpush3.bf16.msra.mxu1 %v2792_v30 }
 0xd65   : > { %4357 = vmatprep.subr.bf16.mxu1 %v5088_v3 }
 0xd67   : > { %4334 = vmatmul.mubr.bf16.vlgmr.msra.gmra.mrb[40].mxu1 %v5748_v40 }
 0xd68   : > { %4358 = vmatpush3.bf16.msra.mxu1 %v2931_v33  ;;  %4373 = vmatprep.mubr.msk.bf16.mxu1 %vm5089_vm0, %v5088_v3 }
 0xd69   : > { %4359 = vmatprep.subr.bf16.mxu1 %v5088_v3 }
 0xd6c   : > { %4360 = vmatpush3.bf16.msra.mxu1 %v2932_v37 }
 0xd6d   : > { %4361 = vmatprep.subr.bf16.mxu1 %v5088_v3 }
 0xd70   : > { %4362 = vmatpush3.bf16.msra.mxu1 %v2933_v41 }
 0xd71   : > { %4363 = vmatprep.subr.bf16.mxu1 %v5088_v3 }
 0xd74   : > { %4364 = vmatpush3.bf16.msra.mxu1 %v2934_v44  ;;  %v2703_v44 = vld [vmem:[#allocation15 + $0x100] sm:$0xff] }
 0xd75   : > { %4365 = vmatprep.subr.bf16.mxu1 %v5088_v3  ;;  %v2719_v48 = vpack.c.bf16 %v2704_v45, %v2703_v44 }
 0xd78   : > { %4366 = vmatpush3.bf16.msra.mxu1 %v2935_v47 }
 0xd79   : > { %4367 = vmatprep.subr.bf16.mxu1 %v5088_v3 }
 0xd7c   : > { %4368 = vmatpush3.bf16.msra.mxu1 %v2936_v50  ;;  %v2705_v50 = vld [vmem:[#allocation15 + $0x110] sm:$0xff] }
 0xd7d   : > { %4369 = vmatprep.subr.bf16.mxu1 %v5088_v3  ;;  %v2720_v52 = vpack.c.bf16 %v2706_v51, %v2705_v50  ;;  %v3751_v50 = vld [vmem:[%s6210_s17 + $0x3] ss:$0 sm:$0xff] }
 0xd80   : > { %4370 = vmatpush3.bf16.msra.mxu1 %v2937_v53  ;;  %v2707_v53 = vld [vmem:[#allocation15 + $0x120] sm:$0xff] }
 0xd81   : > { %4371 = vmatprep.subr.bf16.mxu1 %v5088_v3  ;;  %v2721_v55 = vpack.c.bf16 %v2708_v54, %v2707_v53 }
 0xd84   : > { %4372 = vmatpush3.bf16.msra.mxu1 %v2938_v56  ;;  %v2709_v56 = vld [vmem:[#allocation15 + $0x130] sm:$0xff] }
 0xd85   : > { %4383 = vmatprep.subr.bf16.mxu1 %v5088_v3 }
 0xd87   : > { %4374 = vmatmul.mubr.bf16.vlgmr.msra.gmra.mrb[44].mxu1 %v5748_v40 }
 0xd88   : > { %4385 = vmatprep.mubr.msk.bf16.mxu1 %vm5089_vm0, %v5088_v3 }
 0xdda   : > { %v2334_v57 = vpop.f32.mrb[28].mxu1 }
 0xddb   : > { %v5920_v58 = vadd.f32 %v5854_v14, %v2334_v57  ;;  %v4203_v59 = vpop.f32.mrb[29].mxu1  ;;  %v3746_v14 = vld [vmem:[%s6212_s1 + $0x2] ss:$0 sm:$0xff]  ;;  %v2710_v57 = vld [vmem:[#allocation15 + $0x138] sm:$0xff] }
 0xddc   : > { %v2337_v61 = vpop.f32.mrb[30].mxu1  ;;  %v2722_v59 = vpack.c.bf16 %v2710_v57, %v2709_v56 }
 0xddd   : > { %v4204_v63 = vpop.f32.mrb[31].mxu1  ;;  %v2711_v61 = vld [vmem:[#allocation15 + $0x140] sm:$0xff] }
 0xdde   : > { %v2712_v63 = vld [vmem:[#allocation15 + $0x148] sm:$0xff] }
 0xdfa   : > { %v2447_v1 = vpop.f32.mrb[32].mxu1 }
 0xdfb   : > { %v2448_v2 = vadd.f32 %v3742_v0, %v2447_v1  ;;  %v4243_v4 = vpop.f32.mrb[33].mxu1  ;;  %v2723_v0 = vpack.c.bf16 %v2712_v63, %v2711_v61  ;;  %v2713_v1 = vld [vmem:[#allocation15 + $0x150] sm:$0xff] }
 0xdfc   : > { %v2450_v5 = vpop.f32.mrb[34].mxu1 }
 0xdfd   : > { %v2599_v6 = vpack.c.bf16 %v2448_v2, %v2448_v2  ;;  %v4244_v7 = vpop.f32.mrb[35].mxu1  ;;  %v2714_v2 = vld [vmem:[#allocation15 + $0x158] sm:$0xff]  ;;  %v2715_v5 = vld [vmem:[#allocation15 + $0x160] sm:$0xff] }
 0xdfe   : > { %v2724_v4 = vpack.c.bf16 %v2714_v2, %v2713_v1 }
 0xdff   : > { %4288 = vmatmul.mubr.bf16.vlgmr.msra.gmra.mrb[36].mxu0 %v2599_v6  ;;  %v2716_v6 = vld [vmem:[#allocation15 + $0x168] sm:$0xff] }
 0xe00   : > { %4293 = vmatprep.mubr.msk.bf16.mxu0 %vm5089_vm0, %v5088_v3  ;;  %v2725_v7 = vpack.c.bf16 %v2716_v6, %v2715_v5 }
 0xe1a   : > { %v2593_v8 = vpop.f32.mrb[36].mxu1 }
 0xe1b   : > { %v2594_v9 = vadd.f32 %v3746_v14, %v2593_v8  ;;  %v4283_v10 = vpop.f32.mrb[37].mxu1  ;;  %v2717_v14 = vld [vmem:[#allocation15 + $0x170] sm:$0xff]  ;;  %v2718_v8 = vld [vmem:[#allocation15 + $0x178] sm:$0xff] }
 0xe1c   : > { %v2596_v11 = vpop.f32.mrb[38].mxu1  ;;  %v2842_v10 = vld [vmem:[#allocation12 + $0x180] sm:$0xff] }
 0xe1d   : > { %v2654_v12 = vpack.c.bf16 %v2594_v9, %v2594_v9  ;;  %v4284_v13 = vpop.f32.mrb[39].mxu1  ;;  %v2726_v9 = vpack.c.bf16 %v2718_v8, %v2717_v14  ;;  %v2843_v11 = vld [vmem:[#allocation12 + $0x188] sm:$0xff]  ;;  %v3091_v14 = vld [vmem:[#allocation15 + $0x180] sm:$0xff] }
 0xe1e   : > { %v2858_v13 = vpack.c.bf16 %v2843_v11, %v2842_v10  ;;  %v3092_v8 = vld [vmem:[#allocation15 + $0x188] sm:$0xff]  ;;  %v3094_v11 = vld [vmem:[#allocation15 + $0x198] sm:$0xff] }
 0xe1f   : > { %v2659_v15 = vsel %vm1884_vm12, %v2654_v12, 0  ;;  %v3107_v10 = vpack.c.bf16 %v3092_v8, %v3091_v14  ;;  %v3755_v8 = vld [vmem:[%s6215_s0] ss:$0 sm:$0xff]  ;;  %s950_s0 = scalar_lea.vmem [#allocation21], %s6219_s10 }
 0xe20   : > { %4292 = vmatpush3.bf16.msra.mxu0 %v2659_v15  ;;  %s3511_s16 = sshll.u32 %s950_s0, 4  ;;  %s6051_s16 = int_to_ptr.vmem [resolvable:$true] %s3511_s16 }
 0xe21   : > { %4297 = vmatprep.subr.bf16.mxu0 %v5088_v3  ;;  %s4983_s2 = scalar_lea.vmem %s6051_s16, 256 }
 0xe22   : > { %p4984_p10 = scmp.ne.s32.totalorder %s6051_s16, %s4983_s2 }
 0xe24   : > { %p4985_p7 = pnand %p4984_p10, %p6221_p8 }
 0xe26   : > { %p4986_p11 = pneg %p4985_p7 }
 0xe3a   : > { %v5932_v16 = vpop.f32.mrb[40].mxu1 }
 0xe3b   : > { %v4335_v17 = vpop.f32.mrb[41].mxu1 }
 0xe3c   : > { %v2838_v18 = vpop.f32.mrb[42].mxu1 }
 0xe3d   : > { %v4336_v19 = vpop.f32.mrb[43].mxu1  ;;  %v2844_v18 = vld [vmem:[#allocation12 + $0x190] sm:$0xff] }
 0xe3e   : > { %v2845_v19 = vld [vmem:[#allocation12 + $0x198] sm:$0xff] }
 0xe5a   : > { %v2981_v21 = vpop.f32.mrb[44].mxu1 }
 0xe5b   : > { %v2982_v24 = vadd.f32 %v3753_v20, %v2981_v21  ;;  %v4375_v25 = vpop.f32.mrb[45].mxu1 }
 0xe5c   : > { %v2984_v26 = vpop.f32.mrb[46].mxu1  ;;  %v2846_v25 = vld [vmem:[#allocation12 + $0x1a0] sm:$0xff] }
 0xe5d   : > { %v3042_v27 = vpack.c.bf16 %v2982_v24, %v2982_v24  ;;  %v4376_v28 = vpop.f32.mrb[47].mxu1  ;;  %v2859_v24 = vpack.c.bf16 %v2845_v19, %v2844_v18  ;;  %v2847_v26 = vld [vmem:[#allocation12 + $0x1a8] sm:$0xff]  ;;  %v3097_v18 = vld [vmem:[#allocation15 + $0x1b0] sm:$0xff]  ;;  %v3098_v19 = vld [vmem:[#allocation15 + $0x1b8] sm:$0xff] }
 0xe5e   : > { %v2848_v28 = vld [vmem:[#allocation12 + $0x1b0] sm:$0xff] }
 0xe5f   : > { %v3047_v29 = vsel %vm1884_vm12, %v3042_v27, 0  ;;  %v2860_v27 = vpack.c.bf16 %v2847_v26, %v2846_v25  ;;  %v3101_v26 = vld [vmem:[#allocation15 + $0x1d0] sm:$0xff] }
 0xe60   : > { %4384 = vmatpush3.bf16.msra.mxu1 %v3047_v29  ;;  %v2849_v29 = vld [vmem:[#allocation12 + $0x1b8] sm:$0xff] }
 0xed2   : > { %v2635_v30 = vpop.f32.mrb[36].mxu0 }
 0xed3   : > { %v2641_v31 = vmul.f32 0.5, %v2635_v30  ;;  %v4289_v32 = vpop.f32.mrb[37].mxu0  ;;  %v2861_v30 = vpack.c.bf16 %v2849_v29, %v2848_v28  ;;  %v3103_v29 = vld [vmem:[#allocation15 + $0x1e0] sm:$0xff] }
 0xed4   : > { %v2638_v33 = vpop.f32.mrb[38].mxu0  ;;  %v2851_v32 = vld [vmem:[#allocation12 + $0x1c8] sm:$0xff] }
 0xed5   : > { %v4290_v34 = vpop.f32.mrb[39].mxu0  ;;  %v2642_v35 = vsel %vm1867_vm13, %v2641_v31, -inf }
 0xed6   : > { %2643 = vmax.xlane.f32.xlu0 %v2642_v35  ;;  %v2852_v34 = vld [vmem:[#allocation12 + $0x1d0] sm:$0xff]  ;;  %v2853_v35 = vld [vmem:[#allocation12 + $0x1d8] sm:$0xff] }
 0xf63   : > { %v2644_v37 = vpop.xlane.xlu0 %2643 }
 0xf64   : > { %v2645_v38 = vsub.f32 %v2641_v31, %v2644_v37  ;;  %v2850_v31 = vld [vmem:[#allocation12 + $0x1c0] sm:$0xff]  ;;  %v2863_v37 = vpack.c.bf16 %v2853_v35, %v2852_v34 }
 0xf65   : > { %v2862_v33 = vpack.c.bf16 %v2851_v32, %v2850_v31 }
 0xf66   : > { %v2646_v39 = vmul.f32 1.442695, %v2645_v38  ;;  %v2854_v38 = vld [vmem:[#allocation12 + $0x1e0] sm:$0xff] }
 0xf68   : > { %4670 = vpow2.f32 %v2646_v39  ;;  %v2855_v39 = vld [vmem:[#allocation12 + $0x1e8] sm:$0xff] }
 0xf72   : > { %v4671_v41 = vpop.eup %4670 }
 0xf73   : > { %v2648_v42 = vsel %vm1867_vm13, %v4671_v41, 0.0 }
 0xf74   : > { %2649 = vadd.xlane.f32.xlu1 %v2648_v42  ;;  %v2856_v42 = vld [vmem:[#allocation12 + $0x1f0] sm:$0xff] }
0x1001   : > { %v2650_v43 = vpop.xlane.xlu1 %2649 }
0x1002   : > { %4672 = vrcp.f32 %v2650_v43  ;;  %v2857_v43 = vld [vmem:[#allocation12 + $0x1f8] sm:$0xff] }
0x1003   : > { %v2865_v44 = vpack.c.bf16 %v2857_v43, %v2856_v42 }
0x100c   : > { %v4673_v46 = vpop.eup %4672 }
0x100d   : > { %v2652_v47 = vmul.f32 %v4673_v46, %v4671_v41  ;;  %v2864_v41 = vpack.c.bf16 %v2855_v39, %v2854_v38  ;;  %v3106_v38 = vld [vmem:[#allocation15 + $0x1f8] sm:$0xff] }
0x100f   : > { %v2653_v49 = vpack.c.bf16 %v2652_v47, %v2652_v47 }
0x1011   : > { %4294 = vmatmul.mubr.msk.bf16.vlgmr.msra.gmra.mrb[40].mxu0 %vm1867_vm13, %v2653_v49 }
0x1012   : > { %4298 = vmatpush3.bf16.msra.mxu0 %v2719_v48  ;;  %4313 = vmatprep.mubr.msk.bf16.mxu0 %vm5089_vm0, %v5088_v3 }
0x1013   : > { %4299 = vmatprep.subr.bf16.mxu0 %v5088_v3 }
0x1016   : > { %4300 = vmatpush3.bf16.msra.mxu0 %v2720_v52 }
0x1017   : > { %4301 = vmatprep.subr.bf16.mxu0 %v5088_v3 }
0x101a   : > { %4302 = vmatpush3.bf16.msra.mxu0 %v2721_v55 }
0x101b   : > { %4303 = vmatprep.subr.bf16.mxu0 %v5088_v3 }
0x101e   : > { %4304 = vmatpush3.bf16.msra.mxu0 %v2722_v59 }
0x101f   : > { %4305 = vmatprep.subr.bf16.mxu0 %v5088_v3 }
0x1022   : > { %4306 = vmatpush3.bf16.msra.mxu0 %v2723_v0 }
0x1023   : > { %4307 = vmatprep.subr.bf16.mxu0 %v5088_v3 }
0x1026   : > { %4308 = vmatpush3.bf16.msra.mxu0 %v2724_v4 }
0x1027   : > { %4309 = vmatprep.subr.bf16.mxu0 %v5088_v3 }
0x102a   : > { %4310 = vmatpush3.bf16.msra.mxu0 %v2725_v7 }
0x102b   : > { %4311 = vmatprep.subr.bf16.mxu0 %v5088_v3 }
0x102e   : > { %4312 = vmatpush3.bf16.msra.mxu0 %v2726_v9  ;;  %v3093_v9 = vld [vmem:[#allocation15 + $0x190] sm:$0xff] }
0x102f   : > { %4337 = vmatprep.subr.bf16.mxu0 %v5088_v3 }
0x10e4   : > { %v2695_v12 = vpop.f32.mrb[40].mxu0 }
0x10e5   : > { %v2701_v15 = vpack.c.bf16 %v2695_v12, %v2695_v12  ;;  %v4295_v17 = vpop.f32.mrb[41].mxu0  ;;  %v3108_v12 = vpack.c.bf16 %v3094_v11, %v3093_v9  ;;  %v3259_v11 = vld [vmem:[#allocation16] sm:$0xff] }
0x10e6   : > { %v2698_v20 = vpop.f32.mrb[42].mxu0 }
0x10e7   : > { %v4296_v21 = vpop.f32.mrb[43].mxu0  ;;  %4314 = vmatmul.mubr.bf16.vlgmr.msra.gmra.mrb[44].mxu0 %v2701_v15  ;;  %v3096_v15 = vld [vmem:[#allocation15 + $0x1a8] sm:$0xff]  ;;  %v3110_v20 = vpack.c.bf16 %v3098_v19, %v3097_v18  ;;  %v3261_v18 = vld [vmem:[#allocation16 + $0x10] sm:$0xff] }
0x10e8   : > { %4338 = vmatpush3.bf16.msra.mxu0 %v2858_v13  ;;  %4353 = vmatprep.mubr.msk.bf16.mxu0 %vm5089_vm0, %v5088_v3  ;;  %v3095_v13 = vld [vmem:[#allocation15 + $0x1a0] sm:$0xff] }
0x10e9   : > { %4339 = vmatprep.subr.bf16.mxu0 %v5088_v3  ;;  %v3109_v17 = vpack.c.bf16 %v3096_v15, %v3095_v13  ;;  %v3099_v21 = vld [vmem:[#allocation15 + $0x1c0] sm:$0xff] }
0x10ec   : > { %4340 = vmatpush3.bf16.msra.mxu0 %v2859_v24  ;;  %v3100_v24 = vld [vmem:[#allocation15 + $0x1c8] sm:$0xff] }
0x10ed   : > { %4341 = vmatprep.subr.bf16.mxu0 %v5088_v3  ;;  %v3111_v25 = vpack.c.bf16 %v3100_v24, %v3099_v21  ;;  %v3265_v24 = vld [vmem:[#allocation16 + $0x30] sm:$0xff] }
0x10f0   : > { %4342 = vmatpush3.bf16.msra.mxu0 %v2860_v27  ;;  %v3102_v27 = vld [vmem:[#allocation15 + $0x1d8] sm:$0xff] }
0x10f1   : > { %4343 = vmatprep.subr.bf16.mxu0 %v5088_v3  ;;  %v3112_v28 = vpack.c.bf16 %v3102_v27, %v3101_v26  ;;  %v3267_v27 = vld [vmem:[#allocation16 + $0x40] sm:$0xff] }
0x10f4   : > { %4344 = vmatpush3.bf16.msra.mxu0 %v2861_v30  ;;  %v3104_v30 = vld [vmem:[#allocation15 + $0x1e8] sm:$0xff] }
0x10f5   : > { %4345 = vmatprep.subr.bf16.mxu0 %v5088_v3  ;;  %v3113_v31 = vpack.c.bf16 %v3104_v30, %v3103_v29  ;;  %v3269_v30 = vld [vmem:[#allocation16 + $0x50] sm:$0xff] }
0x10f8   : > { %4346 = vmatpush3.bf16.msra.mxu0 %v2862_v33 }
0x10f9   : > { %4347 = vmatprep.subr.bf16.mxu0 %v5088_v3 }
0x10fc   : > { %4348 = vmatpush3.bf16.msra.mxu0 %v2863_v37  ;;  %v3105_v37 = vld [vmem:[#allocation15 + $0x1f0] sm:$0xff] }
0x10fd   : > { %4349 = vmatprep.subr.bf16.mxu0 %v5088_v3  ;;  %v3114_v39 = vpack.c.bf16 %v3106_v38, %v3105_v37  ;;  %v3356_v37 = vld [vmem:[#allocation18 + $0x60] sm:$0xff]  ;;  %v3357_v38 = vld [vmem:[#allocation18 + $0x68] sm:$0xff] }
0x1100   : > { %4350 = vmatpush3.bf16.msra.mxu0 %v2864_v41 }
0x1101   : > { %4351 = vmatprep.subr.bf16.mxu0 %v5088_v3 }
0x1104   : > { %4352 = vmatpush3.bf16.msra.mxu0 %v2865_v44 }
0x1105   : > { %4377 = vmatprep.subr.bf16.mxu0 %v5088_v3 }
0x1107   : > { %4354 = vmatmul.mubr.bf16.vlgmr.msra.gmra.mrb[48].mxu0 %v5748_v40  ;;  %v3749_v40 = vld [vmem:[%s6211_s8 + $0x3] ss:$0 sm:$0xff] }
0x1108   : > { %4379 = vmatprep.mubr.msk.bf16.mxu0 %vm5089_vm0, %v5088_v3 }
0x11ba   : > { %v2761_v45 = vpop.f32.mrb[44].mxu0 }
0x11bb   : > { %v5965_v46 = vadd.f32 %v2761_v45, %v5920_v58  ;;  %v4315_v47 = vpop.f32.mrb[45].mxu0  ;;  %v2836_v58 = vadd.f32 %v3749_v40, %v5932_v16  ;;  %v3347_v40 = vld [vmem:[#allocation18 + $0x18] sm:$0xff] }
0x11bc   : > { %v2764_v48 = vpop.f32.mrb[46].mxu0  ;;  %v3166_v47 = vmul.u32 2, %v5642_v62  ;;  %v3345_v62 = vld [vmem:[#allocation18 + $0x8] sm:$0xff] }
0x11bd   : > { %v4316_v49 = vpop.f32.mrb[47].mxu0  ;;  %v2987_v57 = vpack.c.bf16 %v2836_v58, %v2836_v58 }
0x11be   : > { %v3169_v48 = vadd.s32 1, %v3166_v47  ;;  %v3165_v49 = vadd.s32 8, %v5639_v60  ;;  %vm3167_vm14 = vcmp.eq.s32.totalorder %v3166_v47, %v5639_v60 }
0x11c0   : > { %vm3170_vm15 = vcmp.eq.s32.totalorder %v3169_v48, %v5639_v60  ;;  %vm3168_vm2 = vcmp.eq.s32.totalorder %v3166_v47, %v3165_v49  ;;  %vm3171_vm3 = vcmp.eq.s32.totalorder %v3169_v48, %v3165_v49 }
0x11c1   : > { %vm3172_vm1 = vmor %vm3167_vm14, %vm3170_vm15 }
0x11c2   : > { %vm5995_vm4 = vmor %vm3168_vm2, %vm3171_vm3 }
0x11c3   : > { %v3757_v15 = vsel %vm5995_vm4, 1.0, %v5088_v3 }
0x11da   : > { %v2908_v51 = vpop.f32.mrb[48].mxu0 }
0x11db   : > { %v2909_v52 = vadd.f32 %v3751_v50, %v2908_v51  ;;  %v4355_v53 = vpop.f32.mrb[49].mxu0  ;;  %v3756_v50 = vsel %vm3172_vm1, 1.0, %v5088_v3  ;;  %v3420_v51 = vld [vmem:[#allocation19] sm:$0xff] }
0x11dc   : > { %v2911_v54 = vpop.f32.mrb[50].mxu0 }
0x11dd   : > { %v2988_v55 = vpack.c.bf16 %v2909_v52, %v2909_v52  ;;  %v4356_v56 = vpop.f32.mrb[51].mxu0  ;;  %v3344_v52 = vld [vmem:[#allocation18] sm:$0xff]  ;;  %v3346_v54 = vld [vmem:[#allocation18 + $0x10] sm:$0xff] }
0x11de   : > { %v3360_v53 = vpack.c.bf16 %v3345_v62, %v3344_v52  ;;  %v3361_v60 = vpack.c.bf16 %v3347_v40, %v3346_v54  ;;  %v3349_v56 = vld [vmem:[#allocation18 + $0x28] sm:$0xff]  ;;  %v3423_v54 = vld [vmem:[#allocation19 + $0x18] sm:$0xff] }
0x11df   : > { %4378 = vmatpush3.bf16.xpose.msra.mxu0 %v2988_v55  ;;  %v3348_v55 = vld [vmem:[#allocation18 + $0x20] sm:$0xff]  ;;  %v3421_v52 = vld [vmem:[#allocation19 + $0x8] sm:$0xff] }
0x11e0   : > { %4389 = vmatprep.subr.bf16.mxu0 %v5088_v3  ;;  %v3362_v58 = vpack.c.bf16 %v3349_v56, %v3348_v55  ;;  %v3437_v62 = vpack.c.bf16 %v3421_v52, %v3420_v51  ;;  %v3425_v55 = vld [vmem:[#allocation19 + $0x28] sm:$0xff] }
0x11e6   : > { %4380 = vmatmul.mubr.bf16.vlgmr.msra.gmra.mrb[52].mxu0 %v2987_v57  ;;  %v3350_v57 = vld [vmem:[#allocation18 + $0x30] sm:$0xff] }
0x11e7   : > { %4405 = vmatprep.mubr.msk.bf16.mxu0 %vm5089_vm0, %v5088_v3  ;;  %4390 = vmatpush3.bf16.msra.mxu0 %v3107_v10 }
0x11e8   : > { %4391 = vmatprep.subr.bf16.mxu0 %v5088_v3 }
0x11eb   : > { %4392 = vmatpush3.bf16.msra.mxu0 %v3108_v12  ;;  %v3260_v12 = vld [vmem:[#allocation16 + $0x8] sm:$0xff] }
0x11ec   : > { %4393 = vmatprep.subr.bf16.mxu0 %v5088_v3 }
0x11ef   : > { %4394 = vmatpush3.bf16.msra.mxu0 %v3109_v17  ;;  %v3276_v17 = vpack.c.bf16 %v3260_v12, %v3259_v11 }
0x11f0   : > { %4395 = vmatprep.subr.bf16.mxu0 %v5088_v3 }
0x11f3   : > { %4396 = vmatpush3.bf16.msra.mxu0 %v3110_v20  ;;  %v3264_v20 = vld [vmem:[#allocation16 + $0x28] sm:$0xff] }
0x11f4   : > { %4397 = vmatprep.subr.bf16.mxu0 %v5088_v3 }
0x11f7   : > { %4398 = vmatpush3.bf16.msra.mxu0 %v3111_v25  ;;  %v3266_v25 = vld [vmem:[#allocation16 + $0x38] sm:$0xff] }
0x11f8   : > { %4399 = vmatprep.subr.bf16.mxu0 %v5088_v3  ;;  %v3279_v26 = vpack.c.bf16 %v3266_v25, %v3265_v24 }
0x11fb   : > { %4400 = vmatpush3.bf16.msra.mxu0 %v3112_v28  ;;  %v3268_v28 = vld [vmem:[#allocation16 + $0x48] sm:$0xff] }
0x11fc   : > { %4401 = vmatprep.subr.bf16.mxu0 %v5088_v3  ;;  %v3280_v29 = vpack.c.bf16 %v3268_v28, %v3267_v27  ;;  %v3763_v27 = vld [vmem:[%s6217_s14] ss:$0 sm:$0xff]  ;;  %s6056_s14 = scalar_lea.hbm %s6220_s25, %s3771_s19 }
0x11ff   : > { %4402 = vmatpush3.bf16.msra.mxu0 %v3113_v31  ;;  %v3270_v31 = vld [vmem:[#allocation16 + $0x58] sm:$0xff] }
0x1200   : > { %4403 = vmatprep.subr.bf16.mxu0 %v5088_v3 }
0x1203   : > { %4404 = vmatpush3.bf16.msra.mxu0 %v3114_v39  ;;  %v3366_v39 = vpack.c.bf16 %v3357_v38, %v3356_v37  ;;  %v3764_v38 = vld [vmem:[%s6218_s12] ss:$0 sm:$0xff]  ;;  %s4987_s12 = sshll.u32 %s5092_s5, 4  ;;  %s4988_s12 = int_to_ptr.vmem [resolvable:$false] %s4987_s12 }
0x1204   : > { %4434 = vmatprep.subr.bf16.mxu0 %v5088_v3  ;;  %s4989_s10 = scalar_lea.vmem %s4988_s12, 512  ;;  %p4990_p1 = scmp.lt.s32.totalorder %s6051_s16, %s4988_s12 }
0x1205   : > { %p4991_p3 = scmp.lt.s32.totalorder %s4989_s10, %s4983_s2 }
0x1207   : > { %p4992_p0 = por %p4991_p3, %p4990_p1 }
0x1209   : > { %p4993_p12 = pnand %p4992_p0, %p4986_p11 }
0x12b9   : > { %v3023_v59 = vpop.f32.mrb[52].mxu0 }
0x12ba   : > { %v3029_v61 = vmul.f32 0.5, %v3023_v59  ;;  %v4381_v63 = vpop.f32.mrb[53].mxu0  ;;  %v3351_v59 = vld [vmem:[#allocation18 + $0x38] sm:$0xff] }
0x12bb   : > { %v3026_v0 = vpop.f32.mrb[54].mxu0  ;;  %v3352_v63 = vld [vmem:[#allocation18 + $0x40] sm:$0xff] }
0x12bc   : > { %v4382_v1 = vpop.f32.mrb[55].mxu0  ;;  %v3030_v2 = vsel %vm1867_vm13, %v3029_v61, -inf  ;;  %v3353_v0 = vld [vmem:[#allocation18 + $0x48] sm:$0xff] }
0x12bd   : > { %3031 = vmax.xlane.f32.xlu0 %v3030_v2  ;;  %v3364_v1 = vpack.c.bf16 %v3353_v0, %v3352_v63  ;;  %v3354_v2 = vld [vmem:[#allocation18 + $0x50] sm:$0xff]  ;;  %v3429_v63 = vld [vmem:[#allocation19 + $0x48] sm:$0xff] }
0x134a   : > { %v3032_v4 = vpop.xlane.xlu0 %3031 }
0x134b   : > { %v3033_v5 = vsub.f32 %v3029_v61, %v3032_v4  ;;  %v3363_v61 = vpack.c.bf16 %v3351_v59, %v3350_v57  ;;  %v3355_v4 = vld [vmem:[#allocation18 + $0x58] sm:$0xff] }
0x134c   : > { %v3427_v57 = vld [vmem:[#allocation19 + $0x38] sm:$0xff] }
0x134d   : > { %v3034_v6 = vmul.f32 1.442695, %v3033_v5  ;;  %v3365_v5 = vpack.c.bf16 %v3355_v4, %v3354_v2  ;;  %v3431_v2 = vld [vmem:[#allocation19 + $0x58] sm:$0xff] }
0x134f   : > { %4674 = vpow2.f32 %v3034_v6 }
0x1359   : > { %v4675_v16 = vpop.eup %4674 }
0x135a   : > { %v3036_v7 = vsel %vm1867_vm13, %v4675_v16, 0.0 }
0x135b   : > { %3037 = vadd.xlane.f32.xlu1 %v3036_v7 }
0x13e8   : > { %v3038_v32 = vpop.xlane.xlu1 %3037 }
0x13e9   : > { %4676 = vrcp.f32 %v3038_v32  ;;  %v3281_v32 = vpack.c.bf16 %v3270_v31, %v3269_v30 }
0x13f3   : > { %v4677_v33 = vpop.eup %4676 }
0x13f4   : > { %v3040_v34 = vmul.f32 %v4677_v33, %v4675_v16  ;;  %v3271_v33 = vld [vmem:[#allocation16 + $0x60] sm:$0xff] }
0x13f6   : > { %v3041_v35 = vpack.c.bf16 %v3040_v34, %v3040_v34  ;;  %v3272_v34 = vld [vmem:[#allocation16 + $0x68] sm:$0xff] }
0x13f8   : > { %4386 = vmatmul.mubr.msk.bf16.vlgmr.msra.gmra.mrb[48].mxu1 %vm1867_vm13, %v3041_v35  ;;  %v3282_v35 = vpack.c.bf16 %v3272_v34, %v3271_v33 }
0x13f9   : > { %4411 = vmatprep.mubr.msk.f32.mxu1 %vm1867_vm13, %v3756_v50 }
0x14cb   : > { %v3083_v41 = vpop.f32.mrb[48].mxu1 }
0x14cc   : > { %v3089_v42 = vpack.c.bf16 %v3083_v41, %v3083_v41  ;;  %v4387_v43 = vpop.f32.mrb[49].mxu1  ;;  %v3273_v41 = vld [vmem:[#allocation16 + $0x70] sm:$0xff] }
0x14cd   : > { %v3086_v44 = vpop.f32.mrb[50].mxu1  ;;  %v3358_v43 = vld [vmem:[#allocation18 + $0x70] sm:$0xff] }
0x14ce   : > { %v4388_v45 = vpop.f32.mrb[51].mxu1  ;;  %4406 = vmatmul.mubr.bf16.vlgmr.msra.gmra.mrb[56].mxu0 %v3089_v42  ;;  %v3274_v42 = vld [vmem:[#allocation16 + $0x78] sm:$0xff] }
0x14cf   : > { %4450 = vmatprep.mubr.msk.bf16.mxu0 %vm5089_vm0, %v5088_v3  ;;  %4435 = vmatpush3.bf16.msra.mxu0 %v3360_v53  ;;  %v3283_v44 = vpack.c.bf16 %v3274_v42, %v3273_v41  ;;  %v3359_v45 = vld [vmem:[#allocation18 + $0x78] sm:$0xff]  ;;  %v3422_v53 = vld [vmem:[#allocation19 + $0x10] sm:$0xff] }
0x14d0   : > { %4436 = vmatprep.subr.bf16.mxu0 %v5088_v3  ;;  %v3367_v47 = vpack.c.bf16 %v3359_v45, %v3358_v43  ;;  %v3438_v40 = vpack.c.bf16 %v3423_v54, %v3422_v53  ;;  %v4686_v43 = vld [vmem:[%s5592_s18] sm:$0xff] }
0x14d3   : > { %4437 = vmatpush3.bf16.msra.mxu0 %v3361_v60  ;;  %v3424_v60 = vld [vmem:[#allocation19 + $0x20] sm:$0xff] }
0x14d4   : > { %4438 = vmatprep.subr.bf16.mxu0 %v5088_v3  ;;  %v3439_v56 = vpack.c.bf16 %v3425_v55, %v3424_v60 }
0x14d7   : > { %4439 = vmatpush3.bf16.msra.mxu0 %v3362_v58  ;;  %v3426_v58 = vld [vmem:[#allocation19 + $0x30] sm:$0xff] }
0x14d8   : > { %4440 = vmatprep.subr.bf16.mxu0 %v5088_v3  ;;  %v3440_v59 = vpack.c.bf16 %v3427_v57, %v3426_v58 }
0x14db   : > { %4441 = vmatpush3.bf16.msra.mxu0 %v3363_v61  ;;  %v3428_v61 = vld [vmem:[#allocation19 + $0x40] sm:$0xff] }
0x14dc   : > { %4442 = vmatprep.subr.bf16.mxu0 %v5088_v3  ;;  %v3441_v0 = vpack.c.bf16 %v3429_v63, %v3428_v61 }
0x14df   : > { %4443 = vmatpush3.bf16.msra.mxu0 %v3364_v1  ;;  %v3430_v1 = vld [vmem:[#allocation19 + $0x50] sm:$0xff] }
0x14e0   : > { %4444 = vmatprep.subr.bf16.mxu0 %v5088_v3  ;;  %v3442_v4 = vpack.c.bf16 %v3431_v2, %v3430_v1 }
0x14e3   : > { %4445 = vmatpush3.bf16.msra.mxu0 %v3365_v5  ;;  %v3432_v5 = vld [vmem:[#allocation19 + $0x60] sm:$0xff] }
0x14e4   : > { %4446 = vmatprep.subr.bf16.mxu0 %v5088_v3 }
0x14e7   : > { %4447 = vmatpush3.bf16.msra.mxu0 %v3366_v39 }
0x14e8   : > { %4448 = vmatprep.subr.bf16.mxu0 %v5088_v3 }
0x14eb   : > { %4449 = vmatpush3.bf16.msra.mxu0 %v3367_v47  ;;  %v4687_v47 = vld [vmem:[%s5592_s18 + $0x8] sm:$0xff] }
0x15a1   : > { %v3149_v6 = vpop.f32.mrb[56].mxu0 }
0x15a2   : > { %v3155_v16 = vadd.f32 %v3149_v6, %v5965_v46  ;;  %v4407_v7 = vpop.f32.mrb[57].mxu0  ;;  %v3262_v46 = vld [vmem:[#allocation16 + $0x18] sm:$0xff]  ;;  %v3433_v6 = vld [vmem:[#allocation19 + $0x68] sm:$0xff] }
0x15a3   : > { %v3152_v14 = vpop.f32.mrb[58].mxu0  ;;  %v3277_v19 = vpack.c.bf16 %v3262_v46, %v3261_v18  ;;  %v3434_v7 = vld [vmem:[#allocation19 + $0x70] sm:$0xff] }
0x15a4   : > { %v3156_v9 = vadd.f32 %v3155_v16, %v5722_v36  ;;  %v4408_v10 = vpop.f32.mrb[59].mxu0  ;;  %v3263_v36 = vld [vmem:[#allocation16 + $0x20] sm:$0xff]  ;;  %v3443_v16 = vpack.c.bf16 %v3433_v6, %v3432_v5  ;;  %v3435_v14 = vld [vmem:[#allocation19 + $0x78] sm:$0xff] }
0x15a5   : > { %v3278_v21 = vpack.c.bf16 %v3264_v20, %v3263_v36 }
0x15a6   : > { %v3164_v13 = vadd.f32 %v3755_v8, %v3156_v9  ;;  %v3444_v8 = vpack.c.bf16 %v3435_v14, %v3434_v7  ;;  %v3760_v9 = vld [vmem:[%s6216_s13] ss:$0 sm:$0xff] }
0x15a8   : > { %4409 = vmatprep.subr.mxu1 %v3164_v13 }
0x15a9   : > { %4410 = vmatpush3.msra.mxu1 %v3164_v13 }
0x15aa   : > { %4412 = vmatmul.mubr.msk.f32.vlgmr.msra.gmra.mrb[52].mxu1 %vm1867_vm13, %v3757_v15  ;;  %4414 = vmatprep.subr.bf16.mxu1 %v5088_v3 }
0x15ab   : > { %4415 = vmatpush3.bf16.msra.mxu1 %v3276_v17  ;;  %4430 = vmatprep.mubr.msk.bf16.mxu1 %vm5089_vm0, %v5088_v3 }
0x15ac   : > { %4416 = vmatprep.subr.bf16.mxu1 %v5088_v3 }
0x15af   : > { %4417 = vmatpush3.bf16.msra.mxu1 %v3277_v19 }
0x15b0   : > { %4418 = vmatprep.subr.bf16.mxu1 %v5088_v3 }
0x15b3   : > { %4419 = vmatpush3.bf16.msra.mxu1 %v3278_v21 }
0x15b4   : > { %4420 = vmatprep.subr.bf16.mxu1 %v5088_v3 }
0x15b7   : > { %4421 = vmatpush3.bf16.msra.mxu1 %v3279_v26 }
0x15b8   : > { %4422 = vmatprep.subr.bf16.mxu1 %v5088_v3 }
0x15bb   : > { %4423 = vmatpush3.bf16.msra.mxu1 %v3280_v29 }
0x15bc   : > { %4424 = vmatprep.subr.bf16.mxu1 %v5088_v3 }
0x15bf   : > { %4425 = vmatpush3.bf16.msra.mxu1 %v3281_v32 }
0x15c0   : > { %4426 = vmatprep.subr.bf16.mxu1 %v5088_v3 }
0x15c3   : > { %4427 = vmatpush3.bf16.msra.mxu1 %v3282_v35 }
0x15c4   : > { %4428 = vmatprep.subr.bf16.mxu1 %v5088_v3 }
0x15c7   : > { %4429 = vmatpush3.bf16.msra.mxu1 %v3283_v44 }
0x15c8   : > { %4454 = vmatprep.subr.bf16.mxu1 %v5088_v3 }
0x167d   : > { %v4413_v48 = vpop.f32.mrb[52].mxu1 }
0x167e   : > { %v3250_v49 = vpop.f32.mrb[53].mxu1 }
0x167f   : > { %v3275_v50 = vpack.c.bf16 %v4413_v48, %v3250_v49 }
0x1681   : > { %4431 = vmatmul.mubr.bf16.vlgmr.msra.gmra.mrb[56].mxu1 %v3275_v50  ;;  %4451 = vmatmul.mubr.bf16.vlgmr.msra.gmra.mrb[60].mxu0 %v3275_v50 }
0x1682   : > { %4470 = vmatprep.mubr.msk.bf16.mxu1 %vm5089_vm0, %v5088_v3  ;;  %4455 = vmatpush3.bf16.msra.mxu1 %v3437_v62 }
0x1683   : > { %4456 = vmatprep.subr.bf16.mxu1 %v5088_v3 }
0x1686   : > { %4457 = vmatpush3.bf16.msra.mxu1 %v3438_v40 }
0x1687   : > { %4458 = vmatprep.subr.bf16.mxu1 %v5088_v3 }
0x168a   : > { %4459 = vmatpush3.bf16.msra.mxu1 %v3439_v56 }
0x168b   : > { %4460 = vmatprep.subr.bf16.mxu1 %v5088_v3 }
0x168e   : > { %4461 = vmatpush3.bf16.msra.mxu1 %v3440_v59 }
0x168f   : > { %4462 = vmatprep.subr.bf16.mxu1 %v5088_v3 }
0x1692   : > { %4463 = vmatpush3.bf16.msra.mxu1 %v3441_v0 }
0x1693   : > { %4464 = vmatprep.subr.bf16.mxu1 %v5088_v3 }
0x1696   : > { %4465 = vmatpush3.bf16.msra.mxu1 %v3442_v4 }
0x1697   : > { %4466 = vmatprep.subr.bf16.mxu1 %v5088_v3 }
0x169a   : > { %4467 = vmatpush3.bf16.msra.mxu1 %v3443_v16 }
0x169b   : > { %4468 = vmatprep.subr.bf16.mxu1 %v5088_v3 }
0x169e   : > { %4469 = vmatpush3.bf16.msra.mxu1 %v3444_v8 }
0x1754   : > { %v3325_v10 = vpop.f32.mrb[56].mxu1  ;;  %v3409_v11 = vpop.f32.mrb[60].mxu0 }
0x1755   : > { %v3326_v12 = vadd.f32 %v3760_v9, %v3325_v10  ;;  %v4432_v13 = vpop.f32.mrb[57].mxu1  ;;  %v4452_v15 = vpop.f32.mrb[61].mxu0  ;;  %v3410_v29 = vadd.f32 %v3763_v27, %v3409_v11 }
0x1756   : > { %v3328_v17 = vpop.f32.mrb[58].mxu1  ;;  %v3412_v18 = vpop.f32.mrb[62].mxu0 }
0x1757   : > { %v3761_v46 = vmul.f32 -1.442695, %v3326_v12  ;;  %v3329_v19 = vadd.f32 %v3760_v9, %v3328_v17  ;;  %v4433_v36 = vpop.f32.mrb[59].mxu1  ;;  %v4453_v20 = vpop.f32.mrb[63].mxu0  ;;  %v3413_v33 = vadd.f32 %v3763_v27, %v3412_v18 }
0x1759   : > { %4678 = vpow2.f32 %v3761_v46  ;;  %v3762_v3 = vmul.f32 -1.442695, %v3329_v19 }
0x175b   : > { %4680 = vpow2.f32 %v3762_v3 }
0x1763   : > { %v4679_v21 = vpop.eup %4678 }
0x1764   : > { %v3338_v24 = vadd.f32 1.0, %v4679_v21 }
0x1765   : > { %v4681_v25 = vpop.eup %4680 }
0x1766   : > { %4682 = vrcp.f32 %v3338_v24  ;;  %v3339_v26 = vadd.f32 1.0, %v4681_v25 }
0x1768   : > { %4684 = vrcp.f32 %v3339_v26 }
0x1770   : > { %v4683_v28 = vpop.eup %4682 }
0x1771   : > { %v3416_v30 = vmul.f32 %v4683_v28, %v5664_v22 }
0x1772   : > { %v4685_v31 = vpop.eup %4684 }
0x1773   : > { %v3418_v32 = vadd.f32 %v3416_v30, %v3410_v29  ;;  %v3417_v34 = vmul.f32 %v4685_v31, %v5666_v23 }
0x1775   : > { %v3419_v35 = vadd.f32 %v3417_v34, %v3413_v33 }
0x1777   : > { %v3436_v37 = vpack.c.bf16 %v3419_v35, %v3418_v32 }
0x1779   : > { %4471 = vmatmul.mubr.bf16.vlgmr.msra.gmra.mrb[60].mxu1 %v3436_v37 }
0x184c   : > { %v3486_v39 = vpop.f32.mrb[60].mxu1 }
0x184d   : > { %v3487_v22 = vadd.f32 %v3764_v38, %v3486_v39  ;;  %v4472_v41 = vpop.f32.mrb[61].mxu1 }
0x184e   : > { %v3489_v42 = vpop.f32.mrb[62].mxu1 }
0x184f   : > { %v3493_v23 = vadd.f32 %v4686_v43, %v3487_v22  ;;  %v3490_v44 = vadd.f32 %v3764_v38, %v3489_v42  ;;  %v4473_v45 = vpop.f32.mrb[63].mxu1 }
0x1851   : > { %3495 = vst [vmem:[%s950_s0] sm:$0xff] %v3493_v23  ;;  %v3494_v48 = vadd.f32 %v4687_v47, %v3490_v44 }
0x1853   : > { %3496 = vst [vmem:[%s950_s0 + $0x8] sm:$0xff] %v3494_v48 }
0x1854   : > { %4996 = shalt.err (!%p4993_p12)
}
0x1855   : > { %s4997_s18 = scalar_lea.hbm %s6056_s14, 256  ;;  %s5001_s13 = scalar_lea.hbm %s6220_s25, 512 }
0x1856   : > { %p4998_p13 = scmp.ne.s32.totalorder %s6056_s14, %s4997_s18  ;;  %p5002_p5 = scmp.lt.u32.totalorder %s6056_s14, %s6220_s25 }
0x1857   : > { %p5003_p9 = scmp.lt.u32.totalorder %s5001_s13, %s4997_s18  ;;  %p5005_p10 = scmp.lt.u32.totalorder %s4997_s18, %s6056_s14 }
0x1858   : > { %p4999_p2 = pnand %p4998_p13, %p6221_p8 }
0x1859   : > { %p5004_p4 = por %p5003_p9, %p5002_p5 }
0x185a   : > { %p5000_p6 = pneg %p4999_p2 }
0x185b   : > { %p5006_p7 = por %p5005_p10, %p5004_p4 }
0x185d   : > { %p5007_p11 = pnand %p5006_p7, %p5000_p6 }
0x185f   : > { %5010 = shalt.err (!%p5007_p11)
}
0x1860   : > { %s5093_s2 = smov 128   ;;  %s5094_s12 = smov 8  }
0x1861   : > { %4543 = dma.vmem_to_hbm [thread:$0]  (%p6221_p8), %s6051_s16, 256, %s6056_s14, %s3498_s29, %s5093_s2, %s5093_s2, %s5094_s12  }
0x1862 PF: > { %s3526_s10 = sand.u32 1, %s5061_s27   ;;  %p6222_p1 = scmp.ne.s32.totalorder %s6185_s30, 0 }
0x1863   : > { %p6223_p3 = scmp.ge.s32.totalorder %s5073_s28, 2  ;;  %s3527_s18 = scalar_lea.sflag [#allocation4], %s3526_s10 }
0x1865   : > { %p4581_p0 = pnand %p6223_p3, %p6222_p1 }
0x1867   : > { %5056 = dma.done.wait (!%p4581_p0), %s3527_s18, 256  }
0x1868   : > { %5058 = vsyncadd (!%p4581_p0), %s3527_s18, 4294967040  ;;  %p45_p12 = scmp.ge.s32.totalorder %s5500_s9, 4   ;;  %s6224_s27 = smov %s5065_s3 }
0x1869   : > { %s6225_s3 = smov %s5069_s7  ;;  %s6226_s7 = smov %s5511_s15 }
0x186a   : > { %s6227_s28 = smov %s5500_s9  ;;  %47 = sbr.rel (!%p45_p12) target bundleno = 35 (0x23), region = 231 }
0x1871   :  { %3532 = vsyncpa [#allocation3], 1 }
0x1872   :  { %3534 = vsyncpa [#allocation3 + $0x1], 1 }
0x1873   :  { %3535 = vsyncpa [#allocation8], 1 }
0x1874   :  { %3536 = vsyncpa [#allocation11], 1 }
0x1875   :  { %3537 = vsyncpa [#allocation14], 1 }
0x1876   :  { %3538 = vsyncpa [#allocation17], 1 }
0x1877   :  { %3539 = vsyncpa [#allocation20], 1 }
0x1878   :  { %3540 = vsyncpa [#allocation4], 1 }
0x1879   :  { %3542 = vsyncpa [#allocation4 + $0x1], 1 }
0x187a   :  { %3543 = vsyncpa [#allocation5], 1 }
0x187b   :  { %3545 = vsyncpa [#allocation5 + $0x1], 1 }

</bundles_post_ra>
